<compile_context>
chip_gen: v7x
topology: tpu7x:2x2x1
jax: 0.10.0
libtpu: 0.0.40
codegen_flags: <defaults>
</compile_context>

<pallas_src>
import functools

import jax
import jax.numpy as jnp
from jax.experimental import pallas as pl
from jax.experimental.pallas import tpu as pltpu

# ----- model hyper-params (small but structurally faithful) -----
LATENT_DIM = 32
CHANNELS = 1
IMG_SIZE = 8
IMG_SHAPE = (CHANNELS, IMG_SIZE, IMG_SIZE)
IMG_FLAT = CHANNELS * IMG_SIZE * IMG_SIZE   # 64
OUT_PAD = 128                               # lane-dense final layer width
HIDDEN = (128, 256, 512, 1024)
BN_EPS = 0.8
LRELU_SLOPE = 0.2
SUBLANE_PAD = 16                            # pad batch rows to a multiple of this


def _linear(x, w_ref, b_ref):
    # x: (B, in) f32; w: (in, out) bf16; b: (1, out) f32.
    # bf16 MXU inputs, f32 accumulation.
    return jnp.dot(x.astype(jnp.bfloat16), w_ref[...],
                   preferred_element_type=jnp.float32) + b_ref[...]


def _leaky_relu(x):
    return jnp.where(x > 0, x, LRELU_SLOPE * x)


def _batchnorm(x, g_ref, be_ref, mask, inv_n):
    # Training-mode BN over the (real) batch rows, biased variance, eps = 0.8.
    # Single pair of reductions: var = E[x^2] - mean^2 (benign with eps=0.8).
    if mask is None:
        s1 = jnp.sum(x, axis=0, keepdims=True)
        s2 = jnp.sum(x * x, axis=0, keepdims=True)
    else:
        xm = jnp.where(mask, x, 0.0)
        s1 = jnp.sum(xm, axis=0, keepdims=True)
        s2 = jnp.sum(xm * xm, axis=0, keepdims=True)
    mean = s1 * inv_n
    var = s2 * inv_n - mean * mean
    scale = g_ref[...] * jax.lax.rsqrt(var + BN_EPS)   # fold gamma * inv into one scale
    shift = be_ref[...] - mean * scale
    return x * scale + shift


def generator_kernel(b_real,
                     z_ref,
                     w1, b1,
                     w2, b2, g2, be2,
                     w3, b3, g3, be3,
                     w4, b4, g4, be4,
                     w5, b5,
                     out_ref):
    b_pad = z_ref.shape[0]
    if b_real == b_pad:
        mask = None                                    # no padded rows -> no masking
    else:
        row = jax.lax.broadcasted_iota(jnp.int32, (b_pad, 1), 0)
        mask = row < b_real
    inv_n = jnp.float32(1.0 / b_real)

    x = z_ref[...].astype(jnp.float32)

    # block(latent, 128, normalize=False)
    h = _leaky_relu(_linear(x, w1, b1))
    # block(128, 256)
    h = _leaky_relu(_batchnorm(_linear(h, w2, b2), g2, be2, mask, inv_n))
    # block(256, 512)
    h = _leaky_relu(_batchnorm(_linear(h, w3, b3), g3, be3, mask, inv_n))
    # block(512, 1024)
    h = _leaky_relu(_batchnorm(_linear(h, w4, b4), g4, be4, mask, inv_n))
    # Linear(1024, OUT_PAD) + Tanh  (lane-dense 128-wide store; cols >= IMG_FLAT are 0)
    out_ref[...] = jnp.tanh(_linear(h, w5, b5)).astype(out_ref.dtype)


@jax.jit
def generator_forward(z, params):
    """z: (B, LATENT_DIM) float32 -> img: (B, C, H, W) float32."""
    B = z.shape[0]
    B_pad = max(SUBLANE_PAD, ((B + SUBLANE_PAD - 1) // SUBLANE_PAD) * SUBLANE_PAD)
    if B_pad != B:
        z = jnp.pad(z, ((0, B_pad - B), (0, 0)))

    flat_args = (z,) + tuple(params)
    n_in = len(flat_args)

    out_flat = pl.pallas_call(
        functools.partial(generator_kernel, B),
        out_shape=jax.ShapeDtypeStruct((B_pad, OUT_PAD), jnp.float32),
        in_specs=[pl.BlockSpec(memory_space=pltpu.MemorySpace.VMEM)] * n_in,
        out_specs=pl.BlockSpec(memory_space=pltpu.MemorySpace.VMEM),
        compiler_params=pltpu.CompilerParams(vmem_limit_bytes=32 * 1024 * 1024),
    )(*flat_args)

    return out_flat[:B, :IMG_FLAT].reshape(B, *IMG_SHAPE)


def init_params(key):
    """Deterministic parameter init mimicking PyTorch nn.Linear default
    (uniform(-1/sqrt(fan_in), 1/sqrt(fan_in))) and BatchNorm1d (gamma=1, beta=0).
    Weights are stored as (in, out) bf16 (x @ W == x @ W_pt.T); biases/gamma/beta
    stay f32.  The final layer is lane-padded from IMG_FLAT=64 to OUT_PAD=128."""
    dims = (LATENT_DIM,) + HIDDEN + (IMG_FLAT,)
    layers = []
    keys = jax.random.split(key, 2 * (len(dims) - 1))
    for i in range(len(dims) - 1):
        fan_in, fan_out = dims[i], dims[i + 1]
        bound = 1.0 / (fan_in ** 0.5)
        w = jax.random.uniform(keys[2 * i], (fan_in, fan_out), jnp.float32,
                               minval=-bound, maxval=bound)
        b = jax.random.uniform(keys[2 * i + 1], (1, fan_out), jnp.float32,
                               minval=-bound, maxval=bound)
        layers.append((w, b))

    # lane-pad the final linear to OUT_PAD columns (zeros -> tanh(0)=0, sliced away)
    w5, b5 = layers[4]
    w5 = jnp.pad(w5, ((0, 0), (0, OUT_PAD - IMG_FLAT)))
    b5 = jnp.pad(b5, ((0, 0), (0, OUT_PAD - IMG_FLAT)))
    layers[4] = (w5, b5)

    flat = []
    # layer 1: no BN
    flat += [layers[0][0].astype(jnp.bfloat16), layers[0][1]]
    # layers 2-4: linear + BN (gamma ones, beta zeros)
    for i in (1, 2, 3):
        w, b = layers[i]
        n = w.shape[1]
        flat += [w.astype(jnp.bfloat16), b,
                 jnp.ones((1, n), jnp.float32), jnp.zeros((1, n), jnp.float32)]
    # final linear
    flat += [layers[4][0].astype(jnp.bfloat16), layers[4][1]]
    return tuple(flat)


def reference_forward(z, params):
    """Pure-JAX reference (same bf16 weights, textbook (x-mean)^2 variance)."""
    (w1, b1, w2, b2, g2, be2, w3, b3, g3, be3,
     w4, b4, g4, be4, w5, b5) = params

    def lin(x, w, b):
        return jnp.dot(x.astype(jnp.bfloat16), w,
                       preferred_element_type=jnp.float32) + b

    def lrelu(x):
        return jnp.where(x > 0, x, LRELU_SLOPE * x)

    def bn(x, g, be):
        mean = jnp.mean(x, axis=0, keepdims=True)
        var = jnp.mean((x - mean) ** 2, axis=0, keepdims=True)
        return (x - mean) * jax.lax.rsqrt(var + BN_EPS) * g + be

    h = lrelu(lin(z, w1, b1))
    h = lrelu(bn(lin(h, w2, b2), g2, be2))
    h = lrelu(bn(lin(h, w3, b3), g3, be3))
    h = lrelu(bn(lin(h, w4, b4), g4, be4))
    out = jnp.tanh(lin(h, w5, b5))
    return out[:, :IMG_FLAT].reshape(z.shape[0], *IMG_SHAPE)


if __name__ == "__main__":
    key = jax.random.PRNGKey(0)
    k_param, k_z = jax.random.split(key)

    params = init_params(k_param)
    B = 2
    z = jax.random.normal(k_z, (B, LATENT_DIM), jnp.float32)

    img = generator_forward(z, params)
    img = jax.block_until_ready(img)

    assert img.shape == (B, CHANNELS, IMG_SIZE, IMG_SIZE), img.shape
    assert img.dtype == jnp.float32
    assert bool(jnp.all(jnp.isfinite(img)))
    # tanh output range sanity check
    assert bool(jnp.all(jnp.abs(img) <= 1.0 + 1e-6))

    # numerical check vs. pure-JAX reference (batch padding + E[x^2]-mean^2 rewrite
    # must not change the result beyond tiny accumulation-order noise)
    ref = reference_forward(z, params)
    assert bool(jnp.allclose(img, ref, atol=2e-2, rtol=0.0)), \
        float(jnp.max(jnp.abs(img - ref)))

    print("KERNEL_OK")
</pallas_src>

<mosaic_0001>
module attributes {stable_mosaic.version = 11 : i64} {
  func.func @generator_kernel(%arg0: memref<16x32xf32, #tpu.memory_space<vmem>>, %arg1: memref<32x128xbf16, #tpu.memory_space<vmem>>, %arg2: memref<1x128xf32, #tpu.memory_space<vmem>>, %arg3: memref<128x256xbf16, #tpu.memory_space<vmem>>, %arg4: memref<1x256xf32, #tpu.memory_space<vmem>>, %arg5: memref<1x256xf32, #tpu.memory_space<vmem>>, %arg6: memref<1x256xf32, #tpu.memory_space<vmem>>, %arg7: memref<256x512xbf16, #tpu.memory_space<vmem>>, %arg8: memref<1x512xf32, #tpu.memory_space<vmem>>, %arg9: memref<1x512xf32, #tpu.memory_space<vmem>>, %arg10: memref<1x512xf32, #tpu.memory_space<vmem>>, %arg11: memref<512x1024xbf16, #tpu.memory_space<vmem>>, %arg12: memref<1x1024xf32, #tpu.memory_space<vmem>>, %arg13: memref<1x1024xf32, #tpu.memory_space<vmem>>, %arg14: memref<1x1024xf32, #tpu.memory_space<vmem>>, %arg15: memref<1024x128xbf16, #tpu.memory_space<vmem>>, %arg16: memref<1x128xf32, #tpu.memory_space<vmem>>, %arg17: memref<16x128xf32, #tpu.memory_space<vmem>>) attributes {dimension_semantics = [], scalar_prefetch = 0 : i64, scratch_operands = 0 : i64, tpu.core_type = #tpu.core_type<tc>} {
    %0 = tpu.iota {dimensions = array<i32: 0>} : vector<16x1xi32>
    %c2_i32 = arith.constant 2 : i32
    %1 = vector.broadcast %c2_i32 : i32 to vector<16x1xi32>
    %2 = arith.cmpi slt, %0, %1 : vector<16x1xi32>
    %c0 = arith.constant 0 : index
    %c0_0 = arith.constant 0 : index
    %3 = vector.load %arg0[%c0, %c0_0] : memref<16x32xf32, #tpu.memory_space<vmem>>, vector<16x32xf32>
    %4 = arith.truncf %3 : vector<16x32xf32> to vector<16x32xbf16>
    %c0_1 = arith.constant 0 : index
    %c0_2 = arith.constant 0 : index
    %5 = vector.load %arg1[%c0_1, %c0_2] : memref<32x128xbf16, #tpu.memory_space<vmem>>, vector<32x128xbf16>
    %cst = arith.constant dense<0.000000e+00> : vector<16x128xf32>
    %6 = tpu.matmul %4, %5, %cst {dimension_numbers = #tpu.dot_dimension_numbers<[1], [0], [0], [1], [0, 0, 1, 1], [], []>} : vector<16x32xbf16>, vector<32x128xbf16>, vector<16x128xf32> -> vector<16x128xf32>
    %c0_3 = arith.constant 0 : index
    %c0_4 = arith.constant 0 : index
    %7 = vector.load %arg2[%c0_3, %c0_4] : memref<1x128xf32, #tpu.memory_space<vmem>>, vector<1x128xf32>
    %8 = vector.broadcast %7 : vector<1x128xf32> to vector<16x128xf32>
    %9 = arith.addf %6, %8 : vector<16x128xf32>
    %cst_5 = arith.constant 0.000000e+00 : f32
    %10 = vector.broadcast %cst_5 : f32 to vector<16x128xf32>
    %11 = arith.cmpf ogt, %9, %10 : vector<16x128xf32>
    %cst_6 = arith.constant 2.000000e-01 : f32
    %12 = vector.broadcast %cst_6 : f32 to vector<16x128xf32>
    %13 = arith.mulf %12, %9 : vector<16x128xf32>
    %14 = arith.select %11, %9, %13 : vector<16x128xi1>, vector<16x128xf32>
    %15 = arith.truncf %14 : vector<16x128xf32> to vector<16x128xbf16>
    %c0_7 = arith.constant 0 : index
    %c0_8 = arith.constant 0 : index
    %16 = vector.load %arg3[%c0_7, %c0_8] : memref<128x256xbf16, #tpu.memory_space<vmem>>, vector<128x256xbf16>
    %cst_9 = arith.constant dense<0.000000e+00> : vector<16x256xf32>
    %17 = tpu.matmul %15, %16, %cst_9 {dimension_numbers = #tpu.dot_dimension_numbers<[1], [0], [0], [1], [0, 0, 1, 1], [], []>} : vector<16x128xbf16>, vector<128x256xbf16>, vector<16x256xf32> -> vector<16x256xf32>
    %c0_10 = arith.constant 0 : index
    %c0_11 = arith.constant 0 : index
    %18 = vector.load %arg4[%c0_10, %c0_11] : memref<1x256xf32, #tpu.memory_space<vmem>>, vector<1x256xf32>
    %19 = vector.broadcast %18 : vector<1x256xf32> to vector<16x256xf32>
    %20 = arith.addf %17, %19 : vector<16x256xf32>
    %cst_12 = arith.constant 0.000000e+00 : f32
    %21 = vector.shape_cast %2 : vector<16x1xi1> to vector<16x1xi1>
    %22 = vector.broadcast %21 : vector<16x1xi1> to vector<16x256xi1>
    %23 = vector.broadcast %cst_12 : f32 to vector<16x256xf32>
    %24 = arith.select %22, %20, %23 : vector<16x256xi1>, vector<16x256xf32>
    %cst_13 = arith.constant dense<0.000000e+00> : vector<256xf32>
    %25 = vector.multi_reduction <add>, %24, %cst_13 [0] : vector<16x256xf32> to vector<256xf32>
    %26 = vector.shape_cast %25 : vector<256xf32> to vector<1x256xf32>
    %27 = arith.mulf %24, %24 : vector<16x256xf32>
    %cst_14 = arith.constant dense<0.000000e+00> : vector<256xf32>
    %28 = vector.multi_reduction <add>, %27, %cst_14 [0] : vector<16x256xf32> to vector<256xf32>
    %29 = vector.shape_cast %28 : vector<256xf32> to vector<1x256xf32>
    %cst_15 = arith.constant 5.000000e-01 : f32
    %30 = vector.broadcast %cst_15 : f32 to vector<1x256xf32>
    %31 = arith.mulf %26, %30 : vector<1x256xf32>
    %cst_16 = arith.constant 5.000000e-01 : f32
    %32 = vector.broadcast %cst_16 : f32 to vector<1x256xf32>
    %33 = arith.mulf %29, %32 : vector<1x256xf32>
    %34 = arith.mulf %31, %31 : vector<1x256xf32>
    %35 = arith.subf %33, %34 : vector<1x256xf32>
    %c0_17 = arith.constant 0 : index
    %c0_18 = arith.constant 0 : index
    %36 = vector.load %arg5[%c0_17, %c0_18] : memref<1x256xf32, #tpu.memory_space<vmem>>, vector<1x256xf32>
    %cst_19 = arith.constant 8.000000e-01 : f32
    %37 = vector.broadcast %cst_19 : f32 to vector<1x256xf32>
    %38 = arith.addf %35, %37 : vector<1x256xf32>
    %39 = math.rsqrt %38 : vector<1x256xf32>
    %40 = arith.mulf %36, %39 : vector<1x256xf32>
    %c0_20 = arith.constant 0 : index
    %c0_21 = arith.constant 0 : index
    %41 = vector.load %arg6[%c0_20, %c0_21] : memref<1x256xf32, #tpu.memory_space<vmem>>, vector<1x256xf32>
    %42 = arith.mulf %31, %40 : vector<1x256xf32>
    %43 = arith.subf %41, %42 : vector<1x256xf32>
    %44 = vector.broadcast %40 : vector<1x256xf32> to vector<16x256xf32>
    %45 = arith.mulf %20, %44 : vector<16x256xf32>
    %46 = vector.broadcast %43 : vector<1x256xf32> to vector<16x256xf32>
    %47 = arith.addf %45, %46 : vector<16x256xf32>
    %cst_22 = arith.constant 0.000000e+00 : f32
    %48 = vector.broadcast %cst_22 : f32 to vector<16x256xf32>
    %49 = arith.cmpf ogt, %47, %48 : vector<16x256xf32>
    %cst_23 = arith.constant 2.000000e-01 : f32
    %50 = vector.broadcast %cst_23 : f32 to vector<16x256xf32>
    %51 = arith.mulf %50, %47 : vector<16x256xf32>
    %52 = arith.select %49, %47, %51 : vector<16x256xi1>, vector<16x256xf32>
    %53 = arith.truncf %52 : vector<16x256xf32> to vector<16x256xbf16>
    %c0_24 = arith.constant 0 : index
    %c0_25 = arith.constant 0 : index
    %54 = vector.load %arg7[%c0_24, %c0_25] : memref<256x512xbf16, #tpu.memory_space<vmem>>, vector<256x512xbf16>
    %cst_26 = arith.constant dense<0.000000e+00> : vector<16x512xf32>
    %55 = tpu.matmul %53, %54, %cst_26 {dimension_numbers = #tpu.dot_dimension_numbers<[1], [0], [0], [1], [0, 0, 1, 1], [], []>} : vector<16x256xbf16>, vector<256x512xbf16>, vector<16x512xf32> -> vector<16x512xf32>
    %c0_27 = arith.constant 0 : index
    %c0_28 = arith.constant 0 : index
    %56 = vector.load %arg8[%c0_27, %c0_28] : memref<1x512xf32, #tpu.memory_space<vmem>>, vector<1x512xf32>
    %57 = vector.broadcast %56 : vector<1x512xf32> to vector<16x512xf32>
    %58 = arith.addf %55, %57 : vector<16x512xf32>
    %cst_29 = arith.constant 0.000000e+00 : f32
    %59 = vector.shape_cast %2 : vector<16x1xi1> to vector<16x1xi1>
    %60 = vector.broadcast %59 : vector<16x1xi1> to vector<16x512xi1>
    %61 = vector.broadcast %cst_29 : f32 to vector<16x512xf32>
    %62 = arith.select %60, %58, %61 : vector<16x512xi1>, vector<16x512xf32>
    %cst_30 = arith.constant dense<0.000000e+00> : vector<512xf32>
    %63 = vector.multi_reduction <add>, %62, %cst_30 [0] : vector<16x512xf32> to vector<512xf32>
    %64 = vector.shape_cast %63 : vector<512xf32> to vector<1x512xf32>
    %65 = arith.mulf %62, %62 : vector<16x512xf32>
    %cst_31 = arith.constant dense<0.000000e+00> : vector<512xf32>
    %66 = vector.multi_reduction <add>, %65, %cst_31 [0] : vector<16x512xf32> to vector<512xf32>
    %67 = vector.shape_cast %66 : vector<512xf32> to vector<1x512xf32>
    %cst_32 = arith.constant 5.000000e-01 : f32
    %68 = vector.broadcast %cst_32 : f32 to vector<1x512xf32>
    %69 = arith.mulf %64, %68 : vector<1x512xf32>
    %cst_33 = arith.constant 5.000000e-01 : f32
    %70 = vector.broadcast %cst_33 : f32 to vector<1x512xf32>
    %71 = arith.mulf %67, %70 : vector<1x512xf32>
    %72 = arith.mulf %69, %69 : vector<1x512xf32>
    %73 = arith.subf %71, %72 : vector<1x512xf32>
    %c0_34 = arith.constant 0 : index
    %c0_35 = arith.constant 0 : index
    %74 = vector.load %arg9[%c0_34, %c0_35] : memref<1x512xf32, #tpu.memory_space<vmem>>, vector<1x512xf32>
    %cst_36 = arith.constant 8.000000e-01 : f32
    %75 = vector.broadcast %cst_36 : f32 to vector<1x512xf32>
    %76 = arith.addf %73, %75 : vector<1x512xf32>
    %77 = math.rsqrt %76 : vector<1x512xf32>
    %78 = arith.mulf %74, %77 : vector<1x512xf32>
    %c0_37 = arith.constant 0 : index
    %c0_38 = arith.constant 0 : index
    %79 = vector.load %arg10[%c0_37, %c0_38] : memref<1x512xf32, #tpu.memory_space<vmem>>, vector<1x512xf32>
    %80 = arith.mulf %69, %78 : vector<1x512xf32>
    %81 = arith.subf %79, %80 : vector<1x512xf32>
    %82 = vector.broadcast %78 : vector<1x512xf32> to vector<16x512xf32>
    %83 = arith.mulf %58, %82 : vector<16x512xf32>
    %84 = vector.broadcast %81 : vector<1x512xf32> to vector<16x512xf32>
    %85 = arith.addf %83, %84 : vector<16x512xf32>
    %cst_39 = arith.constant 0.000000e+00 : f32
    %86 = vector.broadcast %cst_39 : f32 to vector<16x512xf32>
    %87 = arith.cmpf ogt, %85, %86 : vector<16x512xf32>
    %cst_40 = arith.constant 2.000000e-01 : f32
    %88 = vector.broadcast %cst_40 : f32 to vector<16x512xf32>
    %89 = arith.mulf %88, %85 : vector<16x512xf32>
    %90 = arith.select %87, %85, %89 : vector<16x512xi1>, vector<16x512xf32>
    %91 = arith.truncf %90 : vector<16x512xf32> to vector<16x512xbf16>
    %c0_41 = arith.constant 0 : index
    %c0_42 = arith.constant 0 : index
    %92 = vector.load %arg11[%c0_41, %c0_42] : memref<512x1024xbf16, #tpu.memory_space<vmem>>, vector<512x1024xbf16>
    %cst_43 = arith.constant dense<0.000000e+00> : vector<16x1024xf32>
    %93 = tpu.matmul %91, %92, %cst_43 {dimension_numbers = #tpu.dot_dimension_numbers<[1], [0], [0], [1], [0, 0, 1, 1], [], []>} : vector<16x512xbf16>, vector<512x1024xbf16>, vector<16x1024xf32> -> vector<16x1024xf32>
    %c0_44 = arith.constant 0 : index
    %c0_45 = arith.constant 0 : index
    %94 = vector.load %arg12[%c0_44, %c0_45] : memref<1x1024xf32, #tpu.memory_space<vmem>>, vector<1x1024xf32>
    %95 = vector.broadcast %94 : vector<1x1024xf32> to vector<16x1024xf32>
    %96 = arith.addf %93, %95 : vector<16x1024xf32>
    %cst_46 = arith.constant 0.000000e+00 : f32
    %97 = vector.shape_cast %2 : vector<16x1xi1> to vector<16x1xi1>
    %98 = vector.broadcast %97 : vector<16x1xi1> to vector<16x1024xi1>
    %99 = vector.broadcast %cst_46 : f32 to vector<16x1024xf32>
    %100 = arith.select %98, %96, %99 : vector<16x1024xi1>, vector<16x1024xf32>
    %cst_47 = arith.constant dense<0.000000e+00> : vector<1024xf32>
    %101 = vector.multi_reduction <add>, %100, %cst_47 [0] : vector<16x1024xf32> to vector<1024xf32>
    %102 = vector.shape_cast %101 : vector<1024xf32> to vector<1x1024xf32>
    %103 = arith.mulf %100, %100 : vector<16x1024xf32>
    %cst_48 = arith.constant dense<0.000000e+00> : vector<1024xf32>
    %104 = vector.multi_reduction <add>, %103, %cst_48 [0] : vector<16x1024xf32> to vector<1024xf32>
    %105 = vector.shape_cast %104 : vector<1024xf32> to vector<1x1024xf32>
    %cst_49 = arith.constant 5.000000e-01 : f32
    %106 = vector.broadcast %cst_49 : f32 to vector<1x1024xf32>
    %107 = arith.mulf %102, %106 : vector<1x1024xf32>
    %cst_50 = arith.constant 5.000000e-01 : f32
    %108 = vector.broadcast %cst_50 : f32 to vector<1x1024xf32>
    %109 = arith.mulf %105, %108 : vector<1x1024xf32>
    %110 = arith.mulf %107, %107 : vector<1x1024xf32>
    %111 = arith.subf %109, %110 : vector<1x1024xf32>
    %c0_51 = arith.constant 0 : index
    %c0_52 = arith.constant 0 : index
    %112 = vector.load %arg13[%c0_51, %c0_52] : memref<1x1024xf32, #tpu.memory_space<vmem>>, vector<1x1024xf32>
    %cst_53 = arith.constant 8.000000e-01 : f32
    %113 = vector.broadcast %cst_53 : f32 to vector<1x1024xf32>
    %114 = arith.addf %111, %113 : vector<1x1024xf32>
    %115 = math.rsqrt %114 : vector<1x1024xf32>
    %116 = arith.mulf %112, %115 : vector<1x1024xf32>
    %c0_54 = arith.constant 0 : index
    %c0_55 = arith.constant 0 : index
    %117 = vector.load %arg14[%c0_54, %c0_55] : memref<1x1024xf32, #tpu.memory_space<vmem>>, vector<1x1024xf32>
    %118 = arith.mulf %107, %116 : vector<1x1024xf32>
    %119 = arith.subf %117, %118 : vector<1x1024xf32>
    %120 = vector.broadcast %116 : vector<1x1024xf32> to vector<16x1024xf32>
    %121 = arith.mulf %96, %120 : vector<16x1024xf32>
    %122 = vector.broadcast %119 : vector<1x1024xf32> to vector<16x1024xf32>
    %123 = arith.addf %121, %122 : vector<16x1024xf32>
    %cst_56 = arith.constant 0.000000e+00 : f32
    %124 = vector.broadcast %cst_56 : f32 to vector<16x1024xf32>
    %125 = arith.cmpf ogt, %123, %124 : vector<16x1024xf32>
    %cst_57 = arith.constant 2.000000e-01 : f32
    %126 = vector.broadcast %cst_57 : f32 to vector<16x1024xf32>
    %127 = arith.mulf %126, %123 : vector<16x1024xf32>
    %128 = arith.select %125, %123, %127 : vector<16x1024xi1>, vector<16x1024xf32>
    %129 = arith.truncf %128 : vector<16x1024xf32> to vector<16x1024xbf16>
    %c0_58 = arith.constant 0 : index
    %c0_59 = arith.constant 0 : index
    %130 = vector.load %arg15[%c0_58, %c0_59] : memref<1024x128xbf16, #tpu.memory_space<vmem>>, vector<1024x128xbf16>
    %cst_60 = arith.constant dense<0.000000e+00> : vector<16x128xf32>
    %131 = tpu.matmul %129, %130, %cst_60 {dimension_numbers = #tpu.dot_dimension_numbers<[1], [0], [0], [1], [0, 0, 1, 1], [], []>} : vector<16x1024xbf16>, vector<1024x128xbf16>, vector<16x128xf32> -> vector<16x128xf32>
    %c0_61 = arith.constant 0 : index
    %c0_62 = arith.constant 0 : index
    %132 = vector.load %arg16[%c0_61, %c0_62] : memref<1x128xf32, #tpu.memory_space<vmem>>, vector<1x128xf32>
    %133 = vector.broadcast %132 : vector<1x128xf32> to vector<16x128xf32>
    %134 = arith.addf %131, %133 : vector<16x128xf32>
    %135 = math.tanh %134 : vector<16x128xf32>
    %c0_63 = arith.constant 0 : index
    %c0_64 = arith.constant 0 : index
    %136 = vector.load %arg17[%c0_63, %c0_64] : memref<16x128xf32, #tpu.memory_space<vmem>>, vector<16x128xf32>
    tpu.vector_store %arg17[%c0_63, %c0_64], %135 {strides = array<i32>} : memref<16x128xf32, #tpu.memory_space<vmem>>, vector<16x128xf32>,
    return
  }
}

</mosaic_0001>

<bundles_post_ra>
// kernel: generator_forward.1
= control target key start
LH: loop header
LB: loop body
LE: loop exit
PB: predicated region body
PF: predicated region fallthrough
CT: control target
= control target key end

     0   :  { %s5908_s0 = inlined_call_operand.vmem [shape: f32[16,32], index: 0, kind: input, shape index: {}]   ;;  %s5909_s1 = inlined_call_operand.vmem [shape: bf16[32,128], index: 1, kind: input, shape index: {}]   ;;  %s5910_s2 = inlined_call_operand.vmem [shape: f32[1,128], index: 2, kind: input, shape index: {}]   ;;  %s5911_s3 = inlined_call_operand.hbm [shape: bf16[128,256], index: 3, kind: input, shape index: {}]   ;;  %s5912_s4 = inlined_call_operand.hbm [shape: f32[1,256], index: 4, kind: input, shape index: {}]   ;;  %s5913_s5 = inlined_call_operand.hbm [shape: f32[1,256], index: 5, kind: input, shape index: {}]   ;;  %s5914_s6 = inlined_call_operand.hbm [shape: f32[1,256], index: 6, kind: input, shape index: {}]   ;;  %s5915_s7 = inlined_call_operand.hbm [shape: bf16[256,512], index: 7, kind: input, shape index: {}]   ;;  %s5916_s8 = inlined_call_operand.vmem [shape: f32[1,512], index: 8, kind: input, shape index: {}]   ;;  %s5917_s9 = inlined_call_operand.vmem [shape: f32[1,512], index: 9, kind: input, shape index: {}]   ;;  %s5918_s10 = inlined_call_operand.vmem [shape: f32[1,512], index: 10, kind: input, shape index: {}]   ;;  %s5919_s11 = inlined_call_operand.hbm [shape: bf16[512,1024], index: 11, kind: input, shape index: {}]   ;;  %s5920_s12 = inlined_call_operand.vmem [shape: f32[1,1024], index: 12, kind: input, shape index: {}]   ;;  %s5921_s13 = inlined_call_operand.vmem [shape: f32[1,1024], index: 13, kind: input, shape index: {}]   ;;  %s5922_s14 = inlined_call_operand.vmem [shape: f32[1,1024], index: 14, kind: input, shape index: {}]   ;;  %s5923_s15 = inlined_call_operand.hbm [shape: bf16[1024,128], index: 15, kind: input, shape index: {}]   ;;  %s5924_s16 = inlined_call_operand.vmem [shape: f32[1,128], index: 16, kind: input, shape index: {}]   ;;  %s5925_s17 = inlined_call_operand.vmem [shape: f32[16,128], index: 17, kind: output, shape index: {}]  }
   0x1   :  { %5930 = sst [smem:[#allocation21_spill]] %s5908_s0 }
   0x2   :  { %5931 = sst [smem:[#allocation22_spill]] %s5909_s1 }
   0x3   :  { %22 = vsyncpa [#allocation3], 0 }
   0x4   :  { %23 = vsyncpa [#allocation5], 0 }
   0x5   :  { %24 = vsyncpa [#allocation8], 0 }
   0x6   :  { %25 = vsyncpa [#allocation11], 0  ;;  %s5300_s24 = smov [#allocation4]   ;;  %s5301_s26 = smov [#allocation7]  }
   0x7   :  { %s50_s25 = sshll.u32 %s5300_s24, 4  ;;  %s70_s27 = sshll.u32 %s5301_s26, 4  ;;  %s51_s25 = int_to_ptr.vmem [resolvable:$true] %s50_s25  ;;  %s71_s27 = int_to_ptr.vmem [resolvable:$true] %s70_s27 }
   0x8   :  { %s5138_s0 = scalar_lea.hbm %s5912_s4, 32 }
   0x9   :  { %p5139_p0 = scmp.ne.s32.totalorder %s5912_s4, %s5138_s0  ;;  %p5142_p1 = scmp.lt.u32.totalorder %s5138_s0, %s5912_s4 }
   0xb   :  { %p5144_p2 = pnand %p5142_p1, %p5139_p0 }
   0xd   :  { %5147 = shalt.err (!%p5144_p2)
}
   0xe   :  { %s5148_s20 = scalar_lea.vmem %s51_s25, 32  ;;  %p5153_p4 = scmp.lt.s32.totalorder %s51_s25, %s51_s25 }
   0xf   :  { %p5149_p3 = scmp.ne.s32.totalorder %s51_s25, %s5148_s20  ;;  %p5154_p5 = scmp.lt.s32.totalorder %s5148_s20, %s5148_s20 }
  0x11   :  { %p5155_p6 = por %p5154_p5, %p5153_p4 }
  0x13   :  { %p5156_p7 = pnand %p5155_p6, %p5149_p3 }
  0x15   :  { %5159 = shalt.err (!%p5156_p7)
}
  0x16   :  { %53 = dma.hbm_to_vmem [thread:$0]  %s5912_s4, 32, %s51_s25, [#allocation5]  }
  0x17   :  { %s5160_s26 = scalar_lea.hbm %s5914_s6, 32 }
  0x18   :  { %p5161_p8 = scmp.ne.s32.totalorder %s5914_s6, %s5160_s26  ;;  %p5164_p9 = scmp.lt.u32.totalorder %s5160_s26, %s5914_s6 }
  0x1a   :  { %p5166_p10 = pnand %p5164_p9, %p5161_p8 }
  0x1c   :  { %5169 = shalt.err (!%p5166_p10)
}
  0x1d   :  { %s5170_s18 = scalar_lea.vmem %s71_s27, 32  ;;  %p5175_p12 = scmp.lt.s32.totalorder %s71_s27, %s71_s27 }
  0x1e   :  { %p5171_p11 = scmp.ne.s32.totalorder %s71_s27, %s5170_s18  ;;  %p5176_p13 = scmp.lt.s32.totalorder %s5170_s18, %s5170_s18 }
  0x20   :  { %p5177_p0 = por %p5176_p13, %p5175_p12 }
  0x22   :  { %p5178_p1 = pnand %p5177_p0, %p5171_p11 }
  0x24   :  { %5181 = shalt.err (!%p5178_p1)
}
  0x25   :  { %73 = dma.hbm_to_vmem [thread:$0]  %s5914_s6, 32, %s71_s27, [#allocation8]  }
  0x26   :  { %s5302_s19 = smov [#allocation10]   ;;  %s5182_s22 = scalar_lea.hbm %s5919_s11, 32768 }
  0x27   :  { %s97_s1 = sshll.u32 %s5302_s19, 4  ;;  %p5183_p2 = scmp.ne.s32.totalorder %s5919_s11, %s5182_s22  ;;  %s98_s1 = int_to_ptr.vmem [resolvable:$true] %s97_s1 }
  0x28   :  { %p5186_p3 = scmp.lt.u32.totalorder %s5182_s22, %s5919_s11 }
  0x2a   :  { %p5188_p4 = pnand %p5186_p3, %p5183_p2 }
  0x2c   :  { %5191 = shalt.err (!%p5188_p4)
}
  0x2d   :  { %s5192_s29 = scalar_lea.vmem %s98_s1, 32768  ;;  %p5197_p6 = scmp.lt.s32.totalorder %s98_s1, %s98_s1 }
  0x2e   :  { %p5193_p5 = scmp.ne.s32.totalorder %s98_s1, %s5192_s29  ;;  %p5198_p7 = scmp.lt.s32.totalorder %s5192_s29, %s5192_s29 }
  0x30   :  { %p5199_p8 = por %p5198_p7, %p5197_p6 }
  0x32   :  { %p5200_p9 = pnand %p5199_p8, %p5193_p5 }
  0x34   :  { %5203 = shalt.err (!%p5200_p9)
}
  0x35   :  { %s5303_s6 = smov 512   ;;  %s5304_s27 = smov 32  }
  0x36   :  { %103 = dma.hbm_to_vmem [thread:$0]  %s5919_s11, 32768, %s98_s1, [#allocation11], %s5303_s6, %s5303_s6, %s5304_s27  }
  0x37   :  { %s5305_s18 = smov [#allocation2]   ;;  %s5204_s20 = scalar_lea.hbm %s5911_s3, 2048 }
  0x38   :  { %s37_s4 = sshll.u32 %s5305_s18, 4  ;;  %p5205_p10 = scmp.ne.s32.totalorder %s5911_s3, %s5204_s20  ;;  %s38_s4 = int_to_ptr.vmem [resolvable:$true] %s37_s4 }
  0x39   :  { %p5208_p11 = scmp.lt.u32.totalorder %s5204_s20, %s5911_s3 }
  0x3b   :  { %p5210_p12 = pnand %p5208_p11, %p5205_p10 }
  0x3d   :  { %5213 = shalt.err (!%p5210_p12)
}
  0x3e   :  { %s5214_s26 = scalar_lea.vmem %s38_s4, 2048  ;;  %p5219_p0 = scmp.lt.s32.totalorder %s38_s4, %s38_s4 }
  0x3f   :  { %p5215_p13 = scmp.ne.s32.totalorder %s38_s4, %s5214_s26  ;;  %p5220_p1 = scmp.lt.s32.totalorder %s5214_s26, %s5214_s26 }
  0x41   :  { %p5221_p2 = por %p5220_p1, %p5219_p0 }
  0x43   :  { %p5222_p3 = pnand %p5221_p2, %p5215_p13 }
  0x45   :  { %5225 = shalt.err (!%p5222_p3)
}
  0x46   :  { %s5306_s11 = smov 128   ;;  %s5307_s1 = smov 8  }
  0x47   :  { %43 = dma.hbm_to_vmem [thread:$0]  %s5911_s3, 2048, %s38_s4, [#allocation3], %s5306_s11, %s5306_s11, %s5307_s1  }
  0x48   :  { %s5308_s6 = smov [#allocation6]   ;;  %s5309_s0 = smov [#allocation9]  }
  0x49   :  { %s60_s27 = sshll.u32 %s5308_s6, 4  ;;  %s79_s30 = sshll.u32 %s5309_s0, 4  ;;  %s61_s27 = int_to_ptr.vmem [resolvable:$true] %s60_s27  ;;  %s5457_s30 = int_to_ptr.vmem [resolvable:$true] %s79_s30 }
  0x4a   :  { %s5226_s19 = scalar_lea.hbm %s5913_s5, 32 }
  0x4b   :  { %p5227_p4 = scmp.ne.s32.totalorder %s5913_s5, %s5226_s19  ;;  %p5230_p5 = scmp.lt.u32.totalorder %s5226_s19, %s5913_s5 }
  0x4d   :  { %p5232_p6 = pnand %p5230_p5, %p5227_p4 }
  0x4f   :  { %5235 = shalt.err (!%p5232_p6)
}
  0x50   :  { %s5236_s3 = scalar_lea.vmem %s61_s27, 32  ;;  %p5241_p8 = scmp.lt.s32.totalorder %s61_s27, %s61_s27 }
  0x51   :  { %p5237_p7 = scmp.ne.s32.totalorder %s61_s27, %s5236_s3  ;;  %p5242_p9 = scmp.lt.s32.totalorder %s5236_s3, %s5236_s3 }
  0x53   :  { %p5243_p10 = por %p5242_p9, %p5241_p8 }
  0x55   :  { %p5244_p11 = pnand %p5243_p10, %p5237_p7 }
  0x57   :  { %5247 = shalt.err (!%p5244_p11)
}
  0x58   :  { %63 = dma.hbm_to_vmem [thread:$0]  %s5913_s5, 32, %s61_s27, [#allocation5]  }
  0x59   :  { %s5248_s1 = scalar_lea.hbm %s5915_s7, 8192 }
  0x5a   :  { %p5249_p12 = scmp.ne.s32.totalorder %s5915_s7, %s5248_s1  ;;  %p5252_p13 = scmp.lt.u32.totalorder %s5248_s1, %s5915_s7 }
  0x5c   :  { %p5254_p0 = pnand %p5252_p13, %p5249_p12 }
  0x5e   :  { %5257 = shalt.err (!%p5254_p0)
}
  0x5f   :  { %s5258_s18 = scalar_lea.vmem %s5457_s30, 8192  ;;  %p5263_p2 = scmp.lt.s32.totalorder %s5457_s30, %s5457_s30 }
  0x60   :  { %p5259_p1 = scmp.ne.s32.totalorder %s5457_s30, %s5258_s18  ;;  %p5264_p3 = scmp.lt.s32.totalorder %s5258_s18, %s5258_s18 }
  0x62   :  { %p5265_p4 = por %p5264_p3, %p5263_p2 }
  0x64   :  { %p5266_p5 = pnand %p5265_p4, %p5259_p1 }
  0x66   :  { %5269 = shalt.err (!%p5266_p5)
}
  0x67   :  { %s5310_s5 = smov 256   ;;  %s5311_s27 = smov 16  }
  0x68   :  { %85 = dma.hbm_to_vmem [thread:$0]  %s5915_s7, 8192, %s5457_s30, [#allocation8], %s5310_s5, %s5310_s5, %s5311_s27  }
  0x69   :  { %s5312_s20 = smov [#allocation12]   ;;  %s5270_s3 = scalar_lea.hbm %s5923_s15, 8192 }
  0x6a   :  { %s115_s21 = sshll.u32 %s5312_s20, 4  ;;  %p5271_p6 = scmp.ne.s32.totalorder %s5923_s15, %s5270_s3  ;;  %s116_s21 = int_to_ptr.vmem [resolvable:$true] %s115_s21 }
  0x6b   :  { %p5274_p7 = scmp.lt.u32.totalorder %s5270_s3, %s5923_s15 }
  0x6d   :  { %p5276_p8 = pnand %p5274_p7, %p5271_p6 }
  0x6f   :  { %5279 = shalt.err (!%p5276_p8)
}
  0x70   :  { %s5280_s1 = scalar_lea.vmem %s116_s21, 8192  ;;  %p5285_p10 = scmp.lt.s32.totalorder %s116_s21, %s116_s21 }
  0x71   :  { %p5281_p9 = scmp.ne.s32.totalorder %s116_s21, %s5280_s1  ;;  %p5286_p11 = scmp.lt.s32.totalorder %s5280_s1, %s5280_s1 }
  0x73   :  { %p5287_p12 = por %p5286_p11, %p5285_p10 }
  0x75   :  { %p5288_p13 = pnand %p5287_p12, %p5281_p9 }
  0x77   :  { %5291 = shalt.err (!%p5288_p13)
}
  0x78   :  { %s5313_s7 = smov 64   ;;  %s5314_s30 = smov 4  }
  0x79   :  { %121 = dma.hbm_to_vmem [thread:$0]  %s5923_s15, 8192, %s116_s21, [#allocation11], %s5313_s7, %s5313_s7, %s5314_s30  }
  0x7a   :  { %5292 = dma.done.wait [#allocation3], 2048  }
  0x7b   :  { %5293 = vsyncadd [#allocation3], 4294965248 }
  0x7c   :  { %5294 = dma.done.wait [#allocation5], 64  }
  0x7d   :  { %5295 = vsyncadd [#allocation5], 4294967232 }
  0x7e   :  { %5296 = dma.done.wait [#allocation8], 8224  }
  0x7f   :  { %5297 = vsyncadd [#allocation8], 4294959072 }
  0x80   :  { %5298 = dma.done.wait [#allocation11], 40960  }
  0x81   :  { %5299 = vsyncadd [#allocation11], 4294926336  ;;  %v5315_v0 = vmov 0.0   ;;  %vm5316_vm0 = vmmov 0   ;;  %s5932_s18 = sld [smem:[#allocation22_spill]]  ;;  %s5933_s19 = sld [smem:[#allocation21_spill]] }
  0x82   :  { %4861 = vmatprep.subr.bf16.mxu0 %v5315_v0  ;;  %4865 = vmatprep.mubr.msk.bf16.mxu0 %vm5316_vm0, %v5315_v0  ;;  %v4922_v5 = vld [vmem:[#allocation2 + $0x4] ss:$8 sps:$4 sm:$0xff]   ;;  %v4924_v6 = vld [vmem:[#allocation2] ss:$8 sps:$4 sm:$0xff]   ;;  %v4925_v7 = vld [vmem:[#allocation2 + $0x14] ss:$8 sps:$4 sm:$0xff]  }
  0x83   :  { %337 = vmatprep.subr.bf16.mxu1 %v4922_v5  ;;  %vm177_vm1 = vcmask 261120   ;;  %v4927_v9 = vld [vmem:[#allocation2 + $0x10] ss:$8 sps:$4 sm:$0xff]   ;;  %v4928_v10 = vld [vmem:[#allocation2 + $0x24] ss:$8 sps:$4 sm:$0xff]   ;;  %v5317_v22 = vmov 0  }
  0x84   :  { %338 = vmatpush1.bf16.msra.mxu1 %v4924_v6  ;;  %v4930_v11 = vld [vmem:[#allocation2 + $0x20] ss:$8 sps:$4 sm:$0xff]   ;;  %v4931_v12 = vld [vmem:[#allocation2 + $0x34] ss:$8 sps:$4 sm:$0xff]   ;;  %v4933_v13 = vld [vmem:[#allocation2 + $0x30] ss:$8 sps:$4 sm:$0xff]   ;;  %369 = vmatprep.mubr.bf16.mxu1 %v5317_v22 }
  0x85   :  { %339 = vmatprep.subr.bf16.mxu1 %v4925_v7  ;;  %v4934_v14 = vld [vmem:[#allocation2 + $0x44] ss:$8 sps:$4 sm:$0xff]   ;;  %v4936_v15 = vld [vmem:[#allocation2 + $0x40] ss:$8 sps:$4 sm:$0xff]   ;;  %v4937_v16 = vld [vmem:[#allocation2 + $0x54] ss:$8 sps:$4 sm:$0xff]  }
  0x86   :  { %v4939_v17 = vld [vmem:[#allocation2 + $0x50] ss:$8 sps:$4 sm:$0xff]   ;;  %v4940_v18 = vld [vmem:[#allocation2 + $0x64] ss:$8 sps:$4 sm:$0xff]   ;;  %v4942_v19 = vld [vmem:[#allocation2 + $0x60] ss:$8 sps:$4 sm:$0xff]  }
  0x87   :  { %v4920_v1 = vld [vmem:[%s5932_s18] sm:$0xff]   ;;  %v4921_v2 = vld [vmem:[%s5932_s18 + $0x8] sm:$0xff]   ;;  %v4943_v20 = vld [vmem:[#allocation2 + $0x74] ss:$8 sps:$4 sm:$0xff]  }
  0x88   :  { %4862 = vmatpush3.bf16.msra.mxu0 %v4920_v1  ;;  %v151_v3 = vld [vmem:[%s5933_s19] sm:$0xff]  ;;  %v152_v4 = vld [vmem:[%s5933_s19 + $0x8] sm:$0xff]  ;;  %340 = vmatpush1.bf16.msra.mxu1 %v4927_v9  ;;  %v4945_v21 = vld [vmem:[#allocation2 + $0x70] ss:$8 sps:$4 sm:$0xff]  }
  0x89   :  { %4863 = vmatprep.subr.bf16.mxu0 %v5315_v0  ;;  %v153_v8 = vpack.c.bf16 %v152_v4, %v151_v3  ;;  %341 = vmatprep.subr.bf16.mxu1 %v4928_v10  ;;  %v4365_v23 = vld [vmem:[%s5910_s2] ss:$0 sm:$0xff]  ;;  %v4948_v35 = vld [vmem:[#allocation9 + $0x4] ss:$16 sps:$4 sm:$0xff]   ;;  %v4951_v36 = vld [vmem:[#allocation9 + $0xc] ss:$16 sps:$4 sm:$0xff]  }
  0x8a   :  { %v4946_v37 = vld [vmem:[#allocation9] ss:$16 sps:$4 sm:$0xff]   ;;  %v4949_v38 = vld [vmem:[#allocation9 + $0x8] ss:$16 sps:$4 sm:$0xff]   ;;  %v4954_v39 = vld [vmem:[#allocation9 + $0x24] ss:$16 sps:$4 sm:$0xff]  }
  0x8b   :  { %v4957_v40 = vld [vmem:[#allocation9 + $0x2c] ss:$16 sps:$4 sm:$0xff]   ;;  %v4952_v41 = vld [vmem:[#allocation9 + $0x20] ss:$16 sps:$4 sm:$0xff]   ;;  %v4955_v42 = vld [vmem:[#allocation9 + $0x28] ss:$16 sps:$4 sm:$0xff]  }
  0x8c   :  { %4864 = vmatpush3.bf16.msra.mxu0 %v4921_v2  ;;  %342 = vmatpush1.bf16.msra.mxu1 %v4930_v11  ;;  %v4960_v43 = vld [vmem:[#allocation9 + $0x44] ss:$16 sps:$4 sm:$0xff]   ;;  %v4963_v44 = vld [vmem:[#allocation9 + $0x4c] ss:$16 sps:$4 sm:$0xff]   ;;  %v4958_v45 = vld [vmem:[#allocation9 + $0x40] ss:$16 sps:$4 sm:$0xff]  }
  0x8d   :  { %343 = vmatprep.subr.bf16.mxu1 %v4931_v12  ;;  %924 = vmatprep.subr.bf16.mxu0 %v4948_v35  ;;  %v4961_v46 = vld [vmem:[#allocation9 + $0x48] ss:$16 sps:$4 sm:$0xff]   ;;  %v4966_v47 = vld [vmem:[#allocation9 + $0x64] ss:$16 sps:$4 sm:$0xff]   ;;  %v4969_v48 = vld [vmem:[#allocation9 + $0x6c] ss:$16 sps:$4 sm:$0xff]   ;;  %v146_v35 = vlaneseq }
  0x8e   :  { %v4964_v49 = vld [vmem:[#allocation9 + $0x60] ss:$16 sps:$4 sm:$0xff]   ;;  %v4967_v50 = vld [vmem:[#allocation9 + $0x68] ss:$16 sps:$4 sm:$0xff]   ;;  %v4972_v51 = vld [vmem:[#allocation9 + $0x84] ss:$16 sps:$4 sm:$0xff]  }
  0x8f   :  { %4866 = vmatmul.mubr.msk.bf16.vlgmr.msra.gmra.mrb[0].mxu0 %vm177_vm1, %v153_v8  ;;  %v4975_v52 = vld [vmem:[#allocation9 + $0x8c] ss:$16 sps:$4 sm:$0xff]   ;;  %v4970_v53 = vld [vmem:[#allocation9 + $0x80] ss:$16 sps:$4 sm:$0xff]   ;;  %v4973_v54 = vld [vmem:[#allocation9 + $0x88] ss:$16 sps:$4 sm:$0xff]  }
  0x90   :  { %344 = vmatpush1.bf16.msra.mxu1 %v4933_v13  ;;  %925 = vmatpush1.bf16.msra.mxu0 %v4946_v37  ;;  %v4978_v55 = vld [vmem:[#allocation9 + $0xa4] ss:$16 sps:$4 sm:$0xff]   ;;  %v4981_v56 = vld [vmem:[#allocation9 + $0xac] ss:$16 sps:$4 sm:$0xff]   ;;  %v4976_v57 = vld [vmem:[#allocation9 + $0xa0] ss:$16 sps:$4 sm:$0xff]  }
  0x91   :  { %345 = vmatprep.subr.bf16.mxu1 %v4934_v14  ;;  %926 = vmatprep.subr.bf16.mxu0 %v4954_v39  ;;  %v4979_v58 = vld [vmem:[#allocation9 + $0xa8] ss:$16 sps:$4 sm:$0xff]   ;;  %v4984_v59 = vld [vmem:[#allocation9 + $0xc4] ss:$16 sps:$4 sm:$0xff]   ;;  %v4987_v60 = vld [vmem:[#allocation9 + $0xcc] ss:$16 sps:$4 sm:$0xff]  }
  0x92   :  { %v4982_v61 = vld [vmem:[#allocation9 + $0xc0] ss:$16 sps:$4 sm:$0xff]   ;;  %v4985_v62 = vld [vmem:[#allocation9 + $0xc8] ss:$16 sps:$4 sm:$0xff]   ;;  %v4990_v63 = vld [vmem:[#allocation9 + $0xe4] ss:$16 sps:$4 sm:$0xff]  }
  0x93   :  { %v4993_v0 = vld [vmem:[#allocation9 + $0xec] ss:$16 sps:$4 sm:$0xff]   ;;  %v4988_v1 = vld [vmem:[#allocation9 + $0xe0] ss:$16 sps:$4 sm:$0xff]   ;;  %v4991_v2 = vld [vmem:[#allocation9 + $0xe8] ss:$16 sps:$4 sm:$0xff]  }
  0x94   :  { %346 = vmatpush1.bf16.msra.mxu1 %v4936_v15  ;;  %927 = vmatpush1.bf16.msra.mxu0 %v4952_v41  ;;  %v4996_v3 = vld [vmem:[#allocation9 + $0x104] ss:$16 sps:$4 sm:$0xff]   ;;  %v4999_v4 = vld [vmem:[#allocation9 + $0x10c] ss:$16 sps:$4 sm:$0xff]   ;;  %v4994_v5 = vld [vmem:[#allocation9 + $0x100] ss:$16 sps:$4 sm:$0xff]  }
  0x95   :  { %347 = vmatprep.subr.bf16.mxu1 %v4937_v16  ;;  %928 = vmatprep.subr.bf16.mxu0 %v4960_v43  ;;  %v4997_v6 = vld [vmem:[#allocation9 + $0x108] ss:$16 sps:$4 sm:$0xff]   ;;  %v5002_v7 = vld [vmem:[#allocation9 + $0x124] ss:$16 sps:$4 sm:$0xff]   ;;  %v5005_v8 = vld [vmem:[#allocation9 + $0x12c] ss:$16 sps:$4 sm:$0xff]  }
  0x96   :  { %v5000_v9 = vld [vmem:[#allocation9 + $0x120] ss:$16 sps:$4 sm:$0xff]   ;;  %v5003_v10 = vld [vmem:[#allocation9 + $0x128] ss:$16 sps:$4 sm:$0xff]   ;;  %v5008_v11 = vld [vmem:[#allocation9 + $0x144] ss:$16 sps:$4 sm:$0xff]  }
  0x97   :  { %v5011_v12 = vld [vmem:[#allocation9 + $0x14c] ss:$16 sps:$4 sm:$0xff]   ;;  %v5006_v13 = vld [vmem:[#allocation9 + $0x140] ss:$16 sps:$4 sm:$0xff]   ;;  %v5009_v14 = vld [vmem:[#allocation9 + $0x148] ss:$16 sps:$4 sm:$0xff]  }
  0x98   :  { %348 = vmatpush1.bf16.msra.mxu1 %v4939_v17  ;;  %929 = vmatpush1.bf16.msra.mxu0 %v4958_v45  ;;  %v5014_v15 = vld [vmem:[#allocation9 + $0x164] ss:$16 sps:$4 sm:$0xff]   ;;  %v5017_v16 = vld [vmem:[#allocation9 + $0x16c] ss:$16 sps:$4 sm:$0xff]   ;;  %v5012_v17 = vld [vmem:[#allocation9 + $0x160] ss:$16 sps:$4 sm:$0xff]  }
  0x99   :  { %349 = vmatprep.subr.bf16.mxu1 %v4940_v18  ;;  %930 = vmatprep.subr.bf16.mxu0 %v4966_v47  ;;  %v5015_v18 = vld [vmem:[#allocation9 + $0x168] ss:$16 sps:$4 sm:$0xff]  }
  0x9a   :  { %v5021_v22 = vld [vmem:[#allocation9 + $0x188] ss:$16 sps:$4 sm:$0xff]  }
  0x9c   :  { %350 = vmatpush1.bf16.msra.mxu1 %v4942_v19  ;;  %931 = vmatpush1.bf16.msra.mxu0 %v4964_v49  ;;  %v5020_v19 = vld [vmem:[#allocation9 + $0x184] ss:$16 sps:$4 sm:$0xff]  }
  0x9d   :  { %351 = vmatprep.subr.bf16.mxu1 %v4943_v20  ;;  %932 = vmatprep.subr.bf16.mxu0 %v4972_v51  ;;  %v5023_v20 = vld [vmem:[#allocation9 + $0x18c] ss:$16 sps:$4 sm:$0xff]  }
  0xa0   :  { %352 = vmatpush1.bf16.msra.mxu1 %v4945_v21  ;;  %933 = vmatpush1.bf16.msra.mxu0 %v4970_v53  ;;  %v5018_v21 = vld [vmem:[#allocation9 + $0x180] ss:$16 sps:$4 sm:$0xff]  }
  0xa1   :  { %967 = vmatprep.subr.bf16.mxu1 %v4951_v36  ;;  %934 = vmatprep.subr.bf16.mxu0 %v4978_v55  ;;  %v5515_v36 = vshrl.u32 %v146_v35, 7 }
  0xa3   :  { %v5518_v37 = vsub.s32 0, %v5515_v36  ;;  %v5521_v39 = vsub.s32 1, %v5515_v36  ;;  %vm149_vm4 = vcmp.lt.s32.totalorder %v5515_v36, 2 }
  0xa4   :  { %935 = vmatpush1.bf16.msra.mxu0 %v4976_v57 }
  0xa5   :  { %936 = vmatprep.subr.bf16.mxu0 %v4984_v59 }
  0xa8   :  { %937 = vmatpush1.bf16.msra.mxu0 %v4982_v61 }
  0xa9   :  { %938 = vmatprep.subr.bf16.mxu0 %v4990_v63 }
  0xac   :  { %939 = vmatpush1.bf16.msra.mxu0 %v4988_v1 }
  0xad   :  { %940 = vmatprep.subr.bf16.mxu0 %v4996_v3 }
  0xb0   :  { %941 = vmatpush1.bf16.msra.mxu0 %v4994_v5 }
  0xb1   :  { %942 = vmatprep.subr.bf16.mxu0 %v5002_v7 }
  0xb4   :  { %943 = vmatpush1.bf16.msra.mxu0 %v5000_v9 }
  0xb5   :  { %944 = vmatprep.subr.bf16.mxu0 %v5008_v11 }
  0xb8   :  { %945 = vmatpush1.bf16.msra.mxu0 %v5006_v13 }
  0xb9   :  { %946 = vmatprep.subr.bf16.mxu0 %v5014_v15 }
  0xbc   :  { %947 = vmatpush1.bf16.msra.mxu0 %v5012_v17 }
  0xbd   :  { %948 = vmatprep.subr.bf16.mxu0 %v5020_v19 }
  0xc0   :  { %949 = vmatpush1.bf16.msra.mxu0 %v5018_v21 }
 0x162   :  { %v215_v24 = vpop.f32.mrb[0].mxu0 }
 0x163   :  { %v216_v25 = vadd.f32 %v4365_v23, %v215_v24  ;;  %v4867_v26 = vpop.f32.mrb[1].mxu0  ;;  %v5029_v24 = vld [vmem:[#allocation9 + $0x1ac] ss:$16 sps:$4 sm:$0xff]  }
 0x164   :  { %v218_v27 = vpop.f32.mrb[2].mxu0  ;;  %v5027_v26 = vld [vmem:[#allocation9 + $0x1a8] ss:$16 sps:$4 sm:$0xff]  }
 0x165   :  { %v224_v28 = vmul.f32 0.2, %v216_v25  ;;  %v219_v29 = vadd.f32 %v4365_v23, %v218_v27  ;;  %v4868_v30 = vpop.f32.mrb[3].mxu0  ;;  %vm222_vm2 = vcmp.gt.f32.partialorder %v216_v25, 0.0  ;;  %v5026_v23 = vld [vmem:[#allocation9 + $0x1a4] ss:$16 sps:$4 sm:$0xff]  }
 0x166   :  { %950 = vmatprep.subr.bf16.mxu0 %v5026_v23  ;;  %v5032_v27 = vld [vmem:[#allocation9 + $0x1c4] ss:$16 sps:$4 sm:$0xff]   ;;  %v5033_v30 = vld [vmem:[#allocation9 + $0x1c8] ss:$16 sps:$4 sm:$0xff]  }
 0x167   :  { %vm223_vm3 = vcmp.gt.f32.partialorder %v219_v29, 0.0  ;;  %v225_v31 = vmul.f32 0.2, %v219_v29  ;;  %v226_v32 = vsel %vm222_vm2, %v216_v25, %v224_v28  ;;  %v5024_v25 = vld [vmem:[#allocation9 + $0x1a0] ss:$16 sps:$4 sm:$0xff]  }
 0x168   :  { %951 = vmatpush1.bf16.msra.mxu0 %v5024_v25  ;;  %v5035_v28 = vld [vmem:[#allocation9 + $0x1cc] ss:$16 sps:$4 sm:$0xff]  }
 0x169   :  { %v227_v33 = vsel %vm223_vm3, %v219_v29, %v225_v31  ;;  %v5030_v29 = vld [vmem:[#allocation9 + $0x1c0] ss:$16 sps:$4 sm:$0xff]   ;;  %952 = vmatprep.subr.bf16.mxu0 %v5032_v27 }
 0x16a   :  { %v228_v34 = vpack.c.bf16 %v227_v33, %v226_v32  ;;  %v5036_v31 = vld [vmem:[#allocation9 + $0x1e0] ss:$16 sps:$4 sm:$0xff]   ;;  %v5038_v32 = vld [vmem:[#allocation9 + $0x1e4] ss:$16 sps:$4 sm:$0xff]   ;;  %v5039_v33 = vld [vmem:[#allocation9 + $0x1e8] ss:$16 sps:$4 sm:$0xff]  }
 0x16c   :  { %370 = vmatmul.mubr.bf16.vlgmr.msra.gmra.mrb[0].mxu1 %v228_v34  ;;  %953 = vmatpush1.bf16.msra.mxu0 %v5030_v29  ;;  %v5041_v34 = vld [vmem:[#allocation9 + $0x1ec] ss:$16 sps:$4 sm:$0xff]  }
 0x16d   :  { %968 = vmatpush1.bf16.msra.mxu1 %v4949_v38  ;;  %954 = vmatprep.subr.bf16.mxu0 %v5038_v32  ;;  %v245_v38 = vld [vmem:[#allocation4] sm:$0x3] }
 0x16e   :  { %969 = vmatprep.subr.bf16.mxu1 %v4957_v40  ;;  %v250_v40 = vrot.slane %v245_v38, %v5518_v37  ;;  %v254_v41 = vrot.slane %v245_v38, %v5521_v39 }
 0x170   :  { %955 = vmatpush1.bf16.msra.mxu0 %v5036_v31 }
 0x171   :  { %970 = vmatpush1.bf16.msra.mxu1 %v4955_v42 }
 0x172   :  { %971 = vmatprep.subr.bf16.mxu1 %v4963_v44 }
 0x175   :  { %972 = vmatpush1.bf16.msra.mxu1 %v4961_v46 }
 0x176   :  { %973 = vmatprep.subr.bf16.mxu1 %v4969_v48 }
 0x179   :  { %974 = vmatpush1.bf16.msra.mxu1 %v4967_v50 }
 0x17a   :  { %975 = vmatprep.subr.bf16.mxu1 %v4975_v52 }
 0x17d   :  { %976 = vmatpush1.bf16.msra.mxu1 %v4973_v54 }
 0x17e   :  { %977 = vmatprep.subr.bf16.mxu1 %v4981_v56 }
 0x181   :  { %978 = vmatpush1.bf16.msra.mxu1 %v4979_v58 }
 0x182   :  { %979 = vmatprep.subr.bf16.mxu1 %v4987_v60 }
 0x185   :  { %980 = vmatpush1.bf16.msra.mxu1 %v4985_v62 }
 0x186   :  { %981 = vmatprep.subr.bf16.mxu1 %v4993_v0 }
 0x189   :  { %982 = vmatpush1.bf16.msra.mxu1 %v4991_v2 }
 0x18a   :  { %983 = vmatprep.subr.bf16.mxu1 %v4999_v4 }
 0x18d   :  { %984 = vmatpush1.bf16.msra.mxu1 %v4997_v6 }
 0x18e   :  { %985 = vmatprep.subr.bf16.mxu1 %v5005_v8 }
 0x191   :  { %986 = vmatpush1.bf16.msra.mxu1 %v5003_v10 }
 0x192   :  { %987 = vmatprep.subr.bf16.mxu1 %v5011_v12 }
 0x195   :  { %988 = vmatpush1.bf16.msra.mxu1 %v5009_v14 }
 0x196   :  { %989 = vmatprep.subr.bf16.mxu1 %v5017_v16 }
 0x199   :  { %990 = vmatpush1.bf16.msra.mxu1 %v5015_v18 }
 0x19a   :  { %991 = vmatprep.subr.bf16.mxu1 %v5023_v20 }
 0x19d   :  { %992 = vmatpush1.bf16.msra.mxu1 %v5021_v22  ;;  %v5318_v22 = vmov 1966171168  }
 0x19e   :  { %993 = vmatprep.subr.bf16.mxu1 %v5029_v24  ;;  %v437_v23 = vunpack.c.l.s4 %v5318_v22 }
 0x1a0   :  { %v438_v24 = vunpack.c.0.s8 %v437_v23  ;;  %v1279_v23 = vld [vmem:[#allocation10 + $0xa8] sm:$0xff] }
 0x1a1   :  { %994 = vmatpush1.bf16.msra.mxu1 %v5027_v26 }
 0x1a2   :  { %995 = vmatprep.subr.bf16.mxu1 %v5035_v28  ;;  %v5534_v26 = vsub.s32 %v438_v24, %v5515_v36 }
 0x1a5   :  { %996 = vmatpush1.bf16.msra.mxu1 %v5033_v30  ;;  %v428_v30 = vld [vmem:[#allocation6] sm:$0x3] }
 0x1a6   :  { %997 = vmatprep.subr.bf16.mxu1 %v5041_v34 }
 0x1a9   :  { %998 = vmatpush1.bf16.msra.mxu1 %v5039_v33 }
 0x23f   :  { %v371_v42 = vpop.f32.mrb[0].mxu1 }
 0x240   :  { %v5526_v43 = vadd.f32 %v371_v42, %v250_v40  ;;  %v373_v44 = vpop.f32.mrb[1].mxu1 }
 0x241   :  { %v374_v45 = vadd.f32 %v373_v44, %v254_v41  ;;  %v375_v46 = vpop.f32.mrb[2].mxu1 }
 0x242   :  { %v384_v47 = vsel %vm149_vm4, %v5526_v43, 0.0  ;;  %v377_v48 = vpop.f32.mrb[3].mxu1  ;;  %v376_v35 = vadd.f32 %v375_v46, %v250_v40 }
 0x243   :  { %v389_v49 = vrot.slane %v384_v47, 4  ;;  %v402_v50 = vmul.f32 %v384_v47, %v384_v47  ;;  %v385_v51 = vsel %vm149_vm4, %v374_v45, 0.0  ;;  %v378_v38 = vadd.f32 %v377_v48, %v254_v41 }
 0x244   :  { %v396_v52 = vrot.slane %v385_v51, 4  ;;  %v403_v53 = vmul.f32 %v385_v51, %v385_v51 }
 0x245   :  { %v390_v54 = vadd.f32 %v389_v49, %v384_v47  ;;  %v407_v55 = vrot.slane %v402_v50, 4 }
 0x246   :  { %v397_v56 = vadd.f32 %v396_v52, %v385_v51  ;;  %v414_v57 = vrot.slane %v403_v53, 4 }
 0x247   :  { %v391_v58 = vrot.slane %v390_v54, 2  ;;  %v408_v59 = vadd.f32 %v407_v55, %v402_v50 }
 0x248   :  { %v398_v60 = vrot.slane %v397_v56, 2  ;;  %v415_v61 = vadd.f32 %v414_v57, %v403_v53 }
 0x249   :  { %v392_v62 = vadd.f32 %v391_v58, %v390_v54  ;;  %v409_v63 = vrot.slane %v408_v59, 2  ;;  %v452_v54 = vld [vmem:[#allocation7] sm:$0x3] }
 0x24a   :  { %v399_v0 = vadd.f32 %v398_v60, %v397_v56  ;;  %v416_v1 = vrot.slane %v415_v61, 2 }
 0x24b   :  { %v393_v2 = vrot.slane %v392_v62, 1  ;;  %v410_v3 = vadd.f32 %v409_v63, %v408_v59 }
 0x24c   :  { %v400_v4 = vrot.slane %v399_v0, 1  ;;  %v417_v5 = vadd.f32 %v416_v1, %v415_v61 }
 0x24d   :  { %v394_v6 = vadd.f32 %v393_v2, %v392_v62  ;;  %v411_v7 = vrot.slane %v410_v3, 1 }
 0x24e   :  { %v401_v8 = vadd.f32 %v400_v4, %v399_v0  ;;  %v418_v9 = vrot.slane %v417_v5, 1  ;;  %v1262_v4 = vld [vmem:[#allocation10 + $0x20] sm:$0xff] }
 0x24f   :  { %v412_v10 = vadd.f32 %v411_v7, %v410_v3  ;;  %v420_v11 = vmul.f32 0.5, %v394_v6  ;;  %v1258_v3 = vld [vmem:[#allocation10] sm:$0xff]  ;;  %v1263_v7 = vld [vmem:[#allocation10 + $0x28] sm:$0xff] }
 0x250   :  { %v419_v12 = vadd.f32 %v418_v9, %v417_v5  ;;  %v421_v13 = vmul.f32 0.5, %v401_v8  ;;  %v1259_v5 = vld [vmem:[#allocation10 + $0x8] sm:$0xff]  ;;  %v4450_v6 = vcombine.high %v1258_v3, %v1262_v4  ;;  %v4449_v8 = vcombine.low %v1258_v3, %v1262_v4 }
 0x251   :  { %v422_v14 = vmul.f32 0.5, %v412_v10  ;;  %v424_v15 = vmul.f32 %v420_v11, %v420_v11  ;;  %v4451_v9 = vcombine.low %v1259_v5, %v1263_v7  ;;  %v4452_v10 = vcombine.high %v1259_v5, %v1263_v7  ;;  %v1319_v3 = vld [vmem:[#allocation10 + $0x1e8] sm:$0xff]  ;;  %v1322_v7 = vld [vmem:[#allocation10 + $0x200] sm:$0xff] }
 0x252   :  { %v423_v16 = vmul.f32 0.5, %v419_v12  ;;  %v425_v17 = vmul.f32 %v421_v13, %v421_v13  ;;  %2836 = vmatprep.subr.bf16.mxu0 %v4450_v6  ;;  %v1270_v12 = vld [vmem:[#allocation10 + $0x60] sm:$0xff] }
 0x253   :  { %v426_v18 = vsub.f32 %v422_v14, %v424_v15  ;;  %2922 = vmatprep.subr.bf16.mxu1 %v4452_v10  ;;  %v1271_v15 = vld [vmem:[#allocation10 + $0x68] sm:$0xff] }
 0x254   :  { %v427_v19 = vsub.f32 %v423_v16, %v425_v17 }
 0x255   :  { %v429_v20 = vadd.f32 0.8, %v426_v18 }
 0x256   :  { %v430_v21 = vadd.f32 0.8, %v427_v19  ;;  %v1274_v19 = vld [vmem:[#allocation10 + $0x80] sm:$0xff] }
 0x257   :  { %5106 = vrsqrt.f32 %v429_v20  ;;  %v1278_v20 = vld [vmem:[#allocation10 + $0xa0] sm:$0xff] }
 0x258   :  { %5108 = vrsqrt.f32 %v430_v21  ;;  %v1275_v21 = vld [vmem:[#allocation10 + $0x88] sm:$0xff]  ;;  %v4466_v22 = vcombine.high %v1274_v19, %v1278_v20  ;;  %v4465_v24 = vcombine.low %v1274_v19, %v1278_v20 }
 0x259   :  { %v1335_v19 = vld [vmem:[#allocation10 + $0x268] sm:$0xff] }
 0x261   :  { %v5107_v25 = vpop.eup %5106 }
 0x262   :  { %v5109_v27 = vpop.eup %5108 }
 0x263   :  { %v435_v28 = vcombine.low %v5107_v25, %v5109_v27  ;;  %v4467_v25 = vcombine.low %v1275_v21, %v1279_v23  ;;  %v4468_v27 = vcombine.high %v1275_v21, %v1279_v23  ;;  %v1338_v23 = vld [vmem:[#allocation10 + $0x280] sm:$0xff] }
 0x265   :  { %v442_v29 = vrot.slane %v435_v28, %v5534_v26  ;;  %v1282_v28 = vld [vmem:[#allocation10 + $0xc0] sm:$0xff] }
 0x267   :  { %v449_v31 = vrot.slane %v442_v29, %v5534_v26  ;;  %v1286_v29 = vld [vmem:[#allocation10 + $0xe0] sm:$0xff] }
 0x269   :  { %v451_v32 = vmul.f32 %v449_v31, %v428_v30  ;;  %v1283_v30 = vld [vmem:[#allocation10 + $0xc8] sm:$0xff]  ;;  %v4474_v31 = vcombine.high %v1282_v28, %v1286_v29 }
 0x26b   :  { %v457_v33 = vrot.slane %v451_v32, %v5518_v37  ;;  %v461_v34 = vrot.slane %v451_v32, %v5521_v39  ;;  %v1287_v32 = vld [vmem:[#allocation10 + $0xe8] sm:$0xff] }
 0x26d   :  { %v464_v42 = vmul.f32 %v457_v33, %v420_v11  ;;  %v465_v44 = vmul.f32 %v461_v34, %v421_v13  ;;  %v486_v47 = vmul.f32 %v461_v34, %v374_v45  ;;  %v485_v49 = vmul.f32 %v457_v33, %v5526_v43  ;;  %v1266_v11 = vld [vmem:[#allocation10 + $0x40] sm:$0xff]  ;;  %v1267_v13 = vld [vmem:[#allocation10 + $0x48] sm:$0xff] }
 0x26e   :  { %v487_v50 = vmul.f32 %v457_v33, %v376_v35  ;;  %v488_v51 = vmul.f32 %v461_v34, %v378_v38  ;;  %v4458_v14 = vcombine.high %v1266_v11, %v1270_v12  ;;  %v4457_v16 = vcombine.low %v1266_v11, %v1270_v12  ;;  %v1290_v38 = vld [vmem:[#allocation10 + $0x100] sm:$0xff]  ;;  %v1327_v11 = vld [vmem:[#allocation10 + $0x228] sm:$0xff] }
 0x26f   :  { %v468_v52 = vcombine.low %v464_v42, %v465_v44  ;;  %v4459_v17 = vcombine.low %v1267_v13, %v1271_v15  ;;  %v4460_v18 = vcombine.high %v1267_v13, %v1271_v15  ;;  %v4473_v33 = vcombine.low %v1282_v28, %v1286_v29  ;;  %v1294_v42 = vld [vmem:[#allocation10 + $0x120] sm:$0xff]  ;;  %v1291_v44 = vld [vmem:[#allocation10 + $0x108] sm:$0xff] }
 0x270   :  { %v4475_v34 = vcombine.low %v1283_v30, %v1287_v32  ;;  %v4476_v35 = vcombine.high %v1283_v30, %v1287_v32  ;;  %v1330_v15 = vld [vmem:[#allocation10 + $0x240] sm:$0xff]  ;;  %v1343_v28 = vld [vmem:[#allocation10 + $0x2a8] sm:$0xff] }
 0x271   :  { %v475_v53 = vrot.slane %v468_v52, %v5534_v26  ;;  %v1346_v32 = vld [vmem:[#allocation10 + $0x2c0] sm:$0xff] }
 0x273   :  { %v482_v55 = vrot.slane %v475_v53, %v5534_v26  ;;  %v1298_v53 = vld [vmem:[#allocation10 + $0x140] sm:$0xff] }
 0x275   :  { %v484_v56 = vsub.f32 %v452_v54, %v482_v55  ;;  %v1302_v54 = vld [vmem:[#allocation10 + $0x160] sm:$0xff]  ;;  %v1299_v55 = vld [vmem:[#allocation10 + $0x148] sm:$0xff] }
 0x277   :  { %v497_v57 = vrot.slane %v484_v56, %v5521_v39  ;;  %v493_v58 = vrot.slane %v484_v56, %v5518_v37  ;;  %v4490_v56 = vcombine.high %v1298_v53, %v1302_v54 }
 0x279   :  { %v501_v40 = vadd.f32 %v497_v57, %v486_v47  ;;  %v500_v41 = vadd.f32 %v493_v58, %v485_v49  ;;  %v502_v46 = vadd.f32 %v493_v58, %v487_v50  ;;  %v503_v48 = vadd.f32 %v497_v57, %v488_v51  ;;  %v1295_v49 = vld [vmem:[#allocation10 + $0x128] sm:$0xff] }
 0x27a   :  { %v4482_v47 = vcombine.high %v1290_v38, %v1294_v42  ;;  %v4481_v50 = vcombine.low %v1290_v38, %v1294_v42  ;;  %v4483_v51 = vcombine.low %v1291_v44, %v1295_v49  ;;  %v4484_v52 = vcombine.high %v1291_v44, %v1295_v49  ;;  %v1303_v57 = vld [vmem:[#allocation10 + $0x168] sm:$0xff]  ;;  %v1354_v49 = vld [vmem:[#allocation10 + $0x300] sm:$0xff] }
 0x27b   :  { %v509_v45 = vmul.f32 0.2, %v501_v40  ;;  %vm506_vm5 = vcmp.gt.f32.partialorder %v502_v46, 0.0  ;;  %v510_v43 = vmul.f32 0.2, %v502_v46  ;;  %vm505_vm6 = vcmp.gt.f32.partialorder %v501_v40, 0.0 }
 0x27c   :  { %v511_v59 = vmul.f32 0.2, %v503_v48  ;;  %vm507_vm7 = vcmp.gt.f32.partialorder %v503_v48, 0.0  ;;  %vm504_vm8 = vcmp.gt.f32.partialorder %v500_v41, 0.0  ;;  %v508_v60 = vmul.f32 0.2, %v500_v41 }
 0x27d   :  { %v513_v61 = vsel %vm505_vm6, %v501_v40, %v509_v45  ;;  %v514_v62 = vsel %vm506_vm5, %v502_v46, %v510_v43  ;;  %v4489_v58 = vcombine.low %v1298_v53, %v1302_v54  ;;  %v4491_v40 = vcombine.low %v1299_v55, %v1303_v57  ;;  %v1306_v46 = vld [vmem:[#allocation10 + $0x180] sm:$0xff]  ;;  %v1307_v45 = vld [vmem:[#allocation10 + $0x188] sm:$0xff] }
 0x27e   :  { %v515_v63 = vsel %vm507_vm7, %v503_v48, %v511_v59  ;;  %v512_v0 = vsel %vm504_vm8, %v500_v41, %v508_v60  ;;  %v4492_v41 = vcombine.high %v1299_v55, %v1303_v57  ;;  %v1310_v48 = vld [vmem:[#allocation10 + $0x1a0] sm:$0xff]  ;;  %v1311_v59 = vld [vmem:[#allocation10 + $0x1a8] sm:$0xff] }
 0x27f   :  { %v517_v1 = vpack.c.bf16 %v515_v63, %v513_v61  ;;  %v516_v2 = vpack.c.bf16 %v514_v62, %v512_v0  ;;  %v4498_v43 = vcombine.high %v1306_v46, %v1310_v48  ;;  %v4497_v60 = vcombine.low %v1306_v46, %v1310_v48  ;;  %v1314_v63 = vld [vmem:[#allocation10 + $0x1c0] sm:$0xff]  ;;  %v1351_v38 = vld [vmem:[#allocation10 + $0x2e8] sm:$0xff] }
 0x280   :  { %v4499_v61 = vcombine.low %v1307_v45, %v1311_v59  ;;  %v4500_v62 = vcombine.high %v1307_v45, %v1311_v59  ;;  %v1318_v0 = vld [vmem:[#allocation10 + $0x1e0] sm:$0xff]  ;;  %v1359_v53 = vld [vmem:[#allocation10 + $0x328] sm:$0xff] }
 0x281   :  { %956 = vmatprep.mubr.bf16.mxu0 %v517_v1  ;;  %999 = vmatprep.mubr.bf16.mxu1 %v517_v1  ;;  %v1315_v1 = vld [vmem:[#allocation10 + $0x1c8] sm:$0xff]  ;;  %v4505_v4 = vcombine.low %v1314_v63, %v1318_v0  ;;  %v1362_v57 = vld [vmem:[#allocation10 + $0x340] sm:$0xff] }
 0x282   :  { %957 = vmatmul.mubr.bf16.vlgmr.msra.gmra.mrb[4].mxu0 %v516_v2  ;;  %1000 = vmatmul.mubr.bf16.vlgmr.msra.gmra.mrb[4].mxu1 %v516_v2  ;;  %v4506_v2 = vcombine.high %v1314_v63, %v1318_v0  ;;  %v4507_v5 = vcombine.low %v1315_v1, %v1319_v3  ;;  %v4508_v6 = vcombine.high %v1315_v1, %v1319_v3  ;;  %v1367_v46 = vld [vmem:[#allocation10 + $0x368] sm:$0xff]  ;;  %v1370_v59 = vld [vmem:[#allocation10 + $0x380] sm:$0xff] }
 0x283   :  { %2837 = vmatpush1.bf16.msra.mxu0 %v4449_v8  ;;  %2923 = vmatpush1.bf16.msra.mxu1 %v4451_v9  ;;  %v1326_v8 = vld [vmem:[#allocation10 + $0x220] sm:$0xff]  ;;  %v1323_v9 = vld [vmem:[#allocation10 + $0x208] sm:$0xff] }
 0x284   :  { %2838 = vmatprep.subr.bf16.mxu0 %v4458_v14  ;;  %2924 = vmatprep.subr.bf16.mxu1 %v4460_v18  ;;  %v4514_v10 = vcombine.high %v1322_v7, %v1326_v8  ;;  %v4513_v12 = vcombine.low %v1322_v7, %v1326_v8  ;;  %v4515_v13 = vcombine.low %v1323_v9, %v1327_v11  ;;  %v1375_v63 = vld [vmem:[#allocation10 + $0x3a8] sm:$0xff]  ;;  %v1378_v3 = vld [vmem:[#allocation10 + $0x3c0] sm:$0xff] }
 0x285   :  { %v4516_v14 = vcombine.high %v1323_v9, %v1327_v11  ;;  %v1383_v8 = vld [vmem:[#allocation10 + $0x3e8] sm:$0xff]  ;;  %v5545_v11 = vld [vmem:[#allocation10 + $0x400] sm:$0xff] }
 0x287   :  { %2839 = vmatpush1.bf16.msra.mxu0 %v4457_v16  ;;  %2925 = vmatpush1.bf16.msra.mxu1 %v4459_v17  ;;  %v1334_v16 = vld [vmem:[#allocation10 + $0x260] sm:$0xff]  ;;  %v1331_v17 = vld [vmem:[#allocation10 + $0x248] sm:$0xff] }
 0x288   :  { %2840 = vmatprep.subr.bf16.mxu0 %v4466_v22  ;;  %2926 = vmatprep.subr.bf16.mxu1 %v4468_v27  ;;  %v4522_v18 = vcombine.high %v1330_v15, %v1334_v16  ;;  %v4521_v20 = vcombine.low %v1330_v15, %v1334_v16  ;;  %v4523_v21 = vcombine.low %v1331_v17, %v1335_v19  ;;  %v5553_v15 = vld [vmem:[#allocation10 + $0x428] sm:$0xff] }
 0x289   :  { %v4524_v22 = vcombine.high %v1331_v17, %v1335_v19  ;;  %v5562_v19 = vsub.s32 2, %v5515_v36 }
 0x28b   :  { %2841 = vmatpush1.bf16.msra.mxu0 %v4465_v24  ;;  %2927 = vmatpush1.bf16.msra.mxu1 %v4467_v25  ;;  %v1342_v24 = vld [vmem:[#allocation10 + $0x2a0] sm:$0xff]  ;;  %v1339_v25 = vld [vmem:[#allocation10 + $0x288] sm:$0xff] }
 0x28c   :  { %2842 = vmatprep.subr.bf16.mxu0 %v4474_v31  ;;  %2928 = vmatprep.subr.bf16.mxu1 %v4476_v35  ;;  %v4530_v27 = vcombine.high %v1338_v23, %v1342_v24  ;;  %v4529_v29 = vcombine.low %v1338_v23, %v1342_v24  ;;  %v4531_v30 = vcombine.low %v1339_v25, %v1343_v28 }
 0x28d   :  { %v4532_v31 = vcombine.high %v1339_v25, %v1343_v28 }
 0x28f   :  { %2843 = vmatpush1.bf16.msra.mxu0 %v4473_v33  ;;  %2929 = vmatpush1.bf16.msra.mxu1 %v4475_v34  ;;  %v1350_v33 = vld [vmem:[#allocation10 + $0x2e0] sm:$0xff]  ;;  %v1347_v34 = vld [vmem:[#allocation10 + $0x2c8] sm:$0xff] }
 0x290   :  { %2844 = vmatprep.subr.bf16.mxu0 %v4482_v47  ;;  %2930 = vmatprep.subr.bf16.mxu1 %v4484_v52  ;;  %v4538_v35 = vcombine.high %v1346_v32, %v1350_v33  ;;  %v4537_v42 = vcombine.low %v1346_v32, %v1350_v33  ;;  %v4539_v44 = vcombine.low %v1347_v34, %v1351_v38 }
 0x291   :  { %v4540_v47 = vcombine.high %v1347_v34, %v1351_v38 }
 0x293   :  { %2845 = vmatpush1.bf16.msra.mxu0 %v4481_v50  ;;  %2931 = vmatpush1.bf16.msra.mxu1 %v4483_v51  ;;  %v1358_v50 = vld [vmem:[#allocation10 + $0x320] sm:$0xff]  ;;  %v1355_v51 = vld [vmem:[#allocation10 + $0x308] sm:$0xff] }
 0x294   :  { %2846 = vmatprep.subr.bf16.mxu0 %v4490_v56  ;;  %2932 = vmatprep.subr.bf16.mxu1 %v4492_v41  ;;  %v4546_v52 = vcombine.high %v1354_v49, %v1358_v50  ;;  %v4545_v54 = vcombine.low %v1354_v49, %v1358_v50  ;;  %v4547_v55 = vcombine.low %v1355_v51, %v1359_v53 }
 0x295   :  { %v4548_v56 = vcombine.high %v1355_v51, %v1359_v53 }
 0x297   :  { %2847 = vmatpush1.bf16.msra.mxu0 %v4489_v58  ;;  %2933 = vmatpush1.bf16.msra.mxu1 %v4491_v40  ;;  %v1366_v58 = vld [vmem:[#allocation10 + $0x360] sm:$0xff]  ;;  %v1363_v40 = vld [vmem:[#allocation10 + $0x348] sm:$0xff] }
 0x298   :  { %2848 = vmatprep.subr.bf16.mxu0 %v4498_v43  ;;  %2934 = vmatprep.subr.bf16.mxu1 %v4500_v62  ;;  %v4554_v41 = vcombine.high %v1362_v57, %v1366_v58  ;;  %v4553_v48 = vcombine.low %v1362_v57, %v1366_v58  ;;  %v4555_v45 = vcombine.low %v1363_v40, %v1367_v46 }
 0x299   :  { %v4556_v43 = vcombine.high %v1363_v40, %v1367_v46 }
 0x29b   :  { %2849 = vmatpush1.bf16.msra.mxu0 %v4497_v60  ;;  %2935 = vmatpush1.bf16.msra.mxu1 %v4499_v61  ;;  %v1374_v60 = vld [vmem:[#allocation10 + $0x3a0] sm:$0xff]  ;;  %v1371_v61 = vld [vmem:[#allocation10 + $0x388] sm:$0xff] }
 0x29c   :  { %2850 = vmatprep.subr.bf16.mxu0 %v4506_v2  ;;  %2936 = vmatprep.subr.bf16.mxu1 %v4508_v6  ;;  %v4562_v62 = vcombine.high %v1370_v59, %v1374_v60  ;;  %v4561_v0 = vcombine.low %v1370_v59, %v1374_v60  ;;  %v4563_v1 = vcombine.low %v1371_v61, %v1375_v63 }
 0x29d   :  { %v4564_v2 = vcombine.high %v1371_v61, %v1375_v63 }
 0x29f   :  { %2851 = vmatpush1.bf16.msra.mxu0 %v4505_v4  ;;  %2937 = vmatpush1.bf16.msra.mxu1 %v4507_v5  ;;  %v1382_v4 = vld [vmem:[#allocation10 + $0x3e0] sm:$0xff]  ;;  %v1379_v5 = vld [vmem:[#allocation10 + $0x3c8] sm:$0xff] }
 0x2a0   :  { %2852 = vmatprep.subr.bf16.mxu0 %v4514_v10  ;;  %2938 = vmatprep.subr.bf16.mxu1 %v4516_v14  ;;  %v4569_v6 = vcombine.low %v1378_v3, %v1382_v4  ;;  %v4570_v7 = vcombine.high %v1378_v3, %v1382_v4  ;;  %v4571_v9 = vcombine.low %v1379_v5, %v1383_v8 }
 0x2a1   :  { %v4572_v10 = vcombine.high %v1379_v5, %v1383_v8 }
 0x2a3   :  { %2853 = vmatpush1.bf16.msra.mxu0 %v4513_v12  ;;  %2939 = vmatpush1.bf16.msra.mxu1 %v4515_v13  ;;  %v5547_v12 = vld [vmem:[#allocation10 + $0x420] sm:$0xff]  ;;  %v5549_v13 = vld [vmem:[#allocation10 + $0x408] sm:$0xff] }
 0x2a4   :  { %2854 = vmatprep.subr.bf16.mxu0 %v4522_v18  ;;  %2940 = vmatprep.subr.bf16.mxu1 %v4524_v22  ;;  %v4578_v14 = vcombine.high %v5545_v11, %v5547_v12  ;;  %v4577_v16 = vcombine.low %v5545_v11, %v5547_v12  ;;  %v4579_v17 = vcombine.low %v5549_v13, %v5553_v15 }
 0x2a5   :  { %v4580_v18 = vcombine.high %v5549_v13, %v5553_v15 }
 0x2a7   :  { %2855 = vmatpush1.bf16.msra.mxu0 %v4521_v20  ;;  %2941 = vmatpush1.bf16.msra.mxu1 %v4523_v21  ;;  %v582_v20 = vld [vmem:[%s5916_s8] sm:$0xf]  ;;  %v5568_v21 = vsub.s32 3, %v5515_v36 }
 0x2a8   :  { %2856 = vmatprep.subr.bf16.mxu0 %v4530_v27  ;;  %2942 = vmatprep.subr.bf16.mxu1 %v4532_v31  ;;  %v5571_v22 = vrot.slane %v582_v20, %v5518_v37  ;;  %v595_v23 = vrot.slane %v582_v20, %v5562_v19  ;;  %v5575_v24 = vrot.slane %v582_v20, %v5521_v39 }
 0x2a9   :  { %v5578_v25 = vrot.slane %v582_v20, %v5568_v21 }
 0x2ab   :  { %2857 = vmatpush1.bf16.msra.mxu0 %v4529_v29  ;;  %2943 = vmatpush1.bf16.msra.mxu1 %v4531_v30 }
 0x2ac   :  { %2858 = vmatprep.subr.bf16.mxu0 %v4538_v35  ;;  %2944 = vmatprep.subr.bf16.mxu1 %v4540_v47 }
 0x2af   :  { %2859 = vmatpush1.bf16.msra.mxu0 %v4537_v42  ;;  %2945 = vmatpush1.bf16.msra.mxu1 %v4539_v44 }
 0x2b0   :  { %2860 = vmatprep.subr.bf16.mxu0 %v4546_v52  ;;  %2946 = vmatprep.subr.bf16.mxu1 %v4548_v56 }
 0x2b3   :  { %2861 = vmatpush1.bf16.msra.mxu0 %v4545_v54  ;;  %2947 = vmatpush1.bf16.msra.mxu1 %v4547_v55 }
 0x2b4   :  { %2862 = vmatprep.subr.bf16.mxu0 %v4554_v41  ;;  %2948 = vmatprep.subr.bf16.mxu1 %v4556_v43 }
 0x2b7   :  { %2863 = vmatpush1.bf16.msra.mxu0 %v4553_v48  ;;  %2949 = vmatpush1.bf16.msra.mxu1 %v4555_v45 }
 0x2b8   :  { %2864 = vmatprep.subr.bf16.mxu0 %v4562_v62  ;;  %2950 = vmatprep.subr.bf16.mxu1 %v4564_v2 }
 0x2bb   :  { %2865 = vmatpush1.bf16.msra.mxu0 %v4561_v0  ;;  %2951 = vmatpush1.bf16.msra.mxu1 %v4563_v1 }
 0x2bc   :  { %2866 = vmatprep.subr.bf16.mxu0 %v4570_v7  ;;  %2952 = vmatprep.subr.bf16.mxu1 %v4572_v10 }
 0x2bf   :  { %2867 = vmatpush1.bf16.msra.mxu0 %v4569_v6  ;;  %2953 = vmatpush1.bf16.msra.mxu1 %v4571_v9 }
 0x2c0   :  { %2879 = vmatprep.subr.bf16.mxu0 %v4578_v14  ;;  %2965 = vmatprep.subr.bf16.mxu1 %v4580_v18 }
 0x355   :  { %v958_v27 = vpop.f32.mrb[4].mxu0  ;;  %v1001_v28 = vpop.f32.mrb[4].mxu1 }
 0x356   :  { %v5581_v29 = vadd.f32 %v958_v27, %v5571_v22  ;;  %v5583_v30 = vadd.f32 %v1001_v28, %v595_v23  ;;  %v960_v31 = vpop.f32.mrb[5].mxu0  ;;  %v1003_v32 = vpop.f32.mrb[5].mxu1 }
 0x357   :  { %v5586_v33 = vadd.f32 %v960_v31, %v5575_v24  ;;  %v5589_v34 = vadd.f32 %v1003_v32, %v5578_v25  ;;  %v5591_v35 = vpop.f32.mrb[6].mxu0  ;;  %v1005_v38 = vpop.f32.mrb[6].mxu1 }
 0x358   :  { %v1010_v42 = vsel %vm149_vm4, %v5581_v29, 0.0  ;;  %v1012_v44 = vsel %vm149_vm4, %v5583_v30, 0.0  ;;  %v5599_v47 = vadd.f32 %v1005_v38, %v595_v23  ;;  %v5601_v49 = vpop.f32.mrb[7].mxu0  ;;  %v5603_v50 = vpop.f32.mrb[7].mxu1 }
 0x359   :  { %v1019_v51 = vrot.slane %v1010_v42, 4  ;;  %v1046_v52 = vmul.f32 %v1010_v42, %v1010_v42  ;;  %v1033_v53 = vrot.slane %v1012_v44, 4  ;;  %v1048_v54 = vmul.f32 %v1012_v44, %v1012_v44 }
 0x35a   :  { %v1011_v55 = vsel %vm149_vm4, %v5586_v33, 0.0  ;;  %v1013_v56 = vsel %vm149_vm4, %v5589_v34, 0.0 }
 0x35b   :  { %v1020_v57 = vadd.f32 %v1019_v51, %v1010_v42  ;;  %v1055_v58 = vrot.slane %v1046_v52, 4  ;;  %v1034_v40 = vadd.f32 %v1033_v53, %v1012_v44  ;;  %v1069_v41 = vrot.slane %v1048_v54, 4 }
 0x35c   :  { %v1026_v46 = vrot.slane %v1011_v55, 4  ;;  %v1047_v48 = vmul.f32 %v1011_v55, %v1011_v55  ;;  %v1040_v45 = vrot.slane %v1013_v56, 4  ;;  %v1049_v43 = vmul.f32 %v1013_v56, %v1013_v56 }
 0x35d   :  { %v1021_v59 = vrot.slane %v1020_v57, 2  ;;  %v1056_v60 = vadd.f32 %v1055_v58, %v1046_v52  ;;  %v1035_v61 = vrot.slane %v1034_v40, 2  ;;  %v1070_v62 = vadd.f32 %v1069_v41, %v1048_v54 }
 0x35e   :  { %v1027_v63 = vadd.f32 %v1026_v46, %v1011_v55  ;;  %v1062_v0 = vrot.slane %v1047_v48, 4  ;;  %v1041_v1 = vadd.f32 %v1040_v45, %v1013_v56  ;;  %v1076_v2 = vrot.slane %v1049_v43, 4 }
 0x35f   :  { %v1022_v3 = vadd.f32 %v1021_v59, %v1020_v57  ;;  %v1057_v4 = vrot.slane %v1056_v60, 2  ;;  %v1036_v5 = vadd.f32 %v1035_v61, %v1034_v40  ;;  %v1071_v6 = vrot.slane %v1070_v62, 2 }
 0x360   :  { %v1028_v7 = vrot.slane %v1027_v63, 2  ;;  %v1063_v8 = vadd.f32 %v1062_v0, %v1047_v48  ;;  %v1042_v9 = vrot.slane %v1041_v1, 2  ;;  %v1077_v10 = vadd.f32 %v1076_v2, %v1049_v43 }
 0x361   :  { %v1023_v14 = vrot.slane %v1022_v3, 1  ;;  %v1058_v18 = vadd.f32 %v1057_v4, %v1056_v60  ;;  %v1037_v20 = vrot.slane %v1036_v5, 1  ;;  %v1072_v23 = vadd.f32 %v1071_v6, %v1070_v62 }
 0x362   :  { %v1029_v27 = vadd.f32 %v1028_v7, %v1027_v63  ;;  %v1064_v28 = vrot.slane %v1063_v8, 2  ;;  %v1043_v31 = vadd.f32 %v1042_v9, %v1041_v1  ;;  %v1078_v32 = vrot.slane %v1077_v10, 2 }
 0x363   :  { %v1024_v38 = vadd.f32 %v1023_v14, %v1022_v3  ;;  %v1059_v42 = vrot.slane %v1058_v18, 1  ;;  %v1038_v44 = vadd.f32 %v1037_v20, %v1036_v5  ;;  %v1073_v51 = vrot.slane %v1072_v23, 1 }
 0x364   :  { %v1030_v52 = vrot.slane %v1029_v27, 1  ;;  %v1065_v53 = vadd.f32 %v1064_v28, %v1063_v8  ;;  %v1044_v54 = vrot.slane %v1043_v31, 1  ;;  %v1079_v55 = vadd.f32 %v1078_v32, %v1077_v10 }
 0x365   :  { %v1060_v56 = vadd.f32 %v1059_v42, %v1058_v18  ;;  %v1082_v57 = vmul.f32 0.5, %v1024_v38  ;;  %v1074_v58 = vadd.f32 %v1073_v51, %v1072_v23  ;;  %v1084_v40 = vmul.f32 0.5, %v1038_v44 }
 0x366   :  { %v1031_v41 = vadd.f32 %v1030_v52, %v1029_v27  ;;  %v1066_v46 = vrot.slane %v1065_v53, 1  ;;  %v1045_v48 = vadd.f32 %v1044_v54, %v1043_v31  ;;  %v1080_v45 = vrot.slane %v1079_v55, 1  ;;  %v1098_v52 = vld [vmem:[%s5917_s9] sm:$0xf] }
 0x367   :  { %v1086_v43 = vmul.f32 0.5, %v1060_v56  ;;  %v1090_v59 = vmul.f32 %v1082_v57, %v1082_v57  ;;  %v1088_v60 = vmul.f32 0.5, %v1074_v58  ;;  %v1092_v61 = vmul.f32 %v1084_v40, %v1084_v40 }
 0x368   :  { %v1067_v62 = vadd.f32 %v1066_v46, %v1065_v53  ;;  %v1083_v63 = vmul.f32 0.5, %v1031_v41  ;;  %v1081_v0 = vadd.f32 %v1080_v45, %v1079_v55  ;;  %v1085_v1 = vmul.f32 0.5, %v1045_v48 }
 0x369   :  { %v1094_v2 = vsub.f32 %v1086_v43, %v1090_v59  ;;  %v1096_v3 = vsub.f32 %v1088_v60, %v1092_v61  ;;  %v963_v46 = vadd.f32 %v5591_v35, %v5571_v22  ;;  %v965_v48 = vadd.f32 %v5601_v49, %v5575_v24 }
 0x36a   :  { %v1087_v4 = vmul.f32 0.5, %v1067_v62  ;;  %v1091_v5 = vmul.f32 %v1083_v63, %v1083_v63  ;;  %v1089_v6 = vmul.f32 0.5, %v1081_v0  ;;  %v1093_v7 = vmul.f32 %v1085_v1, %v1085_v1 }
 0x36b   :  { %v1099_v8 = vadd.f32 0.8, %v1094_v2  ;;  %v1101_v9 = vadd.f32 0.8, %v1096_v3  ;;  %v1008_v45 = vadd.f32 %v5603_v50, %v5578_v25 }
 0x36c   :  { %v1095_v10 = vsub.f32 %v1087_v4, %v1091_v5  ;;  %v1097_v14 = vsub.f32 %v1089_v6, %v1093_v7 }
 0x36d   :  { %5110 = vrsqrt.f32 %v1099_v8 }
 0x36e   :  { %v1100_v18 = vadd.f32 0.8, %v1095_v10  ;;  %v1102_v20 = vadd.f32 0.8, %v1097_v14  ;;  %5112 = vrsqrt.f32 %v1101_v9 }
 0x370   :  { %5114 = vrsqrt.f32 %v1100_v18 }
 0x371   :  { %5116 = vrsqrt.f32 %v1102_v20 }
 0x377   :  { %v5111_v23 = vpop.eup %5110 }
 0x378   :  { %v5113_v27 = vpop.eup %5112 }
 0x37a   :  { %v5115_v28 = vpop.eup %5114 }
 0x37b   :  { %v5117_v31 = vpop.eup %5116  ;;  %v1111_v32 = vcombine.low %v5111_v23, %v5115_v28 }
 0x37c   :  { %v1112_v38 = vcombine.low %v5113_v27, %v5117_v31 }
 0x37d   :  { %v1119_v42 = vrot.slane %v1111_v32, %v5534_v26 }
 0x37e   :  { %v1126_v44 = vrot.slane %v1112_v38, %v5534_v26 }
 0x380   :  { %v1127_v51 = vcombine.low %v1119_v42, %v1126_v44 }
 0x382   :  { %v1134_v53 = vrot.slane %v1127_v51, %v5534_v26  ;;  %v1394_v51 = vld [vmem:[#allocation10 + $0x440] sm:$0xff] }
 0x384   :  { %v1136_v54 = vmul.f32 %v1134_v53, %v1098_v52 }
 0x386   :  { %v1142_v55 = vrot.slane %v1136_v54, %v5518_v37  ;;  %v1146_v56 = vrot.slane %v1136_v54, %v5521_v39  ;;  %v1150_v58 = vrot.slane %v1136_v54, %v5562_v19  ;;  %v1154_v41 = vrot.slane %v1136_v54, %v5568_v21 }
 0x388   :  { %v1159_v43 = vmul.f32 %v1142_v55, %v1082_v57  ;;  %v1160_v59 = vmul.f32 %v1146_v56, %v1083_v63  ;;  %v1161_v60 = vmul.f32 %v1150_v58, %v1084_v40  ;;  %v1162_v61 = vmul.f32 %v1154_v41, %v1085_v1 }
 0x389   :  { %v1196_v62 = vmul.f32 %v1154_v41, %v5589_v34  ;;  %v1193_v0 = vmul.f32 %v1142_v55, %v5581_v29  ;;  %v1197_v2 = vmul.f32 %v1142_v55, %v963_v46  ;;  %v1195_v3 = vmul.f32 %v1150_v58, %v5583_v30  ;;  %v1137_v29 = vld [vmem:[%s5918_s10] sm:$0xf]  ;;  %v1398_v55 = vld [vmem:[#allocation10 + $0x460] sm:$0xff] }
 0x38a   :  { %v1167_v4 = vcombine.low %v1159_v43, %v1160_v59  ;;  %v1168_v5 = vcombine.low %v1161_v60, %v1162_v61  ;;  %v1199_v22 = vmul.f32 %v1150_v58, %v5599_v47  ;;  %v1194_v24 = vmul.f32 %v1146_v56, %v5586_v33  ;;  %v1399_v58 = vld [vmem:[#allocation10 + $0x468] sm:$0xff]  ;;  %v1402_v59 = vld [vmem:[#allocation10 + $0x480] sm:$0xff] }
 0x38b   :  { %v1198_v35 = vmul.f32 %v1146_v56, %v965_v48  ;;  %v1200_v49 = vmul.f32 %v1154_v41, %v1008_v45  ;;  %v1395_v56 = vld [vmem:[#allocation10 + $0x448] sm:$0xff]  ;;  %v4586_v61 = vcombine.high %v1394_v51, %v1398_v55 }
 0x38c   :  { %v1175_v25 = vrot.slane %v1167_v4, %v5534_v26  ;;  %v1182_v50 = vrot.slane %v1168_v5, %v5534_v26 }
 0x38e   :  { %v1183_v57 = vcombine.low %v1175_v25, %v1182_v50  ;;  %v1410_v25 = vld [vmem:[#allocation10 + $0x4c0] sm:$0xff] }
 0x38f   :  { %v1414_v50 = vld [vmem:[#allocation10 + $0x4e0] sm:$0xff] }
 0x390   :  { %v1190_v34 = vrot.slane %v1183_v57, %v5534_v26  ;;  %v1411_v57 = vld [vmem:[#allocation10 + $0x4c8] sm:$0xff]  ;;  %v4602_v13 = vcombine.high %v1410_v25, %v1414_v50 }
 0x392   :  { %v1192_v30 = vsub.f32 %v1137_v29, %v1190_v34  ;;  %v1415_v29 = vld [vmem:[#allocation10 + $0x4e8] sm:$0xff] }
 0x393   :  { %v4604_v15 = vcombine.high %v1411_v57, %v1415_v29  ;;  %v1419_v34 = vld [vmem:[#allocation10 + $0x508] sm:$0xff] }
 0x394   :  { %v1217_v40 = vrot.slane %v1192_v30, %v5568_v21  ;;  %v1205_v47 = vrot.slane %v1192_v30, %v5518_v37  ;;  %v1213_v33 = vrot.slane %v1192_v30, %v5562_v19  ;;  %v1209_v63 = vrot.slane %v1192_v30, %v5521_v39  ;;  %v1423_v30 = vld [vmem:[#allocation10 + $0x528] sm:$0xff] }
 0x396   :  { %v1225_v1 = vadd.f32 %v1217_v40, %v1196_v62  ;;  %v1222_v6 = vadd.f32 %v1205_v47, %v1193_v0  ;;  %v1226_v7 = vadd.f32 %v1205_v47, %v1197_v2  ;;  %v1224_v8 = vadd.f32 %v1213_v33, %v1195_v3  ;;  %v1406_v0 = vld [vmem:[#allocation10 + $0x4a0] sm:$0xff]  ;;  %v1403_v2 = vld [vmem:[#allocation10 + $0x488] sm:$0xff] }
 0x397   :  { %v1228_v9 = vadd.f32 %v1213_v33, %v1199_v22  ;;  %v1223_v10 = vadd.f32 %v1209_v63, %v1194_v24  ;;  %v1227_v14 = vadd.f32 %v1209_v63, %v1198_v35  ;;  %v1229_v18 = vadd.f32 %v1217_v40, %v1200_v49  ;;  %v1407_v3 = vld [vmem:[#allocation10 + $0x4a8] sm:$0xff] }
 0x398   :  { %vm1233_vm9 = vcmp.gt.f32.partialorder %v1225_v1, 0.0  ;;  %v1241_v20 = vmul.f32 0.2, %v1225_v1  ;;  %vm1234_vm10 = vcmp.gt.f32.partialorder %v1226_v7, 0.0  ;;  %v1242_v23 = vmul.f32 0.2, %v1226_v7 }
 0x399   :  { %vm1236_vm11 = vcmp.gt.f32.partialorder %v1228_v9, 0.0  ;;  %v1244_v27 = vmul.f32 0.2, %v1228_v9  ;;  %vm1235_vm12 = vcmp.gt.f32.partialorder %v1227_v14, 0.0  ;;  %v1243_v28 = vmul.f32 0.2, %v1227_v14 }
 0x39a   :  { %vm1237_vm13 = vcmp.gt.f32.partialorder %v1229_v18, 0.0  ;;  %v1245_v31 = vmul.f32 0.2, %v1229_v18  ;;  %vm1231_vm14 = vcmp.gt.f32.partialorder %v1223_v10, 0.0  ;;  %v1239_v32 = vmul.f32 0.2, %v1223_v10 }
 0x39b   :  { %v1251_v38 = vsel %vm1235_vm12, %v1227_v14, %v1243_v28  ;;  %vm1230_vm15 = vcmp.gt.f32.partialorder %v1222_v6, 0.0  ;;  %v1238_v42 = vmul.f32 0.2, %v1222_v6  ;;  %v1250_v44 = vsel %vm1234_vm10, %v1226_v7, %v1242_v23  ;;  %v1427_v7 = vld [vmem:[#allocation10 + $0x548] sm:$0xff]  ;;  %v1438_v23 = vld [vmem:[#allocation10 + $0x5a0] sm:$0xff] }
 0x39c   :  { %v1247_v52 = vsel %vm1231_vm14, %v1223_v10, %v1239_v32  ;;  %v1249_v53 = vsel %vm1233_vm9, %v1225_v1, %v1241_v20  ;;  %v1253_v54 = vsel %vm1237_vm13, %v1229_v18, %v1245_v31  ;;  %vm1232_vm0 = vcmp.gt.f32.partialorder %v1224_v8, 0.0  ;;  %v1426_v1 = vld [vmem:[#allocation10 + $0x540] sm:$0xff]  ;;  %v1439_v28 = vld [vmem:[#allocation10 + $0x5a8] sm:$0xff] }
 0x39d   :  { %v5643_v41 = vpack.c.bf16 %v1251_v38, %v1247_v52  ;;  %v1246_v46 = vsel %vm1230_vm15, %v1222_v6, %v1238_v42  ;;  %v5645_v48 = vpack.c.bf16 %v1253_v54, %v1249_v53  ;;  %v1240_v45 = vmul.f32 0.2, %v1224_v8  ;;  %v1430_v6 = vld [vmem:[#allocation10 + $0x560] sm:$0xff]  ;;  %v1443_v52 = vld [vmem:[#allocation10 + $0x5c8] sm:$0xff] }
 0x39e   :  { %v5647_v43 = vpack.c.bf16 %v1250_v44, %v1246_v46  ;;  %v1252_v60 = vsel %vm1236_vm11, %v1228_v9, %v1244_v27  ;;  %v4588_v62 = vcombine.high %v1395_v56, %v1399_v58  ;;  %v4585_v22 = vcombine.low %v1394_v51, %v1398_v55  ;;  %v1434_v20 = vld [vmem:[#allocation10 + $0x580] sm:$0xff]  ;;  %v1435_v27 = vld [vmem:[#allocation10 + $0x588] sm:$0xff] }
 0x39f   :  { %2868 = vmatprep.mubr.bf16.mxu0 %v5643_v41  ;;  %2954 = vmatprep.mubr.bf16.mxu1 %v5643_v41  ;;  %v1248_v4 = vsel %vm1232_vm0, %v1224_v8, %v1240_v45  ;;  %v4587_v24 = vcombine.low %v1395_v56, %v1399_v58  ;;  %v4594_v35 = vcombine.high %v1402_v59, %v1406_v0  ;;  %v1431_v8 = vld [vmem:[#allocation10 + $0x568] sm:$0xff]  ;;  %v1442_v44 = vld [vmem:[#allocation10 + $0x5c0] sm:$0xff] }
 0x3a0   :  { %2869 = vmatmul.mubr.bf16.vlgmr.msra.gmra.mrb[8].mxu0 %v5647_v43  ;;  %2955 = vmatmul.mubr.bf16.vlgmr.msra.gmra.mrb[8].mxu1 %v5647_v43  ;;  %v5654_v5 = vpack.c.bf16 %v1252_v60, %v1248_v4  ;;  %v4596_v49 = vcombine.high %v1403_v2, %v1407_v3  ;;  %v4593_v11 = vcombine.low %v1402_v59, %v1406_v0  ;;  %v1446_v51 = vld [vmem:[#allocation10 + $0x5e0] sm:$0xff]  ;;  %v1447_v53 = vld [vmem:[#allocation10 + $0x5e8] sm:$0xff] }
 0x3a1   :  { %2880 = vmatpush1.bf16.msra.mxu0 %v4577_v16  ;;  %2966 = vmatpush1.bf16.msra.mxu1 %v4579_v17  ;;  %v4595_v12 = vcombine.low %v1403_v2, %v1407_v3  ;;  %v1418_v16 = vld [vmem:[#allocation10 + $0x500] sm:$0xff]  ;;  %v4601_v40 = vcombine.low %v1410_v25, %v1414_v50  ;;  %v4603_v47 = vcombine.low %v1411_v57, %v1415_v29  ;;  %v1451_v59 = vld [vmem:[#allocation10 + $0x608] sm:$0xff] }
 0x3a2   :  { %2911 = vmatprep.mubr.bf16.mxu0 %v5645_v48  ;;  %2997 = vmatprep.mubr.bf16.mxu1 %v5645_v48  ;;  %v1422_v17 = vld [vmem:[#allocation10 + $0x520] sm:$0xff]  ;;  %v4612_v63 = vcombine.high %v1419_v34, %v1423_v30  ;;  %v4611_v10 = vcombine.low %v1419_v34, %v1423_v30  ;;  %v4618_v14 = vcombine.high %v1426_v1, %v1430_v6  ;;  %v1455_v60 = vld [vmem:[#allocation10 + $0x628] sm:$0xff] }
 0x3a3   :  { %2881 = vmatprep.subr.bf16.mxu0 %v4586_v61  ;;  %2967 = vmatprep.subr.bf16.mxu1 %v4588_v62  ;;  %v4610_v33 = vcombine.high %v1418_v16, %v1422_v17  ;;  %v4609_v9 = vcombine.low %v1418_v16, %v1422_v17  ;;  %v4620_v18 = vcombine.high %v1427_v7, %v1431_v8  ;;  %v1450_v46 = vld [vmem:[#allocation10 + $0x600] sm:$0xff] }
 0x3a4   :  { %v4617_v31 = vcombine.low %v1426_v1, %v1430_v6  ;;  %v4619_v32 = vcombine.low %v1427_v7, %v1431_v8  ;;  %v4626_v38 = vcombine.high %v1434_v20, %v1438_v23  ;;  %v4628_v42 = vcombine.high %v1435_v27, %v1439_v28  ;;  %v1454_v45 = vld [vmem:[#allocation10 + $0x620] sm:$0xff] }
 0x3a5   :  { %2882 = vmatpush1.bf16.msra.mxu0 %v4585_v22  ;;  %2968 = vmatpush1.bf16.msra.mxu1 %v4587_v24  ;;  %v4625_v54 = vcombine.low %v1434_v20, %v1438_v23  ;;  %v4627_v55 = vcombine.low %v1435_v27, %v1439_v28  ;;  %v4634_v56 = vcombine.high %v1442_v44, %v1446_v51  ;;  %v1458_v3 = vld [vmem:[#allocation10 + $0x640] sm:$0xff]  ;;  %v1459_v22 = vld [vmem:[#allocation10 + $0x648] sm:$0xff] }
 0x3a6   :  { %2883 = vmatprep.subr.bf16.mxu0 %v4594_v35  ;;  %2969 = vmatprep.subr.bf16.mxu1 %v4596_v49  ;;  %v4636_v58 = vcombine.high %v1443_v52, %v1447_v53  ;;  %v4633_v61 = vcombine.low %v1442_v44, %v1446_v51  ;;  %v4635_v62 = vcombine.low %v1443_v52, %v1447_v53  ;;  %v1462_v4 = vld [vmem:[#allocation10 + $0x660] sm:$0xff]  ;;  %v1463_v24 = vld [vmem:[#allocation10 + $0x668] sm:$0xff] }
 0x3a7   :  { %v4642_v0 = vcombine.high %v1450_v46, %v1454_v45  ;;  %v4644_v2 = vcombine.high %v1451_v59, %v1455_v60  ;;  %v4641_v35 = vcombine.low %v1450_v46, %v1454_v45  ;;  %v4643_v49 = vcombine.low %v1451_v59, %v1455_v60  ;;  %v1466_v57 = vld [vmem:[#allocation10 + $0x680] sm:$0xff] }
 0x3a8   :  { %v4650_v25 = vcombine.high %v1458_v3, %v1462_v4  ;;  %v4652_v50 = vcombine.high %v1459_v22, %v1463_v24  ;;  %v1470_v29 = vld [vmem:[#allocation10 + $0x6a0] sm:$0xff] }
 0x3a9   :  { %2884 = vmatpush1.bf16.msra.mxu0 %v4593_v11  ;;  %2970 = vmatpush1.bf16.msra.mxu1 %v4595_v12  ;;  %v1467_v11 = vld [vmem:[#allocation10 + $0x688] sm:$0xff]  ;;  %v4658_v16 = vcombine.high %v1466_v57, %v1470_v29  ;;  %v1474_v34 = vld [vmem:[#allocation10 + $0x6c0] sm:$0xff] }
 0x3aa   :  { %2885 = vmatprep.subr.bf16.mxu0 %v4602_v13  ;;  %2971 = vmatprep.subr.bf16.mxu1 %v4604_v15  ;;  %v1471_v12 = vld [vmem:[#allocation10 + $0x6a8] sm:$0xff]  ;;  %v4649_v13 = vcombine.low %v1458_v3, %v1462_v4  ;;  %v4651_v15 = vcombine.low %v1459_v22, %v1463_v24  ;;  %v1478_v30 = vld [vmem:[#allocation10 + $0x6e0] sm:$0xff]  ;;  %v1260_v22 = vld [vmem:[#allocation10 + $0x10] sm:$0xff] }
 0x3ab   :  { %v4660_v17 = vcombine.high %v1467_v11, %v1471_v12  ;;  %v4666_v1 = vcombine.high %v1474_v34, %v1478_v30  ;;  %v1482_v7 = vld [vmem:[#allocation10 + $0x700] sm:$0xff]  ;;  %v1264_v24 = vld [vmem:[#allocation10 + $0x30] sm:$0xff] }
 0x3ac   :  { %v1486_v8 = vld [vmem:[#allocation10 + $0x720] sm:$0xff] }
 0x3ad   :  { %2886 = vmatpush1.bf16.msra.mxu0 %v4601_v40  ;;  %2972 = vmatpush1.bf16.msra.mxu1 %v4603_v47  ;;  %v1475_v40 = vld [vmem:[#allocation10 + $0x6c8] sm:$0xff]  ;;  %v4674_v20 = vcombine.high %v1482_v7, %v1486_v8  ;;  %v1490_v27 = vld [vmem:[#allocation10 + $0x740] sm:$0xff] }
 0x3ae   :  { %2887 = vmatprep.subr.bf16.mxu0 %v4610_v33  ;;  %2973 = vmatprep.subr.bf16.mxu1 %v4612_v63  ;;  %v1479_v47 = vld [vmem:[#allocation10 + $0x6e8] sm:$0xff]  ;;  %v4657_v33 = vcombine.low %v1466_v57, %v1470_v29  ;;  %v4659_v63 = vcombine.low %v1467_v11, %v1471_v12  ;;  %v1494_v28 = vld [vmem:[#allocation10 + $0x760] sm:$0xff]  ;;  %v4454_v57 = vcombine.high %v1260_v22, %v1264_v24  ;;  %v1268_v11 = vld [vmem:[#allocation10 + $0x50] sm:$0xff] }
 0x3af   :  { %v4668_v6 = vcombine.high %v1475_v40, %v1479_v47  ;;  %v4682_v44 = vcombine.high %v1490_v27, %v1494_v28  ;;  %v1498_v52 = vld [vmem:[#allocation10 + $0x780] sm:$0xff]  ;;  %v1272_v12 = vld [vmem:[#allocation10 + $0x70] sm:$0xff] }
 0x3b0   :  { %v1502_v53 = vld [vmem:[#allocation10 + $0x7a0] sm:$0xff] }
 0x3b1   :  { %2888 = vmatpush1.bf16.msra.mxu0 %v4609_v9  ;;  %2974 = vmatpush1.bf16.msra.mxu1 %v4611_v10  ;;  %v1483_v9 = vld [vmem:[#allocation10 + $0x708] sm:$0xff]  ;;  %v4690_v46 = vcombine.high %v1498_v52, %v1502_v53  ;;  %v1506_v59 = vld [vmem:[#allocation10 + $0x7c0] sm:$0xff] }
 0x3b2   :  { %2889 = vmatprep.subr.bf16.mxu0 %v4618_v14  ;;  %2975 = vmatprep.subr.bf16.mxu1 %v4620_v18  ;;  %v1487_v10 = vld [vmem:[#allocation10 + $0x728] sm:$0xff]  ;;  %v4665_v14 = vcombine.low %v1474_v34, %v1478_v30  ;;  %v4667_v18 = vcombine.low %v1475_v40, %v1479_v47  ;;  %v1510_v60 = vld [vmem:[#allocation10 + $0x7e0] sm:$0xff]  ;;  %v4462_v34 = vcombine.high %v1268_v11, %v1272_v12  ;;  %v1276_v40 = vld [vmem:[#allocation10 + $0x90] sm:$0xff] }
 0x3b3   :  { %v4676_v23 = vcombine.high %v1483_v9, %v1487_v10  ;;  %v4698_v3 = vcombine.high %v1506_v59, %v1510_v60  ;;  %v1280_v47 = vld [vmem:[#allocation10 + $0xb0] sm:$0xff] }
 0x3b5   :  { %2890 = vmatpush1.bf16.msra.mxu0 %v4617_v31  ;;  %2976 = vmatpush1.bf16.msra.mxu1 %v4619_v32  ;;  %v1491_v31 = vld [vmem:[#allocation10 + $0x748] sm:$0xff] }
 0x3b6   :  { %2891 = vmatprep.subr.bf16.mxu0 %v4626_v38  ;;  %2977 = vmatprep.subr.bf16.mxu1 %v4628_v42  ;;  %v1495_v32 = vld [vmem:[#allocation10 + $0x768] sm:$0xff]  ;;  %v4673_v38 = vcombine.low %v1482_v7, %v1486_v8  ;;  %v4675_v42 = vcombine.low %v1483_v9, %v1487_v10  ;;  %v4470_v7 = vcombine.high %v1276_v40, %v1280_v47  ;;  %v1284_v9 = vld [vmem:[#allocation10 + $0xd0] sm:$0xff] }
 0x3b7   :  { %v4684_v51 = vcombine.high %v1491_v31, %v1495_v32  ;;  %v1288_v10 = vld [vmem:[#allocation10 + $0xf0] sm:$0xff] }
 0x3b9   :  { %2892 = vmatpush1.bf16.msra.mxu0 %v4625_v54  ;;  %2978 = vmatpush1.bf16.msra.mxu1 %v4627_v55  ;;  %v1499_v54 = vld [vmem:[#allocation10 + $0x788] sm:$0xff] }
 0x3ba   :  { %2893 = vmatprep.subr.bf16.mxu0 %v4634_v56  ;;  %2979 = vmatprep.subr.bf16.mxu1 %v4636_v58  ;;  %v1503_v55 = vld [vmem:[#allocation10 + $0x7a8] sm:$0xff]  ;;  %v4681_v56 = vcombine.low %v1490_v27, %v1494_v28  ;;  %v4683_v58 = vcombine.low %v1491_v31, %v1495_v32  ;;  %v4478_v27 = vcombine.high %v1284_v9, %v1288_v10  ;;  %v1292_v31 = vld [vmem:[#allocation10 + $0x110] sm:$0xff] }
 0x3bb   :  { %v4692_v45 = vcombine.high %v1499_v54, %v1503_v55  ;;  %v1296_v32 = vld [vmem:[#allocation10 + $0x130] sm:$0xff] }
 0x3bd   :  { %2894 = vmatpush1.bf16.msra.mxu0 %v4633_v61  ;;  %2980 = vmatpush1.bf16.msra.mxu1 %v4635_v62  ;;  %v1507_v61 = vld [vmem:[#allocation10 + $0x7c8] sm:$0xff] }
 0x3be   :  { %2895 = vmatprep.subr.bf16.mxu0 %v4642_v0  ;;  %2981 = vmatprep.subr.bf16.mxu1 %v4644_v2  ;;  %v1511_v62 = vld [vmem:[#allocation10 + $0x7e8] sm:$0xff]  ;;  %v4689_v0 = vcombine.low %v1498_v52, %v1502_v53  ;;  %v4691_v2 = vcombine.low %v1499_v54, %v1503_v55  ;;  %v1300_v53 = vld [vmem:[#allocation10 + $0x150] sm:$0xff]  ;;  %v1301_v55 = vld [vmem:[#allocation10 + $0x158] sm:$0xff] }
 0x3bf   :  { %v4700_v4 = vcombine.high %v1507_v61, %v1511_v62  ;;  %v1304_v54 = vld [vmem:[#allocation10 + $0x170] sm:$0xff] }
 0x3c1   :  { %2896 = vmatpush1.bf16.msra.mxu0 %v4641_v35  ;;  %2982 = vmatpush1.bf16.msra.mxu1 %v4643_v49  ;;  %v1261_v35 = vld [vmem:[#allocation10 + $0x18] sm:$0xff] }
 0x3c2   :  { %2897 = vmatprep.subr.bf16.mxu0 %v4650_v25  ;;  %2983 = vmatprep.subr.bf16.mxu1 %v4652_v50  ;;  %v1265_v49 = vld [vmem:[#allocation10 + $0x38] sm:$0xff]  ;;  %v4697_v25 = vcombine.low %v1506_v59, %v1510_v60  ;;  %v4699_v50 = vcombine.low %v1507_v61, %v1511_v62  ;;  %v1308_v60 = vld [vmem:[#allocation10 + $0x190] sm:$0xff] }
 0x3c3   :  { %v4456_v29 = vcombine.high %v1261_v35, %v1265_v49  ;;  %v1312_v61 = vld [vmem:[#allocation10 + $0x1b0] sm:$0xff]  ;;  %v1309_v62 = vld [vmem:[#allocation10 + $0x198] sm:$0xff] }
 0x3c5   :  { %2898 = vmatpush1.bf16.msra.mxu0 %v4649_v13  ;;  %2984 = vmatpush1.bf16.msra.mxu1 %v4651_v15  ;;  %v1269_v13 = vld [vmem:[#allocation10 + $0x58] sm:$0xff] }
 0x3c6   :  { %2899 = vmatprep.subr.bf16.mxu0 %v4658_v16  ;;  %2985 = vmatprep.subr.bf16.mxu1 %v4660_v17  ;;  %v1273_v15 = vld [vmem:[#allocation10 + $0x78] sm:$0xff]  ;;  %v4453_v16 = vcombine.low %v1260_v22, %v1264_v24  ;;  %v4455_v17 = vcombine.low %v1261_v35, %v1265_v49  ;;  %v1316_v24 = vld [vmem:[#allocation10 + $0x1d0] sm:$0xff] }
 0x3c7   :  { %v4464_v30 = vcombine.high %v1269_v13, %v1273_v15  ;;  %v1320_v35 = vld [vmem:[#allocation10 + $0x1f0] sm:$0xff]  ;;  %v1317_v49 = vld [vmem:[#allocation10 + $0x1d8] sm:$0xff] }
 0x3c9   :  { %2900 = vmatpush1.bf16.msra.mxu0 %v4657_v33  ;;  %2986 = vmatpush1.bf16.msra.mxu1 %v4659_v63  ;;  %v1277_v33 = vld [vmem:[#allocation10 + $0x98] sm:$0xff] }
 0x3ca   :  { %2901 = vmatprep.subr.bf16.mxu0 %v4666_v1  ;;  %2987 = vmatprep.subr.bf16.mxu1 %v4668_v6  ;;  %v1281_v63 = vld [vmem:[#allocation10 + $0xb8] sm:$0xff]  ;;  %v4461_v1 = vcombine.low %v1268_v11, %v1272_v12  ;;  %v4463_v6 = vcombine.low %v1269_v13, %v1273_v15  ;;  %v1324_v12 = vld [vmem:[#allocation10 + $0x210] sm:$0xff] }
 0x3cb   :  { %v4472_v8 = vcombine.high %v1277_v33, %v1281_v63  ;;  %v1328_v13 = vld [vmem:[#allocation10 + $0x230] sm:$0xff]  ;;  %v1325_v15 = vld [vmem:[#allocation10 + $0x218] sm:$0xff] }
 0x3cd   :  { %2902 = vmatpush1.bf16.msra.mxu0 %v4665_v14  ;;  %2988 = vmatpush1.bf16.msra.mxu1 %v4667_v18  ;;  %v1285_v14 = vld [vmem:[#allocation10 + $0xd8] sm:$0xff] }
 0x3ce   :  { %2903 = vmatprep.subr.bf16.mxu0 %v4674_v20  ;;  %2989 = vmatprep.subr.bf16.mxu1 %v4676_v23  ;;  %v1289_v18 = vld [vmem:[#allocation10 + $0xf8] sm:$0xff]  ;;  %v4469_v20 = vcombine.low %v1276_v40, %v1280_v47  ;;  %v4471_v23 = vcombine.low %v1277_v33, %v1281_v63  ;;  %v1332_v47 = vld [vmem:[#allocation10 + $0x250] sm:$0xff] }
 0x3cf   :  { %v4480_v28 = vcombine.high %v1285_v14, %v1289_v18  ;;  %v1336_v33 = vld [vmem:[#allocation10 + $0x270] sm:$0xff]  ;;  %v1333_v63 = vld [vmem:[#allocation10 + $0x258] sm:$0xff] }
 0x3d1   :  { %2904 = vmatpush1.bf16.msra.mxu0 %v4673_v38  ;;  %2990 = vmatpush1.bf16.msra.mxu1 %v4675_v42  ;;  %v1297_v38 = vld [vmem:[#allocation10 + $0x138] sm:$0xff]  ;;  %v4477_v42 = vcombine.low %v1284_v9, %v1288_v10  ;;  %v1340_v10 = vld [vmem:[#allocation10 + $0x290] sm:$0xff] }
 0x3d2   :  { %2905 = vmatprep.subr.bf16.mxu0 %v4682_v44  ;;  %2991 = vmatprep.subr.bf16.mxu1 %v4684_v51  ;;  %v4479_v44 = vcombine.low %v1285_v14, %v1289_v18  ;;  %v4486_v51 = vcombine.high %v1292_v31, %v1296_v32  ;;  %v1344_v14 = vld [vmem:[#allocation10 + $0x2b0] sm:$0xff]  ;;  %v1341_v18 = vld [vmem:[#allocation10 + $0x298] sm:$0xff] }
 0x3d5   :  { %2906 = vmatpush1.bf16.msra.mxu0 %v4681_v56  ;;  %2992 = vmatpush1.bf16.msra.mxu1 %v4683_v58  ;;  %v1305_v56 = vld [vmem:[#allocation10 + $0x178] sm:$0xff]  ;;  %v4485_v58 = vcombine.low %v1292_v31, %v1296_v32  ;;  %v1348_v32 = vld [vmem:[#allocation10 + $0x2d0] sm:$0xff] }
 0x3d6   :  { %2907 = vmatprep.subr.bf16.mxu0 %v4690_v46  ;;  %2993 = vmatprep.subr.bf16.mxu1 %v4692_v45  ;;  %v4494_v45 = vcombine.high %v1300_v53, %v1304_v54  ;;  %v4496_v59 = vcombine.high %v1301_v55, %v1305_v56 }
 0x3d9   :  { %2908 = vmatpush1.bf16.msra.mxu0 %v4689_v0  ;;  %2994 = vmatpush1.bf16.msra.mxu1 %v4691_v2  ;;  %v1313_v0 = vld [vmem:[#allocation10 + $0x1b8] sm:$0xff]  ;;  %v4493_v2 = vcombine.low %v1300_v53, %v1304_v54  ;;  %v1356_v54 = vld [vmem:[#allocation10 + $0x310] sm:$0xff] }
 0x3da   :  { %2909 = vmatprep.subr.bf16.mxu0 %v4698_v3  ;;  %2995 = vmatprep.subr.bf16.mxu1 %v4700_v4  ;;  %v4495_v3 = vcombine.low %v1301_v55, %v1305_v56  ;;  %v4502_v4 = vcombine.high %v1308_v60, %v1312_v61  ;;  %v4504_v22 = vcombine.high %v1309_v62, %v1313_v0  ;;  %v1360_v55 = vld [vmem:[#allocation10 + $0x330] sm:$0xff]  ;;  %v1357_v56 = vld [vmem:[#allocation10 + $0x318] sm:$0xff] }
 0x3dd   :  { %2910 = vmatpush1.bf16.msra.mxu0 %v4697_v25  ;;  %2996 = vmatpush1.bf16.msra.mxu1 %v4699_v50  ;;  %v1321_v25 = vld [vmem:[#allocation10 + $0x1f8] sm:$0xff]  ;;  %v4501_v50 = vcombine.low %v1308_v60, %v1312_v61  ;;  %v1364_v61 = vld [vmem:[#allocation10 + $0x350] sm:$0xff] }
 0x3de   :  { %3008 = vmatprep.subr.bf16.mxu0 %v4454_v57  ;;  %3094 = vmatprep.subr.bf16.mxu1 %v4456_v29  ;;  %v4503_v57 = vcombine.low %v1309_v62, %v1313_v0  ;;  %v4510_v29 = vcombine.high %v1316_v24, %v1320_v35  ;;  %v4512_v11 = vcombine.high %v1317_v49, %v1321_v25  ;;  %v1368_v62 = vld [vmem:[#allocation10 + $0x370] sm:$0xff]  ;;  %v1365_v0 = vld [vmem:[#allocation10 + $0x358] sm:$0xff] }
 0x3e0   :  { %2912 = vmatmul.mubr.bf16.vlgmr.msra.gmra.mrb[8].mxu0 %v5654_v5  ;;  %2998 = vmatmul.mubr.bf16.vlgmr.msra.gmra.mrb[8].mxu1 %v5654_v5 }
 0x3e1   :  { %3009 = vmatpush1.bf16.msra.mxu0 %v4453_v16  ;;  %3040 = vmatprep.mubr.bf16.mxu0 %v5643_v41  ;;  %v1329_v16 = vld [vmem:[#allocation10 + $0x238] sm:$0xff] }
 0x3e2   :  { %3095 = vmatpush1.bf16.msra.mxu1 %v4455_v17  ;;  %3126 = vmatprep.mubr.bf16.mxu1 %v5643_v41  ;;  %v1293_v41 = vld [vmem:[#allocation10 + $0x118] sm:$0xff]  ;;  %v4509_v17 = vcombine.low %v1316_v24, %v1320_v35  ;;  %v4520_v40 = vcombine.high %v1325_v15, %v1329_v16  ;;  %v1372_v35 = vld [vmem:[#allocation10 + $0x390] sm:$0xff] }
 0x3e3   :  { %3010 = vmatprep.subr.bf16.mxu0 %v4462_v34  ;;  %3096 = vmatprep.subr.bf16.mxu1 %v4464_v30  ;;  %v4488_v52 = vcombine.high %v1293_v41, %v1297_v38  ;;  %v4487_v46 = vcombine.low %v1293_v41, %v1297_v38  ;;  %v4511_v34 = vcombine.low %v1317_v49, %v1321_v25  ;;  %v1352_v41 = vld [vmem:[#allocation10 + $0x2f0] sm:$0xff]  ;;  %v1349_v38 = vld [vmem:[#allocation10 + $0x2d8] sm:$0xff] }
 0x3e4   :  { %v4518_v30 = vcombine.high %v1324_v12, %v1328_v13  ;;  %v1376_v49 = vld [vmem:[#allocation10 + $0x3b0] sm:$0xff]  ;;  %v1373_v25 = vld [vmem:[#allocation10 + $0x398] sm:$0xff] }
 0x3e5   :  { %3011 = vmatpush1.bf16.msra.mxu0 %v4461_v1  ;;  %v1337_v1 = vld [vmem:[#allocation10 + $0x278] sm:$0xff] }
 0x3e6   :  { %3097 = vmatpush1.bf16.msra.mxu1 %v4463_v6  ;;  %3012 = vmatprep.subr.bf16.mxu0 %v4470_v7  ;;  %v4517_v6 = vcombine.low %v1324_v12, %v1328_v13  ;;  %v4519_v7 = vcombine.low %v1325_v15, %v1329_v16  ;;  %v4528_v9 = vcombine.high %v1333_v63, %v1337_v1  ;;  %v1380_v13 = vld [vmem:[#allocation10 + $0x3d0] sm:$0xff]  ;;  %v1381_v16 = vld [vmem:[#allocation10 + $0x3d8] sm:$0xff] }
 0x3e7   :  { %3098 = vmatprep.subr.bf16.mxu1 %v4472_v8  ;;  %v4526_v8 = vcombine.high %v1332_v47, %v1336_v33  ;;  %v1384_v15 = vld [vmem:[#allocation10 + $0x3f0] sm:$0xff] }
 0x3e9   :  { %3013 = vmatpush1.bf16.msra.mxu0 %v4469_v20  ;;  %v1345_v20 = vld [vmem:[#allocation10 + $0x2b8] sm:$0xff] }
 0x3ea   :  { %3099 = vmatpush1.bf16.msra.mxu1 %v4471_v23  ;;  %3014 = vmatprep.subr.bf16.mxu0 %v4478_v27  ;;  %v4525_v23 = vcombine.low %v1332_v47, %v1336_v33  ;;  %v4527_v27 = vcombine.low %v1333_v63, %v1337_v1  ;;  %v4536_v31 = vcombine.high %v1341_v18, %v1345_v20  ;;  %v1388_v33 = vld [vmem:[#allocation10 + $0x410] sm:$0xff]  ;;  %v1389_v1 = vld [vmem:[#allocation10 + $0x418] sm:$0xff] }
 0x3eb   :  { %3100 = vmatprep.subr.bf16.mxu1 %v4480_v28  ;;  %v4534_v28 = vcombine.high %v1340_v10, %v1344_v14  ;;  %v1392_v63 = vld [vmem:[#allocation10 + $0x430] sm:$0xff] }
 0x3ed   :  { %3015 = vmatpush1.bf16.msra.mxu0 %v4477_v42  ;;  %v1353_v42 = vld [vmem:[#allocation10 + $0x2f8] sm:$0xff] }
 0x3ee   :  { %3101 = vmatpush1.bf16.msra.mxu1 %v4479_v44  ;;  %3016 = vmatprep.subr.bf16.mxu0 %v4486_v51  ;;  %v4533_v44 = vcombine.low %v1340_v10, %v1344_v14  ;;  %v4535_v51 = vcombine.low %v1341_v18, %v1345_v20  ;;  %v4544_v53 = vcombine.high %v1349_v38, %v1353_v42  ;;  %v1396_v14 = vld [vmem:[#allocation10 + $0x450] sm:$0xff] }
 0x3ef   :  { %3102 = vmatprep.subr.bf16.mxu1 %v4488_v52  ;;  %v4542_v52 = vcombine.high %v1348_v32, %v1352_v41  ;;  %v1400_v18 = vld [vmem:[#allocation10 + $0x470] sm:$0xff]  ;;  %v4581_v20 = vcombine.low %v1388_v33, %v1392_v63 }
 0x3f1   :  { %3017 = vmatpush1.bf16.msra.mxu0 %v4485_v58  ;;  %v1361_v58 = vld [vmem:[#allocation10 + $0x338] sm:$0xff] }
 0x3f2   :  { %3103 = vmatpush1.bf16.msra.mxu1 %v4487_v46  ;;  %3018 = vmatprep.subr.bf16.mxu0 %v4494_v45  ;;  %v4541_v46 = vcombine.low %v1348_v32, %v1352_v41  ;;  %v4543_v45 = vcombine.low %v1349_v38, %v1353_v42  ;;  %v4552_v60 = vcombine.high %v1357_v56, %v1361_v58  ;;  %v1404_v32 = vld [vmem:[#allocation10 + $0x490] sm:$0xff]  ;;  %v1405_v42 = vld [vmem:[#allocation10 + $0x498] sm:$0xff] }
 0x3f3   :  { %3104 = vmatprep.subr.bf16.mxu1 %v4496_v59  ;;  %v4550_v59 = vcombine.high %v1356_v54, %v1360_v55  ;;  %v1408_v41 = vld [vmem:[#allocation10 + $0x4b0] sm:$0xff] }
 0x3f5   :  { %3019 = vmatpush1.bf16.msra.mxu0 %v4493_v2  ;;  %v1369_v2 = vld [vmem:[#allocation10 + $0x378] sm:$0xff] }
 0x3f6   :  { %3105 = vmatpush1.bf16.msra.mxu1 %v4495_v3  ;;  %3020 = vmatprep.subr.bf16.mxu0 %v4502_v4  ;;  %v4549_v3 = vcombine.low %v1356_v54, %v1360_v55  ;;  %v4551_v4 = vcombine.low %v1357_v56, %v1361_v58  ;;  %v4560_v24 = vcombine.high %v1365_v0, %v1369_v2  ;;  %v1412_v55 = vld [vmem:[#allocation10 + $0x4d0] sm:$0xff]  ;;  %v1413_v58 = vld [vmem:[#allocation10 + $0x4d8] sm:$0xff] }
 0x3f7   :  { %3106 = vmatprep.subr.bf16.mxu1 %v4504_v22  ;;  %v4558_v22 = vcombine.high %v1364_v61, %v1368_v62  ;;  %v1416_v56 = vld [vmem:[#allocation10 + $0x4f0] sm:$0xff] }
 0x3f9   :  { %3021 = vmatpush1.bf16.msra.mxu0 %v4501_v50  ;;  %v1377_v50 = vld [vmem:[#allocation10 + $0x3b8] sm:$0xff] }
 0x3fa   :  { %3107 = vmatpush1.bf16.msra.mxu1 %v4503_v57  ;;  %3022 = vmatprep.subr.bf16.mxu0 %v4510_v29  ;;  %v4557_v57 = vcombine.low %v1364_v61, %v1368_v62  ;;  %v4559_v29 = vcombine.low %v1365_v0, %v1369_v2  ;;  %v4568_v12 = vcombine.high %v1373_v25, %v1377_v50  ;;  %v1420_v61 = vld [vmem:[#allocation10 + $0x510] sm:$0xff]  ;;  %v1421_v0 = vld [vmem:[#allocation10 + $0x518] sm:$0xff] }
 0x3fb   :  { %3108 = vmatprep.subr.bf16.mxu1 %v4512_v11  ;;  %v4566_v11 = vcombine.high %v1372_v35, %v1376_v49  ;;  %v1424_v62 = vld [vmem:[#allocation10 + $0x530] sm:$0xff]  ;;  %v1425_v2 = vld [vmem:[#allocation10 + $0x538] sm:$0xff] }
 0x3fd   :  { %3023 = vmatpush1.bf16.msra.mxu0 %v4509_v17  ;;  %v1385_v17 = vld [vmem:[#allocation10 + $0x3f8] sm:$0xff] }
 0x3fe   :  { %3109 = vmatpush1.bf16.msra.mxu1 %v4511_v34  ;;  %3024 = vmatprep.subr.bf16.mxu0 %v4518_v30  ;;  %v4565_v34 = vcombine.low %v1372_v35, %v1376_v49  ;;  %v4567_v30 = vcombine.low %v1373_v25, %v1377_v50  ;;  %v4576_v47 = vcombine.high %v1381_v16, %v1385_v17  ;;  %v1432_v35 = vld [vmem:[#allocation10 + $0x570] sm:$0xff]  ;;  %v1429_v49 = vld [vmem:[#allocation10 + $0x558] sm:$0xff] }
 0x3ff   :  { %3110 = vmatprep.subr.bf16.mxu1 %v4520_v40  ;;  %v4574_v40 = vcombine.high %v1380_v13, %v1384_v15  ;;  %v1433_v25 = vld [vmem:[#allocation10 + $0x578] sm:$0xff]  ;;  %v4613_v50 = vcombine.low %v1420_v61, %v1424_v62 }
 0x401   :  { %3025 = vmatpush1.bf16.msra.mxu0 %v4517_v6  ;;  %v1393_v6 = vld [vmem:[#allocation10 + $0x438] sm:$0xff] }
 0x402   :  { %3111 = vmatpush1.bf16.msra.mxu1 %v4519_v7  ;;  %3026 = vmatprep.subr.bf16.mxu0 %v4526_v8  ;;  %v4573_v7 = vcombine.low %v1380_v13, %v1384_v15  ;;  %v4575_v8 = vcombine.low %v1381_v16, %v1385_v17  ;;  %v4584_v10 = vcombine.high %v1389_v1, %v1393_v6  ;;  %v1440_v13 = vld [vmem:[#allocation10 + $0x5b0] sm:$0xff]  ;;  %v1437_v15 = vld [vmem:[#allocation10 + $0x598] sm:$0xff] }
 0x403   :  { %3112 = vmatprep.subr.bf16.mxu1 %v4528_v9  ;;  %v4582_v9 = vcombine.high %v1388_v33, %v1392_v63  ;;  %v1441_v16 = vld [vmem:[#allocation10 + $0x5b8] sm:$0xff]  ;;  %v1448_v33 = vld [vmem:[#allocation10 + $0x5f0] sm:$0xff] }
 0x404   :  { %v1445_v63 = vld [vmem:[#allocation10 + $0x5d8] sm:$0xff] }
 0x405   :  { %3027 = vmatpush1.bf16.msra.mxu0 %v4525_v23  ;;  %v1397_v23 = vld [vmem:[#allocation10 + $0x458] sm:$0xff] }
 0x406   :  { %3113 = vmatpush1.bf16.msra.mxu1 %v4527_v27  ;;  %3028 = vmatprep.subr.bf16.mxu0 %v4534_v28  ;;  %v1401_v27 = vld [vmem:[#allocation10 + $0x478] sm:$0xff]  ;;  %v4583_v28 = vcombine.low %v1389_v1, %v1393_v6 }
 0x407   :  { %3114 = vmatprep.subr.bf16.mxu1 %v4536_v31  ;;  %v4590_v31 = vcombine.high %v1396_v14, %v1400_v18  ;;  %v4592_v38 = vcombine.high %v1397_v23, %v1401_v27  ;;  %v1449_v1 = vld [vmem:[#allocation10 + $0x5f8] sm:$0xff] }
 0x409   :  { %3029 = vmatpush1.bf16.msra.mxu0 %v4533_v44  ;;  %v1409_v44 = vld [vmem:[#allocation10 + $0x4b8] sm:$0xff] }
 0x40a   :  { %3115 = vmatpush1.bf16.msra.mxu1 %v4535_v51  ;;  %3030 = vmatprep.subr.bf16.mxu0 %v4542_v52  ;;  %v4589_v51 = vcombine.low %v1396_v14, %v1400_v18  ;;  %v4591_v52 = vcombine.low %v1397_v23, %v1401_v27  ;;  %v4600_v54 = vcombine.high %v1405_v42, %v1409_v44  ;;  %v1456_v14 = vld [vmem:[#allocation10 + $0x630] sm:$0xff]  ;;  %v1453_v18 = vld [vmem:[#allocation10 + $0x618] sm:$0xff] }
 0x40b   :  { %3116 = vmatprep.subr.bf16.mxu1 %v4544_v53  ;;  %v4598_v53 = vcombine.high %v1404_v32, %v1408_v41  ;;  %v4639_v27 = vcombine.low %v1445_v63, %v1449_v1 }
 0x40d   :  { %3031 = vmatpush1.bf16.msra.mxu0 %v4541_v46  ;;  %v1417_v46 = vld [vmem:[#allocation10 + $0x4f8] sm:$0xff] }
 0x40e   :  { %3117 = vmatpush1.bf16.msra.mxu1 %v4543_v45  ;;  %3032 = vmatprep.subr.bf16.mxu0 %v4550_v59  ;;  %v4597_v45 = vcombine.low %v1404_v32, %v1408_v41  ;;  %v4606_v59 = vcombine.high %v1412_v55, %v1416_v56  ;;  %v1460_v32 = vld [vmem:[#allocation10 + $0x650] sm:$0xff] }
 0x40f   :  { %3118 = vmatprep.subr.bf16.mxu1 %v4552_v60  ;;  %v4608_v60 = vcombine.high %v1413_v58, %v1417_v46  ;;  %v1464_v41 = vld [vmem:[#allocation10 + $0x670] sm:$0xff] }
 0x411   :  { %3033 = vmatpush1.bf16.msra.mxu0 %v4549_v3  ;;  %v4607_v3 = vcombine.low %v1413_v58, %v1417_v46  ;;  %v1473_v58 = vld [vmem:[#allocation10 + $0x6b8] sm:$0xff]  ;;  %v4653_v46 = vcombine.low %v1460_v32, %v1464_v41 }
 0x412   :  { %3119 = vmatpush1.bf16.msra.mxu1 %v4551_v4  ;;  %3034 = vmatprep.subr.bf16.mxu0 %v4558_v22  ;;  %v4614_v4 = vcombine.high %v1420_v61, %v1424_v62  ;;  %v4616_v22 = vcombine.high %v1421_v0, %v1425_v2  ;;  %v1480_v61 = vld [vmem:[#allocation10 + $0x6f0] sm:$0xff]  ;;  %v1477_v62 = vld [vmem:[#allocation10 + $0x6d8] sm:$0xff] }
 0x413   :  { %3120 = vmatprep.subr.bf16.mxu1 %v4560_v24  ;;  %v1428_v24 = vld [vmem:[#allocation10 + $0x550] sm:$0xff] }
 0x414   :  { %v4621_v17 = vcombine.low %v1428_v24, %v1432_v35 }
 0x415   :  { %3035 = vmatpush1.bf16.msra.mxu0 %v4557_v57  ;;  %v4615_v57 = vcombine.low %v1421_v0, %v1425_v2  ;;  %v1481_v0 = vld [vmem:[#allocation10 + $0x6f8] sm:$0xff] }
 0x416   :  { %3121 = vmatpush1.bf16.msra.mxu1 %v4559_v29  ;;  %3036 = vmatprep.subr.bf16.mxu0 %v4566_v11  ;;  %v4622_v29 = vcombine.high %v1428_v24, %v1432_v35  ;;  %v4624_v11 = vcombine.high %v1429_v49, %v1433_v25  ;;  %v1488_v24 = vld [vmem:[#allocation10 + $0x730] sm:$0xff]  ;;  %v1485_v35 = vld [vmem:[#allocation10 + $0x718] sm:$0xff] }
 0x417   :  { %3122 = vmatprep.subr.bf16.mxu1 %v4568_v12  ;;  %v1436_v12 = vld [vmem:[#allocation10 + $0x590] sm:$0xff] }
 0x418   :  { %v4629_v6 = vcombine.low %v1436_v12, %v1440_v13 }
 0x419   :  { %3037 = vmatpush1.bf16.msra.mxu0 %v4565_v34  ;;  %v4623_v34 = vcombine.low %v1429_v49, %v1433_v25  ;;  %v1489_v49 = vld [vmem:[#allocation10 + $0x738] sm:$0xff] }
 0x41a   :  { %3123 = vmatpush1.bf16.msra.mxu1 %v4567_v30  ;;  %3038 = vmatprep.subr.bf16.mxu0 %v4574_v40  ;;  %v4630_v30 = vcombine.high %v1436_v12, %v1440_v13  ;;  %v4632_v40 = vcombine.high %v1437_v15, %v1441_v16  ;;  %v1496_v12 = vld [vmem:[#allocation10 + $0x770] sm:$0xff]  ;;  %v1493_v13 = vld [vmem:[#allocation10 + $0x758] sm:$0xff] }
 0x41b   :  { %3124 = vmatprep.subr.bf16.mxu1 %v4576_v47  ;;  %v1444_v47 = vld [vmem:[#allocation10 + $0x5d0] sm:$0xff] }
 0x41c   :  { %v4637_v23 = vcombine.low %v1444_v47, %v1448_v33 }
 0x41d   :  { %3039 = vmatpush1.bf16.msra.mxu0 %v4573_v7  ;;  %v4631_v7 = vcombine.low %v1437_v15, %v1441_v16  ;;  %v1497_v15 = vld [vmem:[#allocation10 + $0x778] sm:$0xff] }
 0x41e   :  { %3125 = vmatpush1.bf16.msra.mxu1 %v4575_v8  ;;  %3051 = vmatprep.subr.bf16.mxu0 %v4582_v9  ;;  %v4638_v8 = vcombine.high %v1444_v47, %v1448_v33  ;;  %v4640_v9 = vcombine.high %v1445_v63, %v1449_v1  ;;  %v1504_v47 = vld [vmem:[#allocation10 + $0x7b0] sm:$0xff]  ;;  %v1501_v33 = vld [vmem:[#allocation10 + $0x798] sm:$0xff] }
 0x41f   :  { %3137 = vmatprep.subr.bf16.mxu1 %v4584_v10  ;;  %v1452_v10 = vld [vmem:[#allocation10 + $0x610] sm:$0xff]  ;;  %v1505_v63 = vld [vmem:[#allocation10 + $0x7b8] sm:$0xff] }
 0x420   :  { %3041 = vmatmul.mubr.bf16.vlgmr.msra.gmra.mrb[12].mxu0 %v5647_v43 }
 0x421   :  { %3127 = vmatmul.mubr.bf16.vlgmr.msra.gmra.mrb[12].mxu1 %v5647_v43  ;;  %3052 = vmatpush1.bf16.msra.mxu0 %v4581_v20  ;;  %v4599_v43 = vcombine.low %v1405_v42, %v1409_v44  ;;  %v1457_v20 = vld [vmem:[#allocation10 + $0x638] sm:$0xff]  ;;  %v4645_v44 = vcombine.low %v1452_v10, %v1456_v14 }
 0x422   :  { %3083 = vmatprep.mubr.bf16.mxu0 %v5645_v48  ;;  %3138 = vmatpush1.bf16.msra.mxu1 %v4583_v28  ;;  %v4646_v28 = vcombine.high %v1452_v10, %v1456_v14  ;;  %v1465_v42 = vld [vmem:[#allocation10 + $0x678] sm:$0xff]  ;;  %v1512_v10 = vld [vmem:[#allocation10 + $0x7f0] sm:$0xff] }
 0x423   :  { %3169 = vmatprep.mubr.bf16.mxu1 %v5645_v48  ;;  %3053 = vmatprep.subr.bf16.mxu0 %v4590_v31  ;;  %v4605_v48 = vcombine.low %v1412_v55, %v1416_v56  ;;  %v4648_v31 = vcombine.high %v1453_v18, %v1457_v20  ;;  %v1472_v55 = vld [vmem:[#allocation10 + $0x6b0] sm:$0xff]  ;;  %v1469_v56 = vld [vmem:[#allocation10 + $0x698] sm:$0xff] }
 0x424   :  { %3139 = vmatprep.subr.bf16.mxu1 %v4592_v38  ;;  %v1461_v38 = vld [vmem:[#allocation10 + $0x658] sm:$0xff] }
 0x425   :  { %3054 = vmatpush1.bf16.msra.mxu0 %v4589_v51  ;;  %v4647_v51 = vcombine.low %v1453_v18, %v1457_v20  ;;  %v1509_v14 = vld [vmem:[#allocation10 + $0x7d8] sm:$0xff] }
 0x426   :  { %3140 = vmatpush1.bf16.msra.mxu1 %v4591_v52  ;;  %3055 = vmatprep.subr.bf16.mxu0 %v4598_v53  ;;  %v4654_v52 = vcombine.high %v1460_v32, %v1464_v41  ;;  %v4656_v53 = vcombine.high %v1461_v38, %v1465_v42  ;;  %v1513_v18 = vld [vmem:[#allocation10 + $0x7f8] sm:$0xff] }
 0x427   :  { %3141 = vmatprep.subr.bf16.mxu1 %v4600_v54  ;;  %v1468_v54 = vld [vmem:[#allocation10 + $0x690] sm:$0xff]  ;;  %v4703_v32 = vcombine.low %v1509_v14, %v1513_v18  ;;  %v5677_v41 = vld [vmem:[%s5920_s12] sm:$0xff] }
 0x428   :  { %v4661_v2 = vcombine.low %v1468_v54, %v1472_v55 }
 0x429   :  { %3056 = vmatpush1.bf16.msra.mxu0 %v4597_v45  ;;  %v4655_v45 = vcombine.low %v1461_v38, %v1465_v42  ;;  %v1519_v38 = vrot.slane %v5677_v41, %v5518_v37  ;;  %v1527_v42 = vrot.slane %v5677_v41, %v5562_v19 }
 0x42a   :  { %3142 = vmatpush1.bf16.msra.mxu1 %v4599_v43  ;;  %3057 = vmatprep.subr.bf16.mxu0 %v4606_v59  ;;  %v4662_v43 = vcombine.high %v1468_v54, %v1472_v55  ;;  %v4664_v59 = vcombine.high %v1469_v56, %v1473_v58 }
 0x42b   :  { %3143 = vmatprep.subr.bf16.mxu1 %v4608_v60  ;;  %v1476_v60 = vld [vmem:[#allocation10 + $0x6d0] sm:$0xff] }
 0x42c   :  { %v4669_v25 = vcombine.low %v1476_v60, %v1480_v61 }
 0x42d   :  { %3058 = vmatpush1.bf16.msra.mxu0 %v4605_v48  ;;  %v4663_v48 = vcombine.low %v1469_v56, %v1473_v58 }
 0x42e   :  { %3144 = vmatpush1.bf16.msra.mxu1 %v4607_v3  ;;  %3059 = vmatprep.subr.bf16.mxu0 %v4614_v4  ;;  %v4670_v3 = vcombine.high %v1476_v60, %v1480_v61  ;;  %v4672_v4 = vcombine.high %v1477_v62, %v1481_v0 }
 0x42f   :  { %3145 = vmatprep.subr.bf16.mxu1 %v4616_v22  ;;  %v1484_v22 = vld [vmem:[#allocation10 + $0x710] sm:$0xff] }
 0x430   :  { %v4677_v16 = vcombine.low %v1484_v22, %v1488_v24 }
 0x431   :  { %3060 = vmatpush1.bf16.msra.mxu0 %v4613_v50  ;;  %v4671_v50 = vcombine.low %v1477_v62, %v1481_v0 }
 0x432   :  { %3146 = vmatpush1.bf16.msra.mxu1 %v4615_v57  ;;  %3061 = vmatprep.subr.bf16.mxu0 %v4622_v29  ;;  %v4678_v57 = vcombine.high %v1484_v22, %v1488_v24  ;;  %v4680_v29 = vcombine.high %v1485_v35, %v1489_v49 }
 0x433   :  { %3147 = vmatprep.subr.bf16.mxu1 %v4624_v11  ;;  %v1492_v11 = vld [vmem:[#allocation10 + $0x750] sm:$0xff] }
 0x434   :  { %v4685_v1 = vcombine.low %v1492_v11, %v1496_v12 }
 0x435   :  { %3062 = vmatpush1.bf16.msra.mxu0 %v4621_v17  ;;  %v4679_v17 = vcombine.low %v1485_v35, %v1489_v49 }
 0x436   :  { %3148 = vmatpush1.bf16.msra.mxu1 %v4623_v34  ;;  %3063 = vmatprep.subr.bf16.mxu0 %v4630_v30  ;;  %v4686_v34 = vcombine.high %v1492_v11, %v1496_v12  ;;  %v4688_v30 = vcombine.high %v1493_v13, %v1497_v15 }
 0x437   :  { %3149 = vmatprep.subr.bf16.mxu1 %v4632_v40  ;;  %v1500_v40 = vld [vmem:[#allocation10 + $0x790] sm:$0xff] }
 0x438   :  { %v4693_v20 = vcombine.low %v1500_v40, %v1504_v47 }
 0x439   :  { %3064 = vmatpush1.bf16.msra.mxu0 %v4629_v6  ;;  %v4687_v6 = vcombine.low %v1493_v13, %v1497_v15 }
 0x43a   :  { %3150 = vmatpush1.bf16.msra.mxu1 %v4631_v7  ;;  %3065 = vmatprep.subr.bf16.mxu0 %v4638_v8  ;;  %v4694_v7 = vcombine.high %v1500_v40, %v1504_v47  ;;  %v4696_v8 = vcombine.high %v1501_v33, %v1505_v63 }
 0x43b   :  { %3151 = vmatprep.subr.bf16.mxu1 %v4640_v9  ;;  %v1508_v9 = vld [vmem:[#allocation10 + $0x7d0] sm:$0xff] }
 0x43d   :  { %3066 = vmatpush1.bf16.msra.mxu0 %v4637_v23  ;;  %v4695_v23 = vcombine.low %v1501_v33, %v1505_v63 }
 0x43e   :  { %3152 = vmatpush1.bf16.msra.mxu1 %v4639_v27  ;;  %3067 = vmatprep.subr.bf16.mxu0 %v4646_v28  ;;  %v4702_v27 = vcombine.high %v1508_v9, %v1512_v10  ;;  %v4704_v28 = vcombine.high %v1509_v14, %v1513_v18 }
 0x43f   :  { %3153 = vmatprep.subr.bf16.mxu1 %v4648_v31  ;;  %v4701_v31 = vcombine.low %v1508_v9, %v1512_v10 }
 0x441   :  { %3068 = vmatpush1.bf16.msra.mxu0 %v4645_v44  ;;  %v5685_v44 = vrot.slane %v5677_v41, %v5521_v39 }
 0x442   :  { %3154 = vmatpush1.bf16.msra.mxu1 %v4647_v51  ;;  %3069 = vmatprep.subr.bf16.mxu0 %v4654_v52  ;;  %v5689_v51 = vrot.slane %v5677_v41, %v5568_v21 }
 0x443   :  { %3155 = vmatprep.subr.bf16.mxu1 %v4656_v53 }
 0x445   :  { %3070 = vmatpush1.bf16.msra.mxu0 %v4653_v46 }
 0x446   :  { %3156 = vmatpush1.bf16.msra.mxu1 %v4655_v45  ;;  %3071 = vmatprep.subr.bf16.mxu0 %v4662_v43 }
 0x447   :  { %3157 = vmatprep.subr.bf16.mxu1 %v4664_v59 }
 0x449   :  { %3072 = vmatpush1.bf16.msra.mxu0 %v4661_v2 }
 0x44a   :  { %3158 = vmatpush1.bf16.msra.mxu1 %v4663_v48  ;;  %3073 = vmatprep.subr.bf16.mxu0 %v4670_v3 }
 0x44b   :  { %3159 = vmatprep.subr.bf16.mxu1 %v4672_v4 }
 0x44d   :  { %3074 = vmatpush1.bf16.msra.mxu0 %v4669_v25 }
 0x44e   :  { %3160 = vmatpush1.bf16.msra.mxu1 %v4671_v50  ;;  %3075 = vmatprep.subr.bf16.mxu0 %v4678_v57 }
 0x44f   :  { %3161 = vmatprep.subr.bf16.mxu1 %v4680_v29 }
 0x451   :  { %3076 = vmatpush1.bf16.msra.mxu0 %v4677_v16 }
 0x452   :  { %3162 = vmatpush1.bf16.msra.mxu1 %v4679_v17  ;;  %3077 = vmatprep.subr.bf16.mxu0 %v4686_v34 }
 0x453   :  { %3163 = vmatprep.subr.bf16.mxu1 %v4688_v30 }
 0x455   :  { %3078 = vmatpush1.bf16.msra.mxu0 %v4685_v1 }
 0x456   :  { %3164 = vmatpush1.bf16.msra.mxu1 %v4687_v6  ;;  %3079 = vmatprep.subr.bf16.mxu0 %v4694_v7 }
 0x457   :  { %3165 = vmatprep.subr.bf16.mxu1 %v4696_v8 }
 0x459   :  { %3080 = vmatpush1.bf16.msra.mxu0 %v4693_v20 }
 0x45a   :  { %3166 = vmatpush1.bf16.msra.mxu1 %v4695_v23  ;;  %3081 = vmatprep.subr.bf16.mxu0 %v4702_v27 }
 0x45b   :  { %3167 = vmatprep.subr.bf16.mxu1 %v4704_v28 }
 0x45d   :  { %3082 = vmatpush1.bf16.msra.mxu0 %v4701_v31 }
 0x45e   :  { %3168 = vmatpush1.bf16.msra.mxu1 %v4703_v32 }
 0x460   :  { %3084 = vmatmul.mubr.bf16.vlgmr.msra.gmra.mrb[12].mxu0 %v5654_v5 }
 0x461   :  { %3170 = vmatmul.mubr.bf16.vlgmr.msra.gmra.mrb[12].mxu1 %v5654_v5 }
 0x4b3   :  { %v2913_v5 = vpop.f32.mrb[8].mxu0  ;;  %v2999_v52 = vpop.f32.mrb[8].mxu1 }
 0x4b4   :  { %v5691_v53 = vadd.f32 %v2913_v5, %v1519_v38  ;;  %v5693_v54 = vadd.f32 %v2999_v52, %v1527_v42  ;;  %v2915_v55 = vpop.f32.mrb[9].mxu0  ;;  %v3001_v56 = vpop.f32.mrb[9].mxu1 }
 0x4b5   :  { %v5696_v58 = vadd.f32 %v2915_v55, %v5685_v44  ;;  %v5699_v46 = vadd.f32 %v3001_v56, %v5689_v51  ;;  %v2917_v45 = vpop.f32.mrb[10].mxu0  ;;  %v3003_v43 = vpop.f32.mrb[10].mxu1 }
 0x4b6   :  { %5934 = vst [vmem:[#allocation17_spill] sm:$0xff] %v5691_v53  ;;  %5935 = vst [vmem:[#allocation18_spill] sm:$0xff] %v5693_v54  ;;  %v3180_v59 = vsel %vm149_vm4, %v5691_v53, 0.0  ;;  %v3182_v60 = vsel %vm149_vm4, %v5693_v54, 0.0  ;;  %v5707_v61 = vadd.f32 %v2917_v45, %v1519_v38  ;;  %v5709_v62 = vadd.f32 %v3003_v43, %v1527_v42  ;;  %v5711_v0 = vpop.f32.mrb[11].mxu0  ;;  %v5713_v2 = vpop.f32.mrb[11].mxu1 }
 0x4b7   :  { %v3197_v48 = vrot.slane %v3180_v59, 4  ;;  %v3252_v3 = vmul.f32 %v3180_v59, %v3180_v59  ;;  %v3211_v4 = vrot.slane %v3182_v60, 4  ;;  %v3254_v22 = vmul.f32 %v3182_v60, %v3182_v60 }
 0x4b8   :  { %5936 = vst [vmem:[#allocation19_spill] sm:$0xff] %v5707_v61  ;;  %5937 = vst [vmem:[#allocation20_spill] sm:$0xff] %v5709_v62  ;;  %v3181_v24 = vsel %vm149_vm4, %v5696_v58, 0.0  ;;  %v3183_v35 = vsel %vm149_vm4, %v5699_v46, 0.0 }
 0x4b9   :  { %v3198_v49 = vadd.f32 %v3197_v48, %v3180_v59  ;;  %v3269_v25 = vrot.slane %v3252_v3, 4  ;;  %v3212_v50 = vadd.f32 %v3211_v4, %v3182_v60  ;;  %v3283_v57 = vrot.slane %v3254_v22, 4 }
 0x4ba   :  { %v3204_v29 = vrot.slane %v3181_v24, 4  ;;  %v3253_v11 = vmul.f32 %v3181_v24, %v3181_v24  ;;  %v3218_v12 = vrot.slane %v3183_v35, 4  ;;  %v3255_v13 = vmul.f32 %v3183_v35, %v3183_v35 }
 0x4bb   :  { %v3199_v15 = vrot.slane %v3198_v49, 2  ;;  %v3270_v16 = vadd.f32 %v3269_v25, %v3252_v3  ;;  %v3213_v17 = vrot.slane %v3212_v50, 2  ;;  %v3284_v34 = vadd.f32 %v3283_v57, %v3254_v22 }
 0x4bc   :  { %v3205_v30 = vadd.f32 %v3204_v29, %v3181_v24  ;;  %v3276_v40 = vrot.slane %v3253_v11, 4  ;;  %v3219_v47 = vadd.f32 %v3218_v12, %v3183_v35  ;;  %v3290_v33 = vrot.slane %v3255_v13, 4 }
 0x4bd   :  { %v3200_v63 = vadd.f32 %v3199_v15, %v3198_v49  ;;  %v3271_v1 = vrot.slane %v3270_v16, 2  ;;  %v3214_v6 = vadd.f32 %v3213_v17, %v3212_v50  ;;  %v3285_v7 = vrot.slane %v3284_v34, 2 }
 0x4be   :  { %v3206_v8 = vrot.slane %v3205_v30, 2  ;;  %v3277_v9 = vadd.f32 %v3276_v40, %v3253_v11  ;;  %v3220_v10 = vrot.slane %v3219_v47, 2  ;;  %v3291_v14 = vadd.f32 %v3290_v33, %v3255_v13 }
 0x4bf   :  { %v3201_v18 = vrot.slane %v3200_v63, 1  ;;  %v3272_v20 = vadd.f32 %v3271_v1, %v3270_v16  ;;  %v3215_v23 = vrot.slane %v3214_v6, 1  ;;  %v3286_v27 = vadd.f32 %v3285_v7, %v3284_v34 }
 0x4c0   :  { %v3207_v28 = vadd.f32 %v3206_v8, %v3205_v30  ;;  %v3278_v31 = vrot.slane %v3277_v9, 2  ;;  %v3221_v32 = vadd.f32 %v3220_v10, %v3219_v47  ;;  %v3292_v38 = vrot.slane %v3291_v14, 2 }
 0x4c1   :  { %v3202_v42 = vadd.f32 %v3201_v18, %v3200_v63  ;;  %v3273_v5 = vrot.slane %v3272_v20, 1  ;;  %v3216_v52 = vadd.f32 %v3215_v23, %v3214_v6  ;;  %v3287_v55 = vrot.slane %v3286_v27, 1 }
 0x4c2   :  { %v3208_v56 = vrot.slane %v3207_v28, 1  ;;  %v3279_v45 = vadd.f32 %v3278_v31, %v3277_v9  ;;  %v3222_v43 = vrot.slane %v3221_v32, 1  ;;  %v3293_v59 = vadd.f32 %v3292_v38, %v3291_v14  ;;  %v5043_v38 = vld [vmem:[#allocation12 + $0xc0] sm:$0xff]  }
 0x4c3   :  { %v3274_v60 = vadd.f32 %v3273_v5, %v3272_v20  ;;  %v5721_v48 = vmul.f32 0.5, %v3202_v42  ;;  %v3288_v3 = vadd.f32 %v3287_v55, %v3286_v27  ;;  %v5723_v4 = vmul.f32 0.5, %v3216_v52  ;;  %v5044_v42 = vld [vmem:[#allocation12] sm:$0xff]   ;;  %4795 = vmatprep.subr.bf16.mxu1 %v5043_v38  ;;  %v5046_v52 = vld [vmem:[#allocation12 + $0x48] sm:$0xff]  }
 0x4c4   :  { %v3209_v22 = vadd.f32 %v3208_v56, %v3207_v28  ;;  %v3280_v24 = vrot.slane %v3279_v45, 1  ;;  %v3223_v35 = vadd.f32 %v3222_v43, %v3221_v32  ;;  %v3294_v49 = vrot.slane %v3293_v59, 1  ;;  %v5042_v32 = vld [vmem:[#allocation12 + $0x40] sm:$0xff]   ;;  %v5047_v55 = vld [vmem:[#allocation12 + $0xc8] sm:$0xff]   ;;  %v5050_v43 = vld [vmem:[#allocation12 + $0x50] sm:$0xff]  }
 0x4c5   :  { %v3332_v25 = vmul.f32 0.5, %v3274_v60  ;;  %v3340_v50 = vmul.f32 %v5721_v48, %v5721_v48  ;;  %v3334_v57 = vmul.f32 0.5, %v3288_v3  ;;  %v3342_v29 = vmul.f32 %v5723_v4, %v5723_v4  ;;  %v5045_v5 = vld [vmem:[#allocation12 + $0x80] sm:$0xff]   ;;  %4773 = vmatprep.subr.bf16.mxu0 %v5042_v32  ;;  %v5048_v56 = vld [vmem:[#allocation12 + $0x8] sm:$0xff]   ;;  %v5052_v60 = vld [vmem:[#allocation12 + $0x10] sm:$0xff]  }
 0x4c6   :  { %v3281_v11 = vadd.f32 %v3280_v24, %v3279_v45  ;;  %v5729_v12 = vmul.f32 0.5, %v3209_v22  ;;  %v3295_v13 = vadd.f32 %v3294_v49, %v3293_v59  ;;  %v5731_v15 = vmul.f32 0.5, %v3223_v35  ;;  %4774 = vmatpush3.bf16.msra.mxu0 %v5044_v42  ;;  %4796 = vmatpush3.bf16.msra.mxu1 %v5045_v5  ;;  %v5049_v45 = vld [vmem:[#allocation12 + $0x88] sm:$0xff]   ;;  %v5051_v59 = vld [vmem:[#allocation12 + $0xd0] sm:$0xff]   ;;  %v5054_v22 = vld [vmem:[#allocation12 + $0x58] sm:$0xff]  }
 0x4c7   :  { %v3348_v16 = vsub.f32 %v3332_v25, %v3340_v50  ;;  %v3350_v17 = vsub.f32 %v3334_v57, %v3342_v29  ;;  %4775 = vmatprep.subr.bf16.mxu0 %v5046_v52  ;;  %4797 = vmatprep.subr.bf16.mxu1 %v5047_v55  ;;  %v5053_v3 = vld [vmem:[#allocation12 + $0x90] sm:$0xff]   ;;  %v5055_v24 = vld [vmem:[#allocation12 + $0xd8] sm:$0xff]   ;;  %v5058_v25 = vld [vmem:[#allocation12 + $0x60] sm:$0xff]  }
 0x4c8   :  { %v3333_v34 = vmul.f32 0.5, %v3281_v11  ;;  %v3341_v30 = vmul.f32 %v5729_v12, %v5729_v12  ;;  %v3335_v40 = vmul.f32 0.5, %v3295_v13  ;;  %v3343_v47 = vmul.f32 %v5731_v15, %v5731_v15  ;;  %v5056_v35 = vld [vmem:[#allocation12 + $0x18] sm:$0xff]   ;;  %v5059_v50 = vld [vmem:[#allocation12 + $0xe0] sm:$0xff]   ;;  %v5062_v11 = vld [vmem:[#allocation12 + $0x68] sm:$0xff]  }
 0x4c9   :  { %v3357_v33 = vadd.f32 0.8, %v3348_v16  ;;  %v3359_v63 = vadd.f32 0.8, %v3350_v17  ;;  %v5057_v49 = vld [vmem:[#allocation12 + $0x98] sm:$0xff]   ;;  %v5060_v57 = vld [vmem:[#allocation12 + $0x20] sm:$0xff]  }
 0x4ca   :  { %v3349_v1 = vsub.f32 %v3333_v34, %v3341_v30  ;;  %v3351_v6 = vsub.f32 %v3335_v40, %v3343_v47  ;;  %4776 = vmatpush3.bf16.msra.mxu0 %v5048_v56  ;;  %4798 = vmatpush3.bf16.msra.mxu1 %v5049_v45  ;;  %v5061_v29 = vld [vmem:[#allocation12 + $0xa0] sm:$0xff]   ;;  %v5063_v13 = vld [vmem:[#allocation12 + $0xe8] sm:$0xff]   ;;  %v5066_v34 = vld [vmem:[#allocation12 + $0x70] sm:$0xff]  }
 0x4cb   :  { %5118 = vrsqrt.f32 %v3357_v33  ;;  %4777 = vmatprep.subr.bf16.mxu0 %v5050_v43  ;;  %4799 = vmatprep.subr.bf16.mxu1 %v5051_v59  ;;  %v5064_v16 = vld [vmem:[#allocation12 + $0x28] sm:$0xff]   ;;  %v5067_v30 = vld [vmem:[#allocation12 + $0xf0] sm:$0xff]   ;;  %v5070_v33 = vld [vmem:[#allocation12 + $0x78] sm:$0xff]  }
 0x4cc   :  { %v3358_v7 = vadd.f32 0.8, %v3349_v1  ;;  %v3360_v8 = vadd.f32 0.8, %v3351_v6  ;;  %5120 = vrsqrt.f32 %v3359_v63  ;;  %v5065_v17 = vld [vmem:[#allocation12 + $0xa8] sm:$0xff]   ;;  %v5068_v40 = vld [vmem:[#allocation12 + $0x30] sm:$0xff]  }
 0x4cd   :  { %v5069_v47 = vld [vmem:[#allocation12 + $0xb0] sm:$0xff]   ;;  %v5071_v63 = vld [vmem:[#allocation12 + $0xf8] sm:$0xff]  }
 0x4ce   :  { %5122 = vrsqrt.f32 %v3358_v7  ;;  %4778 = vmatpush3.bf16.msra.mxu0 %v5052_v60  ;;  %4800 = vmatpush3.bf16.msra.mxu1 %v5053_v3  ;;  %v5072_v1 = vld [vmem:[#allocation12 + $0x38] sm:$0xff]   ;;  %v5074_v7 = vld [vmem:[#allocation12 + $0x140] sm:$0xff]  }
 0x4cf   :  { %5124 = vrsqrt.f32 %v3360_v8  ;;  %4779 = vmatprep.subr.bf16.mxu0 %v5054_v22  ;;  %4801 = vmatprep.subr.bf16.mxu1 %v5055_v24  ;;  %v5073_v6 = vld [vmem:[#allocation12 + $0xb8] sm:$0xff]   ;;  %v5075_v8 = vld [vmem:[#allocation12 + $0x1c0] sm:$0xff]  }
 0x4d2   :  { %4780 = vmatpush3.bf16.msra.mxu0 %v5056_v35  ;;  %4802 = vmatpush3.bf16.msra.mxu1 %v5057_v49 }
 0x4d3   :  { %4781 = vmatprep.subr.bf16.mxu0 %v5058_v25  ;;  %4803 = vmatprep.subr.bf16.mxu1 %v5059_v50 }
 0x4d5   :  { %v5119_v9 = vpop.eup %5118 }
 0x4d6   :  { %v5121_v10 = vpop.eup %5120  ;;  %4782 = vmatpush3.bf16.msra.mxu0 %v5060_v57  ;;  %4804 = vmatpush3.bf16.msra.mxu1 %v5061_v29 }
 0x4d7   :  { %4783 = vmatprep.subr.bf16.mxu0 %v5062_v11  ;;  %4805 = vmatprep.subr.bf16.mxu1 %v5063_v13 }
 0x4d8   :  { %v5123_v14 = vpop.eup %5122 }
 0x4d9   :  { %v5125_v18 = vpop.eup %5124  ;;  %v3381_v20 = vcombine.low %v5119_v9, %v5123_v14  ;;  %v5746_v9 = vsub.s32 4, %v5515_v36  ;;  %v5752_v14 = vsub.s32 5, %v5515_v36 }
 0x4da   :  { %v3382_v23 = vcombine.low %v5121_v10, %v5125_v18  ;;  %4784 = vmatpush3.bf16.msra.mxu0 %v5064_v16  ;;  %4806 = vmatpush3.bf16.msra.mxu1 %v5065_v17  ;;  %v5749_v10 = vsub.s32 6, %v5515_v36  ;;  %v5755_v18 = vsub.s32 7, %v5515_v36 }
 0x4db   :  { %v5738_v27 = vrot.slane %v3381_v20, %v5534_v26  ;;  %4785 = vmatprep.subr.bf16.mxu0 %v5066_v34  ;;  %4807 = vmatprep.subr.bf16.mxu1 %v5067_v30  ;;  %v1535_v20 = vrot.slane %v5677_v41, %v5746_v9  ;;  %v5763_v32 = vrot.slane %v5677_v41, %v5752_v14 }
 0x4dc   :  { %v5741_v28 = vrot.slane %v3382_v23, %v5534_v26  ;;  %v1543_v23 = vrot.slane %v5677_v41, %v5749_v10  ;;  %v5767_v38 = vrot.slane %v5677_v41, %v5755_v18 }
 0x4de   :  { %4786 = vmatpush3.bf16.msra.mxu0 %v5068_v40  ;;  %4808 = vmatpush3.bf16.msra.mxu1 %v5069_v47 }
 0x4df   :  { %4787 = vmatprep.subr.bf16.mxu0 %v5070_v33  ;;  %4809 = vmatprep.subr.bf16.mxu1 %v5071_v63 }
 0x4e2   :  { %4788 = vmatpush3.bf16.msra.mxu0 %v5072_v1  ;;  %4810 = vmatpush3.bf16.msra.mxu1 %v5073_v6 }
 0x4e3   :  { %4817 = vmatprep.subr.bf16.mxu0 %v5074_v7  ;;  %4839 = vmatprep.subr.bf16.mxu1 %v5075_v8 }
 0x533   :  { %v3085_v42 = vpop.f32.mrb[12].mxu0 }
 0x534   :  { %v5769_v5 = vadd.f32 %v3085_v42, %v1535_v20  ;;  %v3171_v52 = vpop.f32.mrb[12].mxu1  ;;  %v3087_v55 = vpop.f32.mrb[13].mxu0 }
 0x535   :  { %v5771_v56 = vadd.f32 %v3171_v52, %v1543_v23  ;;  %v5774_v45 = vadd.f32 %v3087_v55, %v5763_v32  ;;  %v3173_v43 = vpop.f32.mrb[13].mxu1  ;;  %v3089_v59 = vpop.f32.mrb[14].mxu0 }
 0x536   :  { %v3184_v60 = vsel %vm149_vm4, %v5769_v5, 0.0  ;;  %v5780_v3 = vadd.f32 %v3173_v43, %v5767_v38  ;;  %v5782_v41 = vadd.f32 %v3089_v59, %v1535_v20  ;;  %v3175_v22 = vpop.f32.mrb[14].mxu1  ;;  %v5784_v24 = vpop.f32.mrb[15].mxu0 }
 0x537   :  { %v3225_v35 = vrot.slane %v3184_v60, 4  ;;  %v3256_v49 = vmul.f32 %v3184_v60, %v3184_v60  ;;  %v3186_v25 = vsel %vm149_vm4, %v5771_v56, 0.0  ;;  %v3185_v50 = vsel %vm149_vm4, %v5774_v45, 0.0  ;;  %v5792_v57 = vpop.f32.mrb[15].mxu1 }
 0x538   :  { %v3239_v29 = vrot.slane %v3186_v25, 4  ;;  %v3258_v11 = vmul.f32 %v3186_v25, %v3186_v25  ;;  %v3232_v13 = vrot.slane %v3185_v50, 4  ;;  %v3257_v16 = vmul.f32 %v3185_v50, %v3185_v50 }
 0x539   :  { %v3226_v17 = vadd.f32 %v3225_v35, %v3184_v60  ;;  %v3297_v34 = vrot.slane %v3256_v49, 4  ;;  %v3187_v30 = vsel %vm149_vm4, %v5780_v3, 0.0  ;;  %v5797_v40 = vadd.f32 %v3175_v22, %v1543_v23 }
 0x53a   :  { %v3240_v47 = vadd.f32 %v3239_v29, %v3186_v25  ;;  %v3311_v33 = vrot.slane %v3258_v11, 4  ;;  %v3233_v63 = vadd.f32 %v3232_v13, %v3185_v50  ;;  %v3304_v1 = vrot.slane %v3257_v16, 4 }
 0x53b   :  { %v3227_v6 = vrot.slane %v3226_v17, 2  ;;  %v3298_v7 = vadd.f32 %v3297_v34, %v3256_v49  ;;  %v3246_v8 = vrot.slane %v3187_v30, 4  ;;  %v3259_v20 = vmul.f32 %v3187_v30, %v3187_v30 }
 0x53c   :  { %v3241_v42 = vrot.slane %v3240_v47, 2  ;;  %v3312_v52 = vadd.f32 %v3311_v33, %v3258_v11  ;;  %v3234_v55 = vrot.slane %v3233_v63, 2  ;;  %v3305_v43 = vadd.f32 %v3304_v1, %v3257_v16 }
 0x53d   :  { %v3228_v59 = vadd.f32 %v3227_v6, %v3226_v17  ;;  %v3299_v60 = vrot.slane %v3298_v7, 2  ;;  %v3247_v35 = vadd.f32 %v3246_v8, %v3187_v30  ;;  %v3318_v31 = vrot.slane %v3259_v20, 4 }
 0x53e   :  { %v3242_v36 = vadd.f32 %v3241_v42, %v3240_v47  ;;  %v3313_v54 = vrot.slane %v3312_v52, 2  ;;  %v3235_v23 = vadd.f32 %v3234_v55, %v3233_v63  ;;  %v3306_v22 = vrot.slane %v3305_v43, 2 }
 0x53f   :  { %v3229_v25 = vrot.slane %v3228_v59, 1  ;;  %v3300_v29 = vadd.f32 %v3299_v60, %v3298_v7  ;;  %v3248_v50 = vrot.slane %v3247_v35, 2  ;;  %v3319_v13 = vadd.f32 %v3318_v31, %v3259_v20 }
 0x540   :  { %v3243_v62 = vrot.slane %v3242_v36, 1  ;;  %v3314_v49 = vadd.f32 %v3313_v54, %v3312_v52  ;;  %v3236_v34 = vrot.slane %v3235_v23, 1  ;;  %v3307_v61 = vadd.f32 %v3306_v22, %v3305_v43 }
 0x541   :  { %v3230_v53 = vadd.f32 %v3229_v25, %v3228_v59  ;;  %v3301_v11 = vrot.slane %v3300_v29, 1  ;;  %v3249_v33 = vadd.f32 %v3248_v50, %v3247_v35  ;;  %v3320_v16 = vrot.slane %v3319_v13, 2 }
 0x542   :  { %v3244_v17 = vadd.f32 %v3243_v62, %v3242_v36  ;;  %v3315_v1 = vrot.slane %v3314_v49, 1  ;;  %v3237_v30 = vadd.f32 %v3236_v34, %v3235_v23  ;;  %v3308_v6 = vrot.slane %v3307_v61, 1 }
 0x543   :  { %v3302_v47 = vadd.f32 %v3301_v11, %v3300_v29  ;;  %v3328_v8 = vmul.f32 0.5, %v3230_v53  ;;  %v3250_v63 = vrot.slane %v3249_v33, 1  ;;  %v3321_v42 = vadd.f32 %v3320_v16, %v3319_v13 }
 0x544   :  { %v3316_v55 = vadd.f32 %v3315_v1, %v3314_v49  ;;  %v3330_v7 = vmul.f32 0.5, %v3244_v17  ;;  %v3309_v60 = vadd.f32 %v3308_v6, %v3307_v61  ;;  %v3329_v31 = vmul.f32 0.5, %v3237_v30 }
 0x545   :  { %v3336_v20 = vmul.f32 0.5, %v3302_v47  ;;  %v3344_v54 = vmul.f32 %v3328_v8, %v3328_v8  ;;  %v3251_v52 = vadd.f32 %v3250_v63, %v3249_v33  ;;  %v3322_v43 = vrot.slane %v3321_v42, 1 }
 0x546   :  { %v3338_v59 = vmul.f32 0.5, %v3316_v55  ;;  %v3346_v22 = vmul.f32 %v3330_v7, %v3330_v7  ;;  %v3337_v35 = vmul.f32 0.5, %v3309_v60  ;;  %v3345_v25 = vmul.f32 %v3329_v31, %v3329_v31 }
 0x547   :  { %v3352_v62 = vsub.f32 %v3336_v20, %v3344_v54  ;;  %v3323_v36 = vadd.f32 %v3322_v43, %v3321_v42  ;;  %v3331_v23 = vmul.f32 0.5, %v3251_v52  ;;  %v4880_v53 = vadd.f32 %v5784_v24, %v5763_v32  ;;  %v3356_v20 = vld [vmem:[%s5921_s13] sm:$0xff] }
 0x548   :  { %v3354_v29 = vsub.f32 %v3338_v59, %v3346_v22  ;;  %v3353_v50 = vsub.f32 %v3337_v35, %v3345_v25  ;;  %v4884_v61 = vadd.f32 %v5792_v57, %v5767_v38  ;;  %v5938_v42 = vcombine.low %v5738_v27, %v5741_v28 }
 0x549   :  { %v3361_v13 = vadd.f32 0.8, %v3352_v62  ;;  %v3339_v49 = vmul.f32 0.5, %v3323_v36  ;;  %v3347_v34 = vmul.f32 %v3331_v23, %v3331_v23  ;;  %v4872_v43 = vadd.f32 %v5711_v0, %v5685_v44 }
 0x54a   :  { %v3363_v11 = vadd.f32 0.8, %v3354_v29  ;;  %v3362_v33 = vadd.f32 0.8, %v3353_v50  ;;  %v3421_v55 = vrot.slane %v5938_v42, %v5534_v26  ;;  %v4876_v59 = vadd.f32 %v5713_v2, %v5689_v51  ;;  %v5941_v42 = vld [vmem:[#allocation20_spill] sm:$0xff] }
 0x54b   :  { %5126 = vrsqrt.f32 %v3361_v13  ;;  %v3355_v16 = vsub.f32 %v3339_v49, %v3347_v34 }
 0x54c   :  { %5128 = vrsqrt.f32 %v3363_v11 }
 0x54d   :  { %5130 = vrsqrt.f32 %v3362_v33  ;;  %v3364_v17 = vadd.f32 0.8, %v3355_v16 }
 0x54f   :  { %5132 = vrsqrt.f32 %v3364_v17 }
 0x555   :  { %v5127_v1 = vpop.eup %5126 }
 0x556   :  { %v5129_v30 = vpop.eup %5128 }
 0x557   :  { %v5131_v6 = vpop.eup %5130 }
 0x558   :  { %v3383_v32 = vcombine.low %v5127_v1, %v5131_v6 }
 0x559   :  { %v5133_v24 = vpop.eup %5132 }
 0x55a   :  { %v3405_v47 = vrot.slane %v3383_v32, %v5534_v26  ;;  %v3384_v63 = vcombine.low %v5129_v30, %v5133_v24 }
 0x55c   :  { %v3412_v38 = vrot.slane %v3384_v63, %v5534_v26  ;;  %v5939_v63 = vld [vmem:[#allocation17_spill] sm:$0xff] }
 0x55e   :  { %v3414_v57 = vcombine.low %v3405_v47, %v3412_v38 }
 0x560   :  { %v3428_v60 = vrot.slane %v3414_v57, %v5534_v26  ;;  %v5940_v57 = vld [vmem:[#allocation19_spill] sm:$0xff] }
 0x562   :  { %v3429_v54 = vcombine.low %v3421_v55, %v3428_v60 }
 0x564   :  { %v3431_v52 = vmul.f32 %v3429_v54, %v3356_v20 }
 0x566   :  { %v3437_v22 = vrot.slane %v3431_v52, %v5518_v37  ;;  %v3441_v35 = vrot.slane %v3431_v52, %v5521_v39  ;;  %v3445_v27 = vrot.slane %v3431_v52, %v5562_v19  ;;  %v3449_v28 = vrot.slane %v3431_v52, %v5568_v21 }
 0x567   :  { %v3453_v25 = vrot.slane %v3431_v52, %v5746_v9  ;;  %v3457_v62 = vrot.slane %v3431_v52, %v5752_v14  ;;  %v3461_v36 = vrot.slane %v3431_v52, %v5749_v10  ;;  %v3465_v29 = vrot.slane %v3431_v52, %v5755_v18 }
 0x568   :  { %v3474_v44 = vmul.f32 %v3437_v22, %v5721_v48  ;;  %v3475_v51 = vmul.f32 %v3441_v35, %v5729_v12  ;;  %v3476_v0 = vmul.f32 %v3445_v27, %v5723_v4  ;;  %v3477_v2 = vmul.f32 %v3449_v28, %v5731_v15 }
 0x569   :  { %v3478_v50 = vmul.f32 %v3453_v25, %v3328_v8  ;;  %v3479_v13 = vmul.f32 %v3457_v62, %v3329_v31  ;;  %v3480_v49 = vmul.f32 %v3461_v36, %v3330_v7  ;;  %v3481_v34 = vmul.f32 %v3465_v29, %v3331_v23 }
 0x56a   :  { %v3490_v11 = vcombine.low %v3474_v44, %v3475_v51  ;;  %v3491_v33 = vcombine.low %v3476_v0, %v3477_v2  ;;  %v3548_v16 = vmul.f32 %v5780_v3, %v3465_v29  ;;  %v3545_v17 = vmul.f32 %v5769_v5, %v3453_v25 }
 0x56b   :  { %v3492_v1 = vcombine.low %v3478_v50, %v3479_v13  ;;  %v3493_v30 = vcombine.low %v3480_v49, %v3481_v34  ;;  %v3553_v48 = vmul.f32 %v5782_v41, %v3453_v25  ;;  %v3547_v12 = vmul.f32 %v5771_v56, %v3461_v36 }
 0x56c   :  { %v3500_v4 = vrot.slane %v3490_v11, %v5534_v26  ;;  %v3507_v15 = vrot.slane %v3491_v33, %v5534_v26  ;;  %v3555_v8 = vmul.f32 %v5797_v40, %v3461_v36  ;;  %v3546_v7 = vmul.f32 %v5774_v45, %v3457_v62  ;;  %v5942_v36 = vld [vmem:[#allocation18_spill] sm:$0xff] }
 0x56d   :  { %v3514_v31 = vrot.slane %v3492_v1, %v5534_v26  ;;  %v3521_v3 = vrot.slane %v3493_v30, %v5534_v26  ;;  %v3554_v23 = vmul.f32 %v4880_v53, %v3457_v62  ;;  %v3556_v5 = vmul.f32 %v4884_v61, %v3465_v29  ;;  %v3432_v53 = vld [vmem:[%s5922_s14] sm:$0xff] }
 0x56e   :  { %v3522_v6 = vcombine.low %v3500_v4, %v3507_v15  ;;  %v3542_v32 = vmul.f32 %v5696_v58, %v3441_v35  ;;  %v3550_v41 = vmul.f32 %v4872_v43, %v3441_v35  ;;  %v3544_v56 = vmul.f32 %v5699_v46, %v3449_v28 }
 0x56f   :  { %v3523_v24 = vcombine.low %v3514_v31, %v3521_v3  ;;  %v3552_v47 = vmul.f32 %v4876_v59, %v3449_v28  ;;  %v3541_v38 = vmul.f32 %v5939_v63, %v3437_v22  ;;  %v3549_v40 = vmul.f32 %v5940_v57, %v3437_v22 }
 0x570   :  { %v3530_v45 = vrot.slane %v3522_v6, %v5534_v26  ;;  %v3551_v55 = vmul.f32 %v5941_v42, %v3445_v27 }
 0x571   :  { %v3537_v60 = vrot.slane %v3523_v24, %v5534_v26  ;;  %v5078_v24 = vld [vmem:[#allocation12 + $0x148] sm:$0xff]  }
 0x573   :  { %v3538_v58 = vcombine.low %v3530_v45, %v3537_v60 }
 0x575   :  { %v3540_v61 = vsub.f32 %v3432_v53, %v3538_v58  ;;  %v5079_v53 = vld [vmem:[#allocation12 + $0x1c8] sm:$0xff]  }
 0x576   :  { %v5080_v58 = vld [vmem:[#allocation12 + $0x108] sm:$0xff]  }
 0x577   :  { %v3589_v46 = vrot.slane %v3540_v61, %v5755_v18  ;;  %v3577_v20 = vrot.slane %v3540_v61, %v5746_v9  ;;  %v3585_v54 = vrot.slane %v3540_v61, %v5749_v10  ;;  %v3581_v52 = vrot.slane %v3540_v61, %v5752_v14 }
 0x578   :  { %v3565_v43 = vrot.slane %v3540_v61, %v5521_v39  ;;  %v3573_v59 = vrot.slane %v3540_v61, %v5568_v21  ;;  %v3561_v26 = vrot.slane %v3540_v61, %v5518_v37  ;;  %v3543_v21 = vmul.f32 %v5942_v36, %v3445_v27  ;;  %v5089_v36 = vld [vmem:[#allocation12 + $0x198] sm:$0xff]  }
 0x579   :  { %v5856_v22 = vadd.f32 %v3589_v46, %v3548_v16  ;;  %v5858_v35 = vadd.f32 %v3577_v20, %v3545_v17  ;;  %v5860_v28 = vadd.f32 %v3577_v20, %v3553_v48  ;;  %v5862_v25 = vadd.f32 %v3585_v54, %v3547_v12 }
 0x57a   :  { %v5864_v18 = vadd.f32 %v3585_v54, %v3555_v8  ;;  %v3603_v9 = vadd.f32 %v3581_v52, %v3546_v7  ;;  %v3611_v10 = vadd.f32 %v3581_v52, %v3554_v23  ;;  %v3613_v62 = vadd.f32 %v3589_v46, %v3556_v5  ;;  %v5076_v5 = vld [vmem:[#allocation12 + $0x100] sm:$0xff]   ;;  %v5082_v46 = vld [vmem:[#allocation12 + $0x150] sm:$0xff]  }
 0x57b   :  { %v3637_v14 = vmul.f32 0.2, %v5856_v22  ;;  %v3599_v39 = vadd.f32 %v3565_v43, %v3542_v32  ;;  %v3569_v37 = vrot.slane %v3540_v61, %v5562_v19  ;;  %v5870_v29 = vmul.f32 0.2, %v5860_v28 }
 0x57c   :  { %v5873_v44 = vmul.f32 0.2, %v5864_v18  ;;  %v3643_v51 = vmul.f32 0.2, %v3611_v10  ;;  %v3607_v0 = vadd.f32 %v3565_v43, %v3550_v41  ;;  %v3645_v2 = vmul.f32 0.2, %v3613_v62 }
 0x57d   :  { %vm3615_vm1 = vcmp.gt.f32.partialorder %v3599_v39, 0.0  ;;  %v3631_v50 = vmul.f32 0.2, %v3599_v39  ;;  %v3601_v13 = vadd.f32 %v3573_v59, %v3544_v56  ;;  %vm3626_vm2 = vcmp.gt.f32.partialorder %v5860_v28, 0.0 }
 0x57e   :  { %vm3628_vm3 = vcmp.gt.f32.partialorder %v5864_v18, 0.0  ;;  %vm3623_vm4 = vcmp.gt.f32.partialorder %v3607_v0, 0.0  ;;  %v3639_v27 = vmul.f32 0.2, %v3607_v0  ;;  %v3609_v49 = vadd.f32 %v3573_v59, %v3552_v47  ;;  %v5081_v59 = vld [vmem:[#allocation12 + $0x188] sm:$0xff]  }
 0x57f   :  { %v3598_v19 = vadd.f32 %v3561_v26, %v3541_v38  ;;  %v3647_v34 = vsel %vm3615_vm1, %v3599_v39, %v3631_v50  ;;  %vm3617_vm5 = vcmp.gt.f32.partialorder %v3601_v13, 0.0  ;;  %v3633_v11 = vmul.f32 0.2, %v3601_v13  ;;  %v5077_v38 = vld [vmem:[#allocation12 + $0x180] sm:$0xff]   ;;  %v5099_v50 = vld [vmem:[#allocation12 + $0x1f0] sm:$0xff]  }
 0x580   :  { %v3606_v33 = vadd.f32 %v3561_v26, %v3549_v40  ;;  %v3655_v16 = vsel %vm3623_vm4, %v3607_v0, %v3639_v27  ;;  %vm3625_vm6 = vcmp.gt.f32.partialorder %v3609_v49, 0.0  ;;  %v3641_v17 = vmul.f32 0.2, %v3609_v49  ;;  %v5090_v39 = vld [vmem:[#allocation12 + $0x160] sm:$0xff]   ;;  %v5098_v0 = vld [vmem:[#allocation12 + $0x170] sm:$0xff]   ;;  %v5102_v27 = vld [vmem:[#allocation12 + $0x178] sm:$0xff]  }
 0x581   :  { %vm3614_vm7 = vcmp.gt.f32.partialorder %v3598_v19, 0.0  ;;  %v3663_v1 = vpack.c.bf16 %v3655_v16, %v3647_v34  ;;  %v3649_v30 = vsel %vm3617_vm5, %v3601_v13, %v3633_v11  ;;  %v3630_v48 = vmul.f32 0.2, %v3598_v19  ;;  %v5100_v13 = vld [vmem:[#allocation12 + $0x130] sm:$0xff]   ;;  %v5104_v34 = vld [vmem:[#allocation12 + $0x138] sm:$0xff]  }
 0x582   :  { %vm3622_vm8 = vcmp.gt.f32.partialorder %v3606_v33, 0.0  ;;  %v3657_v12 = vsel %vm3625_vm6, %v3609_v49, %v3641_v17  ;;  %v3638_v4 = vmul.f32 0.2, %v3606_v33  ;;  %v3600_v15 = vadd.f32 %v3569_v37, %v3543_v21  ;;  %v5092_v21 = vld [vmem:[#allocation12 + $0x120] sm:$0xff]   ;;  %v5101_v49 = vld [vmem:[#allocation12 + $0x1b0] sm:$0xff]   ;;  %v5105_v11 = vld [vmem:[#allocation12 + $0x1b8] sm:$0xff]  }
 0x583   :  { %v3608_v8 = vadd.f32 %v3569_v37, %v3551_v55  ;;  %4221 = vmatprep.mubr.bf16.mxu0 %v3663_v1  ;;  %v3665_v7 = vpack.c.bf16 %v3657_v12, %v3649_v30  ;;  %v3646_v31 = vsel %vm3614_vm7, %v3598_v19, %v3630_v48  ;;  %vm3619_vm9 = vcmp.gt.f32.partialorder %v3603_v9, 0.0  ;;  %v5094_v37 = vld [vmem:[#allocation12 + $0x168] sm:$0xff]   ;;  %v5103_v19 = vld [vmem:[#allocation12 + $0x1f8] sm:$0xff]  }
 0x584   :  { %vm3627_vm10 = vcmp.gt.f32.partialorder %v3611_v10, 0.0  ;;  %v3654_v3 = vsel %vm3622_vm8, %v3606_v33, %v3638_v4  ;;  %vm3616_vm11 = vcmp.gt.f32.partialorder %v3600_v15, 0.0  ;;  %v3632_v23 = vmul.f32 0.2, %v3600_v15  ;;  %v4705_v16 = vld [vmem:[%s5924_s16] ss:$0 sm:$0xff] }
 0x585   :  { %vm3624_vm12 = vcmp.gt.f32.partialorder %v3608_v8, 0.0  ;;  %4262 = vmatprep.mubr.bf16.mxu1 %v3665_v7  ;;  %v3662_v6 = vpack.c.bf16 %v3654_v3, %v3646_v31  ;;  %v3640_v32 = vmul.f32 0.2, %v3608_v8  ;;  %v3635_v41 = vmul.f32 0.2, %v3603_v9 }
 0x586   :  { %v3659_v56 = vsel %vm3627_vm10, %v3611_v10, %v3643_v51  ;;  %v3648_v47 = vsel %vm3616_vm11, %v3600_v15, %v3632_v23  ;;  %vm3621_vm13 = vcmp.gt.f32.partialorder %v5856_v22, 0.0  ;;  %vm3629_vm14 = vcmp.gt.f32.partialorder %v3613_v62, 0.0  ;;  %v5096_v51 = vld [vmem:[#allocation12 + $0x128] sm:$0xff]  }
 0x587   :  { %vm3618_vm15 = vcmp.gt.f32.partialorder %v5858_v35, 0.0  ;;  %4222 = vmatmul.mubr.bf16.vlgmr.msra.gmra.mrb[16].mxu0 %v3662_v6  ;;  %v3656_v63 = vsel %vm3624_vm12, %v3608_v8, %v3640_v32  ;;  %v3651_v57 = vsel %vm3619_vm9, %v3603_v9, %v3635_v41  ;;  %v3653_v40 = vsel %vm3621_vm13, %v5856_v22, %v3637_v14  ;;  %v5084_v9 = vld [vmem:[#allocation12 + $0x110] sm:$0xff]   ;;  %v5087_v14 = vld [vmem:[#allocation12 + $0x1d8] sm:$0xff]  }
 0x588   :  { %v3661_v45 = vsel %vm3629_vm14, %v3613_v62, %v3645_v2  ;;  %v3664_v42 = vpack.c.bf16 %v3656_v63, %v3648_v47  ;;  %4818 = vmatpush3.bf16.msra.mxu0 %v5076_v5  ;;  %v3667_v55 = vpack.c.bf16 %v3659_v56, %v3651_v57  ;;  %v3634_v61 = vmul.f32 0.2, %v5858_v35  ;;  %v5085_v62 = vld [vmem:[#allocation12 + $0x190] sm:$0xff]   ;;  %v5097_v2 = vld [vmem:[#allocation12 + $0x1a8] sm:$0xff]  }
 0x589   :  { %v3669_v60 = vpack.c.bf16 %v3661_v45, %v3653_v40  ;;  %4819 = vmatprep.subr.bf16.mxu0 %v5078_v24  ;;  %v5886_v20 = vsel %vm3626_vm2, %v5860_v28, %v5870_v29  ;;  %vm3620_vm0 = vcmp.gt.f32.partialorder %v5862_v25, 0.0  ;;  %v3636_v54 = vmul.f32 0.2, %v5862_v25  ;;  %v5083_v28 = vld [vmem:[#allocation12 + $0x1d0] sm:$0xff]   ;;  %v5093_v29 = vld [vmem:[#allocation12 + $0x1a0] sm:$0xff]  }
 0x58a   :  { %v3660_v52 = vsel %vm3628_vm3, %v5864_v18, %v5873_v44  ;;  %4263 = vmatmul.mubr.bf16.vlgmr.msra.gmra.mrb[16].mxu1 %v3664_v42  ;;  %4303 = vmatprep.mubr.bf16.mxu0 %v3667_v55  ;;  %v3650_v43 = vsel %vm3618_vm15, %v5858_v35, %v3634_v61  ;;  %v5086_v18 = vld [vmem:[#allocation12 + $0x158] sm:$0xff]   ;;  %v5095_v44 = vld [vmem:[#allocation12 + $0x1e8] sm:$0xff]  }
 0x58b   :  { %4840 = vmatpush3.bf16.msra.mxu1 %v5077_v38  ;;  %4344 = vmatprep.mubr.bf16.mxu1 %v3669_v60  ;;  %v3666_v26 = vpack.c.bf16 %v5886_v20, %v3650_v43  ;;  %v3652_v22 = vsel %vm3620_vm0, %v5862_v25, %v3636_v54  ;;  %v5088_v35 = vld [vmem:[#allocation12 + $0x118] sm:$0xff]   ;;  %v5091_v25 = vld [vmem:[#allocation12 + $0x1e0] sm:$0xff]  }
 0x58c   :  { %4841 = vmatprep.subr.bf16.mxu1 %v5079_v53  ;;  %4820 = vmatpush3.bf16.msra.mxu0 %v5080_v58  ;;  %v3668_v10 = vpack.c.bf16 %v3660_v52, %v3652_v22 }
 0x58d   :  { %4821 = vmatprep.subr.bf16.mxu0 %v5082_v46 }
 0x58f   :  { %4842 = vmatpush3.bf16.msra.mxu1 %v5081_v59 }
 0x590   :  { %4843 = vmatprep.subr.bf16.mxu1 %v5083_v28  ;;  %4822 = vmatpush3.bf16.msra.mxu0 %v5084_v9 }
 0x591   :  { %4823 = vmatprep.subr.bf16.mxu0 %v5086_v18 }
 0x593   :  { %4844 = vmatpush3.bf16.msra.mxu1 %v5085_v62 }
 0x594   :  { %4845 = vmatprep.subr.bf16.mxu1 %v5087_v14  ;;  %4824 = vmatpush3.bf16.msra.mxu0 %v5088_v35 }
 0x595   :  { %4825 = vmatprep.subr.bf16.mxu0 %v5090_v39 }
 0x597   :  { %4846 = vmatpush3.bf16.msra.mxu1 %v5089_v36 }
 0x598   :  { %4847 = vmatprep.subr.bf16.mxu1 %v5091_v25  ;;  %4826 = vmatpush3.bf16.msra.mxu0 %v5092_v21 }
 0x599   :  { %4827 = vmatprep.subr.bf16.mxu0 %v5094_v37 }
 0x59b   :  { %4848 = vmatpush3.bf16.msra.mxu1 %v5093_v29 }
 0x59c   :  { %4849 = vmatprep.subr.bf16.mxu1 %v5095_v44  ;;  %4828 = vmatpush3.bf16.msra.mxu0 %v5096_v51 }
 0x59d   :  { %4829 = vmatprep.subr.bf16.mxu0 %v5098_v0 }
 0x59f   :  { %4850 = vmatpush3.bf16.msra.mxu1 %v5097_v2 }
 0x5a0   :  { %4851 = vmatprep.subr.bf16.mxu1 %v5099_v50  ;;  %4830 = vmatpush3.bf16.msra.mxu0 %v5100_v13 }
 0x5a1   :  { %4831 = vmatprep.subr.bf16.mxu0 %v5102_v27 }
 0x5a3   :  { %4852 = vmatpush3.bf16.msra.mxu1 %v5101_v49 }
 0x5a4   :  { %4853 = vmatprep.subr.bf16.mxu1 %v5103_v19  ;;  %4832 = vmatpush3.bf16.msra.mxu0 %v5104_v34 }
 0x5a7   :  { %4854 = vmatpush3.bf16.msra.mxu1 %v5105_v11  ;;  %4304 = vmatmul.mubr.bf16.vlgmr.msra.gmra.mrb[20].mxu0 %v3666_v26 }
 0x5aa   :  { %4345 = vmatmul.mubr.bf16.vlgmr.msra.gmra.mrb[20].mxu1 %v3668_v10 }
 0x65a   :  { %v4789_v33 = vpop.f32.mrb[16].mxu0 }
 0x65b   :  { %v4790_v17 = vpop.f32.mrb[17].mxu0 }
 0x65c   :  { %v4791_v1 = vadd.f32 %v4790_v17, %v4789_v33  ;;  %v4792_v30 = vpop.f32.mrb[18].mxu0 }
 0x65d   :  { %v4811_v48 = vpop.f32.mrb[16].mxu1  ;;  %v4793_v12 = vpop.f32.mrb[19].mxu0 }
 0x65e   :  { %v4224_v4 = vadd.f32 %v4791_v1, %v4705_v16  ;;  %v4812_v15 = vpop.f32.mrb[17].mxu1  ;;  %v4794_v8 = vadd.f32 %v4793_v12, %v4792_v30 }
 0x65f   :  { %v4813_v7 = vadd.f32 %v4812_v15, %v4811_v48  ;;  %v4814_v31 = vpop.f32.mrb[18].mxu1 }
 0x660   :  { %v4227_v3 = vadd.f32 %v4794_v8, %v4705_v16  ;;  %v4815_v23 = vpop.f32.mrb[19].mxu1 }
 0x661   :  { %v4265_v5 = vadd.f32 %v4813_v7, %v4224_v4  ;;  %v4816_v6 = vadd.f32 %v4815_v23, %v4814_v31 }
 0x663   :  { %v4268_v32 = vadd.f32 %v4816_v6, %v4227_v3 }
 0x67a   :  { %v4833_v41 = vpop.f32.mrb[20].mxu0 }
 0x67b   :  { %v4834_v56 = vpop.f32.mrb[21].mxu0 }
 0x67c   :  { %v4835_v24 = vadd.f32 %v4834_v56, %v4833_v41  ;;  %v4836_v47 = vpop.f32.mrb[22].mxu0 }
 0x67d   :  { %v4855_v63 = vpop.f32.mrb[20].mxu1  ;;  %v4837_v38 = vpop.f32.mrb[23].mxu0 }
 0x67e   :  { %v4306_v57 = vadd.f32 %v4835_v24, %v4265_v5  ;;  %v4856_v40 = vpop.f32.mrb[21].mxu1  ;;  %v4838_v45 = vadd.f32 %v4837_v38, %v4836_v47 }
 0x67f   :  { %v4857_v42 = vadd.f32 %v4856_v40, %v4855_v63  ;;  %v4858_v55 = vpop.f32.mrb[22].mxu1 }
 0x680   :  { %v4309_v60 = vadd.f32 %v4838_v45, %v4268_v32  ;;  %v4859_v53 = vpop.f32.mrb[23].mxu1 }
 0x681   :  { %v4347_v58 = vadd.f32 %v4857_v42, %v4306_v57  ;;  %v4860_v61 = vadd.f32 %v4859_v53, %v4858_v55 }
 0x683   :  { %5134 = vtanh.f32 %v4347_v58  ;;  %v4350_v46 = vadd.f32 %v4860_v61, %v4309_v60 }
 0x685   :  { %5136 = vtanh.f32 %v4350_v46 }
 0x68d   :  { %v5135_v20 = vpop.eup %5134 }
 0x68e   :  { %4355 = vst [vmem:[%s5925_s17] sm:$0xff] %v5135_v20 }
 0x68f   :  { %v5137_v54 = vpop.eup %5136 }
 0x690   :  { %4356 = vst [vmem:[%s5925_s17 + $0x8] sm:$0xff] %v5137_v54 }
 0x691   :  { %4361 = vsyncpa [#allocation3], 1 }
 0x692   :  { %4362 = vsyncpa [#allocation5], 1 }
 0x693   :  { %4363 = vsyncpa [#allocation8], 1 }
 0x694   :  { %4364 = vsyncpa [#allocation11], 1 }

</bundles_post_ra>
